<compile_context>
chip_gen: v6e
topology: v6e:2x2x1
jax: 0.10.0
libtpu: 0.0.40
codegen_flags: <defaults>
</compile_context>

<pallas_src>
import functools

import jax
import jax.numpy as jnp
from jax import lax
from jax.experimental import pallas as pl
from jax.experimental.pallas import tpu as pltpu

_EPS = 1e-5


def _round_up(x, m):
    return (x + m - 1) // m * m


def _pick_tile(total, target, quantum):
    """Largest multiple of `quantum` dividing `total`, at most `target`."""
    t = min(total, max(target, quantum))
    t -= t % quantum
    while t > quantum and total % t:
        t -= quantum
    return t


# ---------------------------------------------------------------------------
# Kernel 1: fused 1x1-conv matmul (single K block), M/N tiled, no scratch.
#   y = x @ w + shift ; activation ; store
# ---------------------------------------------------------------------------
def _matmul1x1_kernel(x_ref, w_ref, shift_ref, o_ref, *, act):
    y = jnp.dot(x_ref[...], w_ref[...], preferred_element_type=jnp.float32)
    y = y + shift_ref[...]
    if act == "tanh":
        y = jnp.tanh(y)
    elif act == "log_softmax":
        # Padded class lanes carry shift = -1e30 -> exp underflows to 0 (f32),
        # so the normalization only sees real classes.
        m = jnp.max(y, axis=-1, keepdims=True)
        z = y - m
        y = z - jnp.log(jnp.sum(jnp.exp(z), axis=-1, keepdims=True))
    o_ref[...] = y.astype(o_ref.dtype)


def fused_matmul_1x1(x, w, shift, act="none", out_dtype=jnp.bfloat16,
                     tm_target=1024, tn_target=512):
    """(M, K) @ (K, Np) + shift, fused activation.  Np % 128 == 0, single K
    block (all 1x1 convs in this model have K <= 4096)."""
    M, K = x.shape
    Kw, Np = w.shape
    assert K == Kw and Np % 128 == 0

    # N tiling: log_softmax reduces over N -> one N block.
    tn = Np if act == "log_softmax" else _pick_tile(Np, tn_target, 128)

    # M tiling: single block for small M, else prefer an exact divisor of M.
    if M <= tm_target:
        tm = _round_up(M, 16)
    else:
        tm = 0
        for cand in range(tm_target - tm_target % 16, 15, -16):
            if M % cand == 0:
                tm = cand
                break
        if tm == 0:
            tm = tm_target
    m_pad = _round_up(M, tm)

    x_p = x.astype(jnp.bfloat16)
    if m_pad != M:
        x_p = jnp.pad(x_p, ((0, m_pad - M), (0, 0)))
    shift2 = shift.reshape(1, Np).astype(jnp.float32)

    out = pl.pallas_call(
        functools.partial(_matmul1x1_kernel, act=act),
        out_shape=jax.ShapeDtypeStruct((m_pad, Np), out_dtype),
        grid_spec=pltpu.PrefetchScalarGridSpec(
            num_scalar_prefetch=0,
            grid=(m_pad // tm, Np // tn),
            in_specs=[
                pl.BlockSpec((tm, K), lambda i, j: (i, 0)),
                pl.BlockSpec((K, tn), lambda i, j: (0, j)),
                pl.BlockSpec((1, tn), lambda i, j: (0, j)),
            ],
            out_specs=pl.BlockSpec((tm, tn), lambda i, j: (i, j)),
        ),
        compiler_params=pltpu.CompilerParams(
            dimension_semantics=("parallel", "parallel"),
            vmem_limit_bytes=32 * 1024 * 1024),
    )(x_p, w.astype(jnp.bfloat16), shift2)
    return out[:M] if m_pad != M else out


# ---------------------------------------------------------------------------
# Kernel 2: 3x3 conv with the 9 taps folded into the in-kernel reduction.
# Input is a spatially padded, flattened (rows, C) slab; tap (dh, dw) is a
# constant flattened-row offset, realized by rotating the per-tap matmul
# product (roll(x, s) @ W == roll(x @ W, s)), so only one copy of the
# activation ever lives in HBM.
# ---------------------------------------------------------------------------
def _conv3x3_kernel(x_ref, w_ref, shift_ref, o_ref, acc_ref, *, shifts, act):
    kc = pl.program_id(2)
    x = x_ref[...]

    def tap(t):
        p = jnp.dot(x, w_ref[t], preferred_element_type=jnp.float32)
        if shifts[t]:
            p = pltpu.roll(p, shifts[t], axis=0)
        return p

    @pl.when(kc == 0)
    def _():
        acc_ref[...] = tap(0)          # direct set: no zero-init + add

    @pl.when(kc != 0)
    def _():
        acc_ref[...] += tap(0)

    for t in range(1, 9):
        acc_ref[...] += tap(t)

    @pl.when(kc == pl.num_programs(2) - 1)
    def _():
        y = acc_ref[...] + shift_ref[...]
        if act == "tanh":
            y = jnp.tanh(y)
        o_ref[...] = y.astype(o_ref.dtype)


def conv3x3_rows(x_rows, w_taps, shift, wp, act="tanh",
                 out_dtype=jnp.bfloat16, tn_target=512, tk_target=512,
                 rows_per_block=None):
    """3x3 conv (stride 1, pad 1, BN scale pre-folded) over a padded slab.

    x_rows : (M, Cp) bf16, flattened (n, h_padded, w_padded) rows.  Every
             image carries >= 2 zero pad rows at its top and bottom and one
             zero pad column left/right, so roll wrap-around only touches
             discarded pad outputs.
    w_taps : (9, Cp, Np), tap order (kh, kw).
    wp     : padded row width (W + 2); tap offset = (kh-1)*wp + (kw-1).
    """
    M, Cp = x_rows.shape
    nine, Cw, Np = w_taps.shape
    assert nine == 9 and Cw == Cp and Cp % 128 == 0 and Np % 128 == 0

    tm = M if rows_per_block is None else rows_per_block
    assert M % tm == 0 and (tm % 8 == 0 or tm == M)
    tk = _pick_tile(Cp, tk_target, 128)
    tn = _pick_tile(Np, tn_target, 128)

    offs = [(dh - 1) * wp + (dw - 1) for dh in range(3) for dw in range(3)]
    shifts = tuple((-o) % tm for o in offs)   # result[p] = prod[p + off]

    return pl.pallas_call(
        functools.partial(_conv3x3_kernel, shifts=shifts, act=act),
        out_shape=jax.ShapeDtypeStruct((M, Np), out_dtype),
        grid_spec=pltpu.PrefetchScalarGridSpec(
            num_scalar_prefetch=0,
            grid=(M // tm, Np // tn, Cp // tk),
            in_specs=[
                pl.BlockSpec((tm, tk), lambda i, j, k: (i, k)),
                pl.BlockSpec((9, tk, tn), lambda i, j, k: (0, k, j)),
                pl.BlockSpec((1, tn), lambda i, j, k: (0, j)),
            ],
            out_specs=pl.BlockSpec((tm, tn), lambda i, j, k: (i, j)),
            scratch_shapes=[pltpu.VMEM((tm, tn), jnp.float32)],
        ),
        compiler_params=pltpu.CompilerParams(
            dimension_semantics=("parallel", "parallel", "arbitrary"),
            vmem_limit_bytes=32 * 1024 * 1024),
    )(x_rows.astype(jnp.bfloat16), w_taps.astype(jnp.bfloat16),
      shift.reshape(1, Np).astype(jnp.float32))


# ---------------------------------------------------------------------------
# Plain-JAX glue: padded-slab assembly, pooling / bilinear matrices.
# ---------------------------------------------------------------------------
def _make_slab(parts, n, h, w, cp):
    """Assemble the spatially padded conv input slab directly from its
    sources (no intermediate concat).  2 zero rows on top, >=2 at the bottom
    (rounded so rows-per-image % 8 == 0), 1 zero column left/right."""
    wp = w + 2
    hp = h + 4
    while (hp * wp) % 8:
        hp += 1
    slab = jnp.zeros((n, hp, wp, cp), jnp.bfloat16)
    for arr, c0 in parts:               # arr: (n, h, w, ci) NHWC
        ci = arr.shape[-1]
        slab = slab.at[:, 2:h + 2, 1:w + 1, c0:c0 + ci].set(
            arr.astype(jnp.bfloat16))
    return slab.reshape(n * hp * wp, cp), (hp, wp)


def _extract_valid(rows, n, hp, wp, h, w, c):
    return rows.reshape(n, hp, wp, -1)[:, 2:h + 2, 1:w + 1, :c]


def _group_rows(n_imgs, rows_per_img, target_rows=2048):
    g = max(1, min(n_imgs, target_rows // max(rows_per_img, 1)))
    while n_imgs % g:
        g -= 1
    return g * rows_per_img


def _adaptive_pool_matrix(out_size, in_size):
    """Row matrix reproducing nn.AdaptiveAvgPool2d bin boundaries."""
    i = jnp.arange(out_size)
    starts = (i * in_size) // out_size
    ends = ((i + 1) * in_size + out_size - 1) // out_size
    idx = jnp.arange(in_size)
    mask = (idx[None, :] >= starts[:, None]) & (idx[None, :] < ends[:, None])
    mat = mask.astype(jnp.float32)
    return mat / mat.sum(axis=1, keepdims=True)


def _bilinear_matrix(out_size, in_size):
    """F.interpolate(mode='bilinear', align_corners=False) row matrix."""
    i = jnp.arange(out_size, dtype=jnp.float32)
    src = (i + 0.5) * (in_size / out_size) - 0.5
    src = jnp.maximum(src, 0.0)
    i0 = jnp.minimum(jnp.floor(src).astype(jnp.int32), in_size - 1)
    i1 = jnp.minimum(i0 + 1, in_size - 1)
    frac = src - i0.astype(jnp.float32)
    mat = jnp.zeros((out_size, in_size), jnp.float32)
    mat = mat.at[jnp.arange(out_size), i0].add(1.0 - frac)
    mat = mat.at[jnp.arange(out_size), i1].add(frac)
    return mat


# ---------------------------------------------------------------------------
# Parameters: raw (PyTorch-layout) tensors + kernel-format preparation.
# ---------------------------------------------------------------------------
def init_raw_params(key, num_class, fc_dim, ppm_ch, last_ch, pool_scales):
    keys = iter(jax.random.split(key, 64))

    def conv_w(cout, cin, k):
        return 0.05 * jax.random.normal(next(keys), (cout, cin, k, k),
                                        dtype=jnp.float32)

    def bn(c):
        return dict(
            gamma=jax.random.uniform(next(keys), (c,), minval=0.5, maxval=1.5),
            beta=0.1 * jax.random.normal(next(keys), (c,)),
            mean=0.1 * jax.random.normal(next(keys), (c,)),
            var=jax.random.uniform(next(keys), (c,), minval=0.5, maxval=1.5))

    raw = {"ppm": []}
    for _ in pool_scales:
        raw["ppm"].append(dict(w=conv_w(ppm_ch, fc_dim, 1), bn=bn(ppm_ch)))
    cat_ch = fc_dim + len(pool_scales) * ppm_ch
    raw["cl_w1"] = conv_w(last_ch, cat_ch, 3)
    raw["cl_bn1"] = bn(last_ch)
    raw["cl_w2"] = conv_w(num_class, last_ch, 1)
    raw["cl_b2"] = 0.1 * jax.random.normal(next(keys), (num_class,))
    raw["ds_w"] = conv_w(fc_dim // 4, fc_dim // 2, 3)
    raw["ds_bn"] = bn(fc_dim // 4)
    raw["dsl_w"] = conv_w(num_class, fc_dim // 4, 1)
    raw["dsl_b"] = 0.1 * jax.random.normal(next(keys), (num_class,))
    return raw


def _bn_fold(bn):
    scale = bn["gamma"] / jnp.sqrt(bn["var"] + _EPS)
    return scale, bn["beta"] - bn["mean"] * scale


def prepare_params(raw, num_class, fc_dim, ppm_ch, last_ch, pool_scales):
    p = {}
    # PPM: batch the four 1x1 convs into one weight, BN scale folded in.
    ws, shs = [], []
    for br in raw["ppm"]:
        s, sh = _bn_fold(br["bn"])
        ws.append(br["w"][:, :, 0, 0].T * s[None, :])        # (fc_dim, ppm_ch)
        shs.append(sh)
    ppm_w = jnp.concatenate(ws, axis=1)
    ppm_sh = jnp.concatenate(shs)
    npad = _round_up(ppm_w.shape[1], 128)
    p["ppm_w"] = jnp.pad(ppm_w, ((0, 0), (0, npad - ppm_w.shape[1]))
                         ).astype(jnp.bfloat16)
    p["ppm_shift"] = jnp.pad(ppm_sh, (0, npad - ppm_sh.shape[0]))

    # conv_last 3x3: (9, cat_pad, last_pad), BN scale folded.
    cat_ch = fc_dim + len(pool_scales) * ppm_ch
    cat_pad = _round_up(cat_ch, 128)
    last_pad = _round_up(last_ch, 128)
    s1, sh1 = _bn_fold(raw["cl_bn1"])
    w1 = jnp.transpose(raw["cl_w1"], (2, 3, 1, 0)).reshape(9, cat_ch, last_ch)
    w1 = w1 * s1[None, None, :]
    p["cl_w1"] = jnp.pad(w1, ((0, 0), (0, cat_pad - cat_ch),
                              (0, last_pad - last_ch))).astype(jnp.bfloat16)
    p["cl_shift1"] = jnp.pad(sh1, (0, last_pad - last_ch))

    # conv_last final 1x1 (bias) -> log_softmax (pad lanes masked at -1e30).
    nc_pad = _round_up(num_class, 128)
    w2 = raw["cl_w2"][:, :, 0, 0].T
    p["cl_w2"] = jnp.pad(w2, ((0, last_pad - last_ch),
                              (0, nc_pad - num_class))).astype(jnp.bfloat16)
    p["cl_shift2"] = jnp.concatenate(
        [raw["cl_b2"], jnp.full((nc_pad - num_class,), -1e30, jnp.float32)])

    # cbr_deepsup 3x3.
    c4, ds_ch = fc_dim // 2, fc_dim // 4
    c4_pad = _round_up(c4, 128)
    ds_pad = _round_up(ds_ch, 128)
    sd, shd = _bn_fold(raw["ds_bn"])
    wd = jnp.transpose(raw["ds_w"], (2, 3, 1, 0)).reshape(9, c4, ds_ch)
    wd = wd * sd[None, None, :]
    p["ds_w"] = jnp.pad(wd, ((0, 0), (0, c4_pad - c4),
                             (0, ds_pad - ds_ch))).astype(jnp.bfloat16)
    p["ds_shift"] = jnp.pad(shd, (0, ds_pad - ds_ch))

    # conv_last_deepsup 1x1 (bias) -> log_softmax.
    wdl = raw["dsl_w"][:, :, 0, 0].T
    p["dsl_w"] = jnp.pad(wdl, ((0, ds_pad - ds_ch),
                               (0, nc_pad - num_class))).astype(jnp.bfloat16)
    p["dsl_shift"] = jnp.concatenate(
        [raw["dsl_b"], jnp.full((nc_pad - num_class,), -1e30, jnp.float32)])
    return p


# ---------------------------------------------------------------------------
# PPMDeepsup forward (use_softmax=False path -> (x, deepsup)).
# ---------------------------------------------------------------------------
def ppm_deepsup_forward(conv4, conv5, params, pool_scales, num_class, ppm_ch):
    n, c5, h, w = conv5.shape
    x5 = jnp.transpose(conv5, (0, 2, 3, 1))                  # NHWC f32

    # PPM: adaptive avg pool -> batched 1x1 conv + BN + tanh (Pallas).
    pooled_rows, offs = [], [0]
    for s in pool_scales:
        ph = _adaptive_pool_matrix(s, h)
        pw = _adaptive_pool_matrix(s, w)
        pooled = jnp.einsum("sh,nhwc,tw->nstc", ph, x5, pw)
        pooled_rows.append(pooled.reshape(n * s * s, c5))
        offs.append(offs[-1] + n * s * s)
    pooled_all = jnp.concatenate(pooled_rows, axis=0)
    ppm_feat = fused_matmul_1x1(pooled_all, params["ppm_w"],
                                params["ppm_shift"], act="tanh")

    # Assemble the padded conv_last input slab directly (no concat tensor).
    cat_pad = params["cl_w1"].shape[1]
    parts = [(x5, 0)]
    for i, s in enumerate(pool_scales):
        y = ppm_feat[offs[i]:offs[i + 1], i * ppm_ch:(i + 1) * ppm_ch]
        y = y.reshape(n, s, s, ppm_ch).astype(jnp.float32)
        up = jnp.einsum("hi,nijc,wj->nhwc", _bilinear_matrix(h, s), y,
                        _bilinear_matrix(w, s))
        parts.append((up, c5 + i * ppm_ch))
    rows, (hp, wp) = _make_slab(parts, n, h, w, cat_pad)

    # conv_last: 3x3 conv + BN + tanh (taps folded in-kernel), Dropout2d eval
    # identity, then 1x1 conv (bias) + log_softmax.
    feat = conv3x3_rows(rows, params["cl_w1"], params["cl_shift1"], wp,
                        act="tanh",
                        rows_per_block=_group_rows(n, hp * wp))
    logits = fused_matmul_1x1(feat, params["cl_w2"], params["cl_shift2"],
                              act="log_softmax", out_dtype=jnp.float32)
    x_out = _extract_valid(logits, n, hp, wp, h, w, num_class)
    x_out = jnp.transpose(x_out, (0, 3, 1, 2))

    # Deep-supervision branch on conv4.
    n4, c4, h4, w4 = conv4.shape
    x4 = jnp.transpose(conv4, (0, 2, 3, 1))
    c4_pad = params["ds_w"].shape[1]
    rows4, (hp4, wp4) = _make_slab([(x4, 0)], n4, h4, w4, c4_pad)
    dfeat = conv3x3_rows(rows4, params["ds_w"], params["ds_shift"], wp4,
                         act="tanh",
                         rows_per_block=_group_rows(n4, hp4 * wp4))
    dlogits = fused_matmul_1x1(dfeat, params["dsl_w"], params["dsl_shift"],
                               act="log_softmax", out_dtype=jnp.float32)
    d_out = _extract_valid(dlogits, n4, hp4, wp4, h4, w4, num_class)
    d_out = jnp.transpose(d_out, (0, 3, 1, 2))
    return x_out, d_out


# ---------------------------------------------------------------------------
# Pure-JAX f32 reference of the PyTorch module (for correctness checking).
# ---------------------------------------------------------------------------
def _conv2d_nchw(x, w, padding):
    return lax.conv_general_dilated(x, w, window_strides=(1, 1),
                                    padding=padding,
                                    dimension_numbers=("NCHW", "OIHW", "NCHW"))


def _bn_eval(x, bn):
    s, sh = _bn_fold(bn)
    return x * s[None, :, None, None] + sh[None, :, None, None]


def reference_forward(conv4, conv5, raw, pool_scales):
    n, c5, h, w = conv5.shape
    ppm_out = [conv5]
    for i, s in enumerate(pool_scales):
        ph = _adaptive_pool_matrix(s, h)
        pw = _adaptive_pool_matrix(s, w)
        pooled = jnp.einsum("sh,nchw,tw->ncst", ph, conv5, pw)
        br = raw["ppm"][i]
        y = jnp.tanh(_bn_eval(_conv2d_nchw(pooled, br["w"],
                                           [(0, 0), (0, 0)]), br["bn"]))
        up = jnp.einsum("hi,ncij,wj->nchw", _bilinear_matrix(h, s), y,
                        _bilinear_matrix(w, s))
        ppm_out.append(up)
    cat = jnp.concatenate(ppm_out, axis=1)
    f = jnp.tanh(_bn_eval(_conv2d_nchw(cat, raw["cl_w1"], [(1, 1), (1, 1)]),
                          raw["cl_bn1"]))
    logits = (_conv2d_nchw(f, raw["cl_w2"], [(0, 0), (0, 0)])
              + raw["cl_b2"][None, :, None, None])
    x = jax.nn.log_softmax(logits, axis=1)

    d = jnp.tanh(_bn_eval(_conv2d_nchw(conv4, raw["ds_w"], [(1, 1), (1, 1)]),
                          raw["ds_bn"]))
    dl = (_conv2d_nchw(d, raw["dsl_w"], [(0, 0), (0, 0)])
          + raw["dsl_b"][None, :, None, None])
    return x, jax.nn.log_softmax(dl, axis=1)


# ---------------------------------------------------------------------------
if __name__ == "__main__":
    # Small synthetic configuration (hidden widths scaled down from 512 so the
    # example stays tiny; structure identical to the real module).
    num_class = 16
    fc_dim = 32
    ppm_ch = 16
    last_ch = 16
    pool_scales = (1, 2, 3, 6)
    n, hgt, wid = 2, 12, 12

    key = jax.random.PRNGKey(0)
    kp, k4, k5 = jax.random.split(key, 3)
    raw = init_raw_params(kp, num_class, fc_dim, ppm_ch, last_ch, pool_scales)
    params = prepare_params(raw, num_class, fc_dim, ppm_ch, last_ch,
                            pool_scales)
    conv5 = jax.random.normal(k5, (n, fc_dim, hgt, wid), dtype=jnp.float32)
    conv4 = jax.random.normal(k4, (n, fc_dim // 2, hgt, wid),
                              dtype=jnp.float32)

    fwd = jax.jit(functools.partial(ppm_deepsup_forward,
                                    pool_scales=pool_scales,
                                    num_class=num_class, ppm_ch=ppm_ch))
    x, deepsup = fwd(conv4, conv5, params)
    jax.block_until_ready((x, deepsup))

    assert x.shape == (n, num_class, hgt, wid)
    assert deepsup.shape == (n, num_class, hgt, wid)

    # Correctness vs a pure-JAX f32 reference (bf16 operand tolerance).
    x_ref, d_ref = reference_forward(conv4, conv5, raw, pool_scales)
    err_x = float(jnp.max(jnp.abs(x - x_ref)))
    err_d = float(jnp.max(jnp.abs(deepsup - d_ref)))
    assert err_x < 0.1 and err_d < 0.1, (err_x, err_d)

    # log_softmax sanity: probabilities sum to 1 over the class dim (the
    # -1e30-shifted pad lanes must not perturb the normalization).
    assert bool(jnp.all(jnp.abs(jnp.exp(x).sum(axis=1) - 1.0) < 1e-3))
    assert bool(jnp.all(jnp.abs(jnp.exp(deepsup).sum(axis=1) - 1.0) < 1e-3))
    assert bool(jnp.all(jnp.isfinite(x))) and bool(jnp.all(jnp.isfinite(deepsup)))
    print("KERNEL_OK")
</pallas_src>

<mosaic_0001>
module attributes {stable_mosaic.version = 11 : i64} {
  func.func @_matmul1x1_kernel(%arg0: i32, %arg1: i32, %arg2: memref<112x32xbf16, #tpu.memory_space<vmem>>, %arg3: memref<32x128xbf16, #tpu.memory_space<vmem>>, %arg4: memref<1x128xf32, #tpu.memory_space<vmem>>, %arg5: memref<112x128xbf16, #tpu.memory_space<vmem>>) attributes {dimension_semantics = [#tpu.dimension_semantics<parallel>, #tpu.dimension_semantics<parallel>], iteration_bounds = array<i64: 1, 1>, scalar_prefetch = 0 : i64, scratch_operands = 0 : i64, tpu.core_type = #tpu.core_type<tc>, window_params = [{transform_indices = @transform_0, window_bounds = array<i64: 112, 32>}, {transform_indices = @transform_1, window_bounds = array<i64: 32, 128>}, {transform_indices = @transform_2, window_bounds = array<i64: 1, 128>}, {transform_indices = @transform_3, window_bounds = array<i64: 112, 128>}]} {
    %c0 = arith.constant 0 : index
    %c0_0 = arith.constant 0 : index
    %0 = vector.load %arg2[%c0, %c0_0] : memref<112x32xbf16, #tpu.memory_space<vmem>>, vector<112x32xbf16>
    %c0_1 = arith.constant 0 : index
    %c0_2 = arith.constant 0 : index
    %1 = vector.load %arg3[%c0_1, %c0_2] : memref<32x128xbf16, #tpu.memory_space<vmem>>, vector<32x128xbf16>
    %cst = arith.constant dense<0.000000e+00> : vector<112x128xf32>
    %2 = tpu.matmul %0, %1, %cst {dimension_numbers = #tpu.dot_dimension_numbers<[1], [0], [0], [1], [0, 0, 1, 1], [], []>} : vector<112x32xbf16>, vector<32x128xbf16>, vector<112x128xf32> -> vector<112x128xf32>
    %c0_3 = arith.constant 0 : index
    %c0_4 = arith.constant 0 : index
    %3 = vector.load %arg4[%c0_3, %c0_4] : memref<1x128xf32, #tpu.memory_space<vmem>>, vector<1x128xf32>
    %4 = vector.broadcast %3 : vector<1x128xf32> to vector<112x128xf32>
    %5 = arith.addf %2, %4 : vector<112x128xf32>
    %6 = math.tanh %5 : vector<112x128xf32>
    %7 = arith.truncf %6 : vector<112x128xf32> to vector<112x128xbf16>
    %c0_5 = arith.constant 0 : index
    %c0_6 = arith.constant 0 : index
    %8 = vector.load %arg5[%c0_5, %c0_6] : memref<112x128xbf16, #tpu.memory_space<vmem>>, vector<112x128xbf16>
    tpu.vector_store %arg5[%c0_5, %c0_6], %7 {strides = array<i32>} : memref<112x128xbf16, #tpu.memory_space<vmem>>, vector<112x128xbf16>,
    return
  }
  func.func @transform_0(%arg0: i32, %arg1: i32) -> (i32, i32) {
    %c0_i32 = arith.constant 0 : i32
    %c0_i32_0 = arith.constant 0 : i32
    return %arg0, %c0_i32 : i32, i32
  }
  func.func @transform_1(%arg0: i32, %arg1: i32) -> (i32, i32) {
    %c0_i32 = arith.constant 0 : i32
    %c0_i32_0 = arith.constant 0 : i32
    return %c0_i32, %arg1 : i32, i32
  }
  func.func @transform_2(%arg0: i32, %arg1: i32) -> (i32, i32) {
    %c0_i32 = arith.constant 0 : i32
    %c0_i32_0 = arith.constant 0 : i32
    return %c0_i32, %arg1 : i32, i32
  }
  func.func @transform_3(%arg0: i32, %arg1: i32) -> (i32, i32) {
    %c0_i32 = arith.constant 0 : i32
    return %arg0, %arg1 : i32, i32
  }
}

module attributes {stable_mosaic.version = 11 : i64} {
  func.func @_conv3x3_kernel(%arg0: i32, %arg1: i32, %arg2: i32, %arg3: memref<448x128xbf16, #tpu.memory_space<vmem>>, %arg4: memref<9x128x128xbf16, #tpu.memory_space<vmem>>, %arg5: memref<1x128xf32, #tpu.memory_space<vmem>>, %arg6: memref<448x128xbf16, #tpu.memory_space<vmem>>, %arg7: memref<448x128xf32, #tpu.memory_space<vmem>>) attributes {dimension_semantics = [#tpu.dimension_semantics<parallel>, #tpu.dimension_semantics<parallel>, #tpu.dimension_semantics<arbitrary>], iteration_bounds = array<i64: 1, 1, 1>, scalar_prefetch = 0 : i64, scratch_operands = 1 : i64, tpu.core_type = #tpu.core_type<tc>, window_params = [{transform_indices = @transform_0, window_bounds = array<i64: 448, 128>}, {transform_indices = @transform_1, window_bounds = array<i64: 9, 128, 128>}, {transform_indices = @transform_2, window_bounds = array<i64: 1, 128>}, {transform_indices = @transform_3, window_bounds = array<i64: 448, 128>}]} {
    %c0 = arith.constant 0 : index
    %c0_0 = arith.constant 0 : index
    %0 = vector.load %arg3[%c0, %c0_0] : memref<448x128xbf16, #tpu.memory_space<vmem>>, vector<448x128xbf16>
    %c0_i32 = arith.constant 0 : i32
    %1 = arith.cmpi eq, %arg2, %c0_i32 : i32
    %2 = arith.extui %1 : i1 to i32
    %c0_i32_1 = arith.constant 0 : i32
    %3 = arith.cmpi ne, %2, %c0_i32_1 : i32
    scf.if %3 {
      %c0_61 = arith.constant 0 : index
      %c0_62 = arith.constant 0 : index
      %c0_63 = arith.constant 0 : index
      %65 = vector.load %arg4[%c0_61, %c0_62, %c0_63] : memref<9x128x128xbf16, #tpu.memory_space<vmem>>, vector<1x128x128xbf16>
      %66 = vector.shape_cast %65 : vector<1x128x128xbf16> to vector<128x128xbf16>
      %cst_64 = arith.constant dense<0.000000e+00> : vector<448x128xf32>
      %67 = tpu.matmul %0, %66, %cst_64 {dimension_numbers = #tpu.dot_dimension_numbers<[1], [0], [0], [1], [0, 0, 1, 1], [], []>} : vector<448x128xbf16>, vector<128x128xbf16>, vector<448x128xf32> -> vector<448x128xf32>
      %c15_i32 = arith.constant 15 : i32
      %68 = tpu.dynamic_rotate %67 by %c15_i32 dim 0 : vector<448x128xf32>, i32 -> vector<448x128xf32>
      %c0_65 = arith.constant 0 : index
      %c0_66 = arith.constant 0 : index
      %69 = vector.load %arg7[%c0_65, %c0_66] : memref<448x128xf32, #tpu.memory_space<vmem>>, vector<448x128xf32>
      tpu.vector_store %arg7[%c0_65, %c0_66], %68 {strides = array<i32>} : memref<448x128xf32, #tpu.memory_space<vmem>>, vector<448x128xf32>,
    } else {
    }
    %c0_i32_2 = arith.constant 0 : i32
    %4 = arith.cmpi ne, %arg2, %c0_i32_2 : i32
    %5 = arith.extui %4 : i1 to i32
    %c0_i32_3 = arith.constant 0 : i32
    %6 = arith.cmpi ne, %5, %c0_i32_3 : i32
    scf.if %6 {
      %c0_61 = arith.constant 0 : index
      %c0_62 = arith.constant 0 : index
      %65 = vector.load %arg7[%c0_61, %c0_62] : memref<448x128xf32, #tpu.memory_space<vmem>>, vector<448x128xf32>
      %c0_63 = arith.constant 0 : index
      %c0_64 = arith.constant 0 : index
      %c0_65 = arith.constant 0 : index
      %66 = vector.load %arg4[%c0_63, %c0_64, %c0_65] : memref<9x128x128xbf16, #tpu.memory_space<vmem>>, vector<1x128x128xbf16>
      %67 = vector.shape_cast %66 : vector<1x128x128xbf16> to vector<128x128xbf16>
      %cst_66 = arith.constant dense<0.000000e+00> : vector<448x128xf32>
      %68 = tpu.matmul %0, %67, %cst_66 {dimension_numbers = #tpu.dot_dimension_numbers<[1], [0], [0], [1], [0, 0, 1, 1], [], []>} : vector<448x128xbf16>, vector<128x128xbf16>, vector<448x128xf32> -> vector<448x128xf32>
      %c15_i32 = arith.constant 15 : i32
      %69 = tpu.dynamic_rotate %68 by %c15_i32 dim 0 : vector<448x128xf32>, i32 -> vector<448x128xf32>
      %70 = arith.addf %65, %69 : vector<448x128xf32>
      %c0_67 = arith.constant 0 : index
      %c0_68 = arith.constant 0 : index
      %71 = vector.load %arg7[%c0_67, %c0_68] : memref<448x128xf32, #tpu.memory_space<vmem>>, vector<448x128xf32>
      tpu.vector_store %arg7[%c0_67, %c0_68], %70 {strides = array<i32>} : memref<448x128xf32, #tpu.memory_space<vmem>>, vector<448x128xf32>,
    } else {
    }
    %c0_4 = arith.constant 0 : index
    %c0_5 = arith.constant 0 : index
    %7 = vector.load %arg7[%c0_4, %c0_5] : memref<448x128xf32, #tpu.memory_space<vmem>>, vector<448x128xf32>
    %c1 = arith.constant 1 : index
    %c0_6 = arith.constant 0 : index
    %c0_7 = arith.constant 0 : index
    %8 = vector.load %arg4[%c1, %c0_6, %c0_7] : memref<9x128x128xbf16, #tpu.memory_space<vmem>>, vector<1x128x128xbf16>
    %9 = vector.shape_cast %8 : vector<1x128x128xbf16> to vector<128x128xbf16>
    %cst = arith.constant dense<0.000000e+00> : vector<448x128xf32>
    %10 = tpu.matmul %0, %9, %cst {dimension_numbers = #tpu.dot_dimension_numbers<[1], [0], [0], [1], [0, 0, 1, 1], [], []>} : vector<448x128xbf16>, vector<128x128xbf16>, vector<448x128xf32> -> vector<448x128xf32>
    %c14_i32 = arith.constant 14 : i32
    %11 = tpu.dynamic_rotate %10 by %c14_i32 dim 0 : vector<448x128xf32>, i32 -> vector<448x128xf32>
    %12 = arith.addf %7, %11 : vector<448x128xf32>
    %c0_8 = arith.constant 0 : index
    %c0_9 = arith.constant 0 : index
    %13 = vector.load %arg7[%c0_8, %c0_9] : memref<448x128xf32, #tpu.memory_space<vmem>>, vector<448x128xf32>
    tpu.vector_store %arg7[%c0_8, %c0_9], %12 {strides = array<i32>} : memref<448x128xf32, #tpu.memory_space<vmem>>, vector<448x128xf32>,
    %c0_10 = arith.constant 0 : index
    %c0_11 = arith.constant 0 : index
    %14 = vector.load %arg7[%c0_10, %c0_11] : memref<448x128xf32, #tpu.memory_space<vmem>>, vector<448x128xf32>
    %c2 = arith.constant 2 : index
    %c0_12 = arith.constant 0 : index
    %c0_13 = arith.constant 0 : index
    %15 = vector.load %arg4[%c2, %c0_12, %c0_13] : memref<9x128x128xbf16, #tpu.memory_space<vmem>>, vector<1x128x128xbf16>
    %16 = vector.shape_cast %15 : vector<1x128x128xbf16> to vector<128x128xbf16>
    %cst_14 = arith.constant dense<0.000000e+00> : vector<448x128xf32>
    %17 = tpu.matmul %0, %16, %cst_14 {dimension_numbers = #tpu.dot_dimension_numbers<[1], [0], [0], [1], [0, 0, 1, 1], [], []>} : vector<448x128xbf16>, vector<128x128xbf16>, vector<448x128xf32> -> vector<448x128xf32>
    %c13_i32 = arith.constant 13 : i32
    %18 = tpu.dynamic_rotate %17 by %c13_i32 dim 0 : vector<448x128xf32>, i32 -> vector<448x128xf32>
    %19 = arith.addf %14, %18 : vector<448x128xf32>
    %c0_15 = arith.constant 0 : index
    %c0_16 = arith.constant 0 : index
    %20 = vector.load %arg7[%c0_15, %c0_16] : memref<448x128xf32, #tpu.memory_space<vmem>>, vector<448x128xf32>
    tpu.vector_store %arg7[%c0_15, %c0_16], %19 {strides = array<i32>} : memref<448x128xf32, #tpu.memory_space<vmem>>, vector<448x128xf32>,
    %c0_17 = arith.constant 0 : index
    %c0_18 = arith.constant 0 : index
    %21 = vector.load %arg7[%c0_17, %c0_18] : memref<448x128xf32, #tpu.memory_space<vmem>>, vector<448x128xf32>
    %c3 = arith.constant 3 : index
    %c0_19 = arith.constant 0 : index
    %c0_20 = arith.constant 0 : index
    %22 = vector.load %arg4[%c3, %c0_19, %c0_20] : memref<9x128x128xbf16, #tpu.memory_space<vmem>>, vector<1x128x128xbf16>
    %23 = vector.shape_cast %22 : vector<1x128x128xbf16> to vector<128x128xbf16>
    %cst_21 = arith.constant dense<0.000000e+00> : vector<448x128xf32>
    %24 = tpu.matmul %0, %23, %cst_21 {dimension_numbers = #tpu.dot_dimension_numbers<[1], [0], [0], [1], [0, 0, 1, 1], [], []>} : vector<448x128xbf16>, vector<128x128xbf16>, vector<448x128xf32> -> vector<448x128xf32>
    %c1_i32 = arith.constant 1 : i32
    %25 = tpu.dynamic_rotate %24 by %c1_i32 dim 0 : vector<448x128xf32>, i32 -> vector<448x128xf32>
    %26 = arith.addf %21, %25 : vector<448x128xf32>
    %c0_22 = arith.constant 0 : index
    %c0_23 = arith.constant 0 : index
    %27 = vector.load %arg7[%c0_22, %c0_23] : memref<448x128xf32, #tpu.memory_space<vmem>>, vector<448x128xf32>
    tpu.vector_store %arg7[%c0_22, %c0_23], %26 {strides = array<i32>} : memref<448x128xf32, #tpu.memory_space<vmem>>, vector<448x128xf32>,
    %c0_24 = arith.constant 0 : index
    %c0_25 = arith.constant 0 : index
    %28 = vector.load %arg7[%c0_24, %c0_25] : memref<448x128xf32, #tpu.memory_space<vmem>>, vector<448x128xf32>
    %c4 = arith.constant 4 : index
    %c0_26 = arith.constant 0 : index
    %c0_27 = arith.constant 0 : index
    %29 = vector.load %arg4[%c4, %c0_26, %c0_27] : memref<9x128x128xbf16, #tpu.memory_space<vmem>>, vector<1x128x128xbf16>
    %30 = vector.shape_cast %29 : vector<1x128x128xbf16> to vector<128x128xbf16>
    %cst_28 = arith.constant dense<0.000000e+00> : vector<448x128xf32>
    %31 = tpu.matmul %0, %30, %cst_28 {dimension_numbers = #tpu.dot_dimension_numbers<[1], [0], [0], [1], [0, 0, 1, 1], [], []>} : vector<448x128xbf16>, vector<128x128xbf16>, vector<448x128xf32> -> vector<448x128xf32>
    %32 = arith.addf %28, %31 : vector<448x128xf32>
    %c0_29 = arith.constant 0 : index
    %c0_30 = arith.constant 0 : index
    %33 = vector.load %arg7[%c0_29, %c0_30] : memref<448x128xf32, #tpu.memory_space<vmem>>, vector<448x128xf32>
    tpu.vector_store %arg7[%c0_29, %c0_30], %32 {strides = array<i32>} : memref<448x128xf32, #tpu.memory_space<vmem>>, vector<448x128xf32>,
    %c0_31 = arith.constant 0 : index
    %c0_32 = arith.constant 0 : index
    %34 = vector.load %arg7[%c0_31, %c0_32] : memref<448x128xf32, #tpu.memory_space<vmem>>, vector<448x128xf32>
    %c5 = arith.constant 5 : index
    %c0_33 = arith.constant 0 : index
    %c0_34 = arith.constant 0 : index
    %35 = vector.load %arg4[%c5, %c0_33, %c0_34] : memref<9x128x128xbf16, #tpu.memory_space<vmem>>, vector<1x128x128xbf16>
    %36 = vector.shape_cast %35 : vector<1x128x128xbf16> to vector<128x128xbf16>
    %cst_35 = arith.constant dense<0.000000e+00> : vector<448x128xf32>
    %37 = tpu.matmul %0, %36, %cst_35 {dimension_numbers = #tpu.dot_dimension_numbers<[1], [0], [0], [1], [0, 0, 1, 1], [], []>} : vector<448x128xbf16>, vector<128x128xbf16>, vector<448x128xf32> -> vector<448x128xf32>
    %c447_i32 = arith.constant 447 : i32
    %38 = tpu.dynamic_rotate %37 by %c447_i32 dim 0 : vector<448x128xf32>, i32 -> vector<448x128xf32>
    %39 = arith.addf %34, %38 : vector<448x128xf32>
    %c0_36 = arith.constant 0 : index
    %c0_37 = arith.constant 0 : index
    %40 = vector.load %arg7[%c0_36, %c0_37] : memref<448x128xf32, #tpu.memory_space<vmem>>, vector<448x128xf32>
    tpu.vector_store %arg7[%c0_36, %c0_37], %39 {strides = array<i32>} : memref<448x128xf32, #tpu.memory_space<vmem>>, vector<448x128xf32>,
    %c0_38 = arith.constant 0 : index
    %c0_39 = arith.constant 0 : index
    %41 = vector.load %arg7[%c0_38, %c0_39] : memref<448x128xf32, #tpu.memory_space<vmem>>, vector<448x128xf32>
    %c6 = arith.constant 6 : index
    %c0_40 = arith.constant 0 : index
    %c0_41 = arith.constant 0 : index
    %42 = vector.load %arg4[%c6, %c0_40, %c0_41] : memref<9x128x128xbf16, #tpu.memory_space<vmem>>, vector<1x128x128xbf16>
    %43 = vector.shape_cast %42 : vector<1x128x128xbf16> to vector<128x128xbf16>
    %cst_42 = arith.constant dense<0.000000e+00> : vector<448x128xf32>
    %44 = tpu.matmul %0, %43, %cst_42 {dimension_numbers = #tpu.dot_dimension_numbers<[1], [0], [0], [1], [0, 0, 1, 1], [], []>} : vector<448x128xbf16>, vector<128x128xbf16>, vector<448x128xf32> -> vector<448x128xf32>
    %c435_i32 = arith.constant 435 : i32
    %45 = tpu.dynamic_rotate %44 by %c435_i32 dim 0 : vector<448x128xf32>, i32 -> vector<448x128xf32>
    %46 = arith.addf %41, %45 : vector<448x128xf32>
    %c0_43 = arith.constant 0 : index
    %c0_44 = arith.constant 0 : index
    %47 = vector.load %arg7[%c0_43, %c0_44] : memref<448x128xf32, #tpu.memory_space<vmem>>, vector<448x128xf32>
    tpu.vector_store %arg7[%c0_43, %c0_44], %46 {strides = array<i32>} : memref<448x128xf32, #tpu.memory_space<vmem>>, vector<448x128xf32>,
    %c0_45 = arith.constant 0 : index
    %c0_46 = arith.constant 0 : index
    %48 = vector.load %arg7[%c0_45, %c0_46] : memref<448x128xf32, #tpu.memory_space<vmem>>, vector<448x128xf32>
    %c7 = arith.constant 7 : index
    %c0_47 = arith.constant 0 : index
    %c0_48 = arith.constant 0 : index
    %49 = vector.load %arg4[%c7, %c0_47, %c0_48] : memref<9x128x128xbf16, #tpu.memory_space<vmem>>, vector<1x128x128xbf16>
    %50 = vector.shape_cast %49 : vector<1x128x128xbf16> to vector<128x128xbf16>
    %cst_49 = arith.constant dense<0.000000e+00> : vector<448x128xf32>
    %51 = tpu.matmul %0, %50, %cst_49 {dimension_numbers = #tpu.dot_dimension_numbers<[1], [0], [0], [1], [0, 0, 1, 1], [], []>} : vector<448x128xbf16>, vector<128x128xbf16>, vector<448x128xf32> -> vector<448x128xf32>
    %c434_i32 = arith.constant 434 : i32
    %52 = tpu.dynamic_rotate %51 by %c434_i32 dim 0 : vector<448x128xf32>, i32 -> vector<448x128xf32>
    %53 = arith.addf %48, %52 : vector<448x128xf32>
    %c0_50 = arith.constant 0 : index
    %c0_51 = arith.constant 0 : index
    %54 = vector.load %arg7[%c0_50, %c0_51] : memref<448x128xf32, #tpu.memory_space<vmem>>, vector<448x128xf32>
    tpu.vector_store %arg7[%c0_50, %c0_51], %53 {strides = array<i32>} : memref<448x128xf32, #tpu.memory_space<vmem>>, vector<448x128xf32>,
    %c0_52 = arith.constant 0 : index
    %c0_53 = arith.constant 0 : index
    %55 = vector.load %arg7[%c0_52, %c0_53] : memref<448x128xf32, #tpu.memory_space<vmem>>, vector<448x128xf32>
    %c8 = arith.constant 8 : index
    %c0_54 = arith.constant 0 : index
    %c0_55 = arith.constant 0 : index
    %56 = vector.load %arg4[%c8, %c0_54, %c0_55] : memref<9x128x128xbf16, #tpu.memory_space<vmem>>, vector<1x128x128xbf16>
    %57 = vector.shape_cast %56 : vector<1x128x128xbf16> to vector<128x128xbf16>
    %cst_56 = arith.constant dense<0.000000e+00> : vector<448x128xf32>
    %58 = tpu.matmul %0, %57, %cst_56 {dimension_numbers = #tpu.dot_dimension_numbers<[1], [0], [0], [1], [0, 0, 1, 1], [], []>} : vector<448x128xbf16>, vector<128x128xbf16>, vector<448x128xf32> -> vector<448x128xf32>
    %c433_i32 = arith.constant 433 : i32
    %59 = tpu.dynamic_rotate %58 by %c433_i32 dim 0 : vector<448x128xf32>, i32 -> vector<448x128xf32>
    %60 = arith.addf %55, %59 : vector<448x128xf32>
    %c0_57 = arith.constant 0 : index
    %c0_58 = arith.constant 0 : index
    %61 = vector.load %arg7[%c0_57, %c0_58] : memref<448x128xf32, #tpu.memory_space<vmem>>, vector<448x128xf32>
    tpu.vector_store %arg7[%c0_57, %c0_58], %60 {strides = array<i32>} : memref<448x128xf32, #tpu.memory_space<vmem>>, vector<448x128xf32>,
    %c0_i32_59 = arith.constant 0 : i32
    %62 = arith.cmpi eq, %arg2, %c0_i32_59 : i32
    %63 = arith.extui %62 : i1 to i32
    %c0_i32_60 = arith.constant 0 : i32
    %64 = arith.cmpi ne, %63, %c0_i32_60 : i32
    scf.if %64 {
      %c0_61 = arith.constant 0 : index
      %c0_62 = arith.constant 0 : index
      %65 = vector.load %arg7[%c0_61, %c0_62] : memref<448x128xf32, #tpu.memory_space<vmem>>, vector<448x128xf32>
      %c0_63 = arith.constant 0 : index
      %c0_64 = arith.constant 0 : index
      %66 = vector.load %arg5[%c0_63, %c0_64] : memref<1x128xf32, #tpu.memory_space<vmem>>, vector<1x128xf32>
      %67 = vector.broadcast %66 : vector<1x128xf32> to vector<448x128xf32>
      %68 = arith.addf %65, %67 : vector<448x128xf32>
      %69 = math.tanh %68 : vector<448x128xf32>
      %70 = arith.truncf %69 : vector<448x128xf32> to vector<448x128xbf16>
      %c0_65 = arith.constant 0 : index
      %c0_66 = arith.constant 0 : index
      %71 = vector.load %arg6[%c0_65, %c0_66] : memref<448x128xbf16, #tpu.memory_space<vmem>>, vector<448x128xbf16>
      tpu.vector_store %arg6[%c0_65, %c0_66], %70 {strides = array<i32>} : memref<448x128xbf16, #tpu.memory_space<vmem>>, vector<448x128xbf16>,
    } else {
    }
    return
  }
  func.func @transform_0(%arg0: i32, %arg1: i32, %arg2: i32) -> (i32, i32) {
    %c0_i32 = arith.constant 0 : i32
    return %arg0, %arg2 : i32, i32
  }
  func.func @transform_1(%arg0: i32, %arg1: i32, %arg2: i32) -> (i32, i32, i32) {
    %c0_i32 = arith.constant 0 : i32
    %c0_i32_0 = arith.constant 0 : i32
    return %c0_i32, %arg2, %arg1 : i32, i32, i32
  }
  func.func @transform_2(%arg0: i32, %arg1: i32, %arg2: i32) -> (i32, i32) {
    %c0_i32 = arith.constant 0 : i32
    %c0_i32_0 = arith.constant 0 : i32
    return %c0_i32, %arg1 : i32, i32
  }
  func.func @transform_3(%arg0: i32, %arg1: i32, %arg2: i32) -> (i32, i32) {
    %c0_i32 = arith.constant 0 : i32
    return %arg0, %arg1 : i32, i32
  }
}

module attributes {stable_mosaic.version = 11 : i64} {
  func.func @_matmul1x1_kernel(%arg0: i32, %arg1: i32, %arg2: memref<448x128xbf16, #tpu.memory_space<vmem>>, %arg3: memref<128x128xbf16, #tpu.memory_space<vmem>>, %arg4: memref<1x128xf32, #tpu.memory_space<vmem>>, %arg5: memref<448x128xf32, #tpu.memory_space<vmem>>) attributes {dimension_semantics = [#tpu.dimension_semantics<parallel>, #tpu.dimension_semantics<parallel>], iteration_bounds = array<i64: 1, 1>, scalar_prefetch = 0 : i64, scratch_operands = 0 : i64, tpu.core_type = #tpu.core_type<tc>, window_params = [{transform_indices = @transform_0, window_bounds = array<i64: 448, 128>}, {transform_indices = @transform_1, window_bounds = array<i64: 128, 128>}, {transform_indices = @transform_2, window_bounds = array<i64: 1, 128>}, {transform_indices = @transform_3, window_bounds = array<i64: 448, 128>}]} {
    %c0 = arith.constant 0 : index
    %c0_0 = arith.constant 0 : index
    %0 = vector.load %arg2[%c0, %c0_0] : memref<448x128xbf16, #tpu.memory_space<vmem>>, vector<448x128xbf16>
    %c0_1 = arith.constant 0 : index
    %c0_2 = arith.constant 0 : index
    %1 = vector.load %arg3[%c0_1, %c0_2] : memref<128x128xbf16, #tpu.memory_space<vmem>>, vector<128x128xbf16>
    %cst = arith.constant dense<0.000000e+00> : vector<448x128xf32>
    %2 = tpu.matmul %0, %1, %cst {dimension_numbers = #tpu.dot_dimension_numbers<[1], [0], [0], [1], [0, 0, 1, 1], [], []>} : vector<448x128xbf16>, vector<128x128xbf16>, vector<448x128xf32> -> vector<448x128xf32>
    %c0_3 = arith.constant 0 : index
    %c0_4 = arith.constant 0 : index
    %3 = vector.load %arg4[%c0_3, %c0_4] : memref<1x128xf32, #tpu.memory_space<vmem>>, vector<1x128xf32>
    %4 = vector.broadcast %3 : vector<1x128xf32> to vector<448x128xf32>
    %5 = arith.addf %2, %4 : vector<448x128xf32>
    %cst_5 = arith.constant dense<0xFF800000> : vector<448xf32>
    %6 = vector.multi_reduction <maximumf>, %5, %cst_5 [1] : vector<448x128xf32> to vector<448xf32>
    %7 = vector.shape_cast %6 : vector<448xf32> to vector<448x1xf32>
    %8 = vector.broadcast %7 : vector<448x1xf32> to vector<448x128xf32>
    %9 = arith.subf %5, %8 : vector<448x128xf32>
    %10 = math.exp %9 : vector<448x128xf32>
    %cst_6 = arith.constant dense<0.000000e+00> : vector<448xf32>
    %11 = vector.multi_reduction <add>, %10, %cst_6 [1] : vector<448x128xf32> to vector<448xf32>
    %12 = vector.shape_cast %11 : vector<448xf32> to vector<448x1xf32>
    %13 = math.log %12 : vector<448x1xf32>
    %14 = vector.broadcast %13 : vector<448x1xf32> to vector<448x128xf32>
    %15 = arith.subf %9, %14 : vector<448x128xf32>
    %c0_7 = arith.constant 0 : index
    %c0_8 = arith.constant 0 : index
    %16 = vector.load %arg5[%c0_7, %c0_8] : memref<448x128xf32, #tpu.memory_space<vmem>>, vector<448x128xf32>
    tpu.vector_store %arg5[%c0_7, %c0_8], %15 {strides = array<i32>} : memref<448x128xf32, #tpu.memory_space<vmem>>, vector<448x128xf32>,
    return
  }
  func.func @transform_0(%arg0: i32, %arg1: i32) -> (i32, i32) {
    %c0_i32 = arith.constant 0 : i32
    %c0_i32_0 = arith.constant 0 : i32
    return %arg0, %c0_i32 : i32, i32
  }
  func.func @transform_1(%arg0: i32, %arg1: i32) -> (i32, i32) {
    %c0_i32 = arith.constant 0 : i32
    %c0_i32_0 = arith.constant 0 : i32
    return %c0_i32, %arg1 : i32, i32
  }
  func.func @transform_2(%arg0: i32, %arg1: i32) -> (i32, i32) {
    %c0_i32 = arith.constant 0 : i32
    %c0_i32_0 = arith.constant 0 : i32
    return %c0_i32, %arg1 : i32, i32
  }
  func.func @transform_3(%arg0: i32, %arg1: i32) -> (i32, i32) {
    %c0_i32 = arith.constant 0 : i32
    return %arg0, %arg1 : i32, i32
  }
}

</mosaic_0001>

<bundles_post_ra>
// kernel: ppm_deepsup_forward.5
= control target key start
LH: loop header
LB: loop body
LE: loop exit
PB: predicated region body
PF: predicated region fallthrough
CT: control target
= control target key end

     0   :  { %v456_v0 = vmov 0.0   ;;  %vm457_vm0 = vmmov 0   ;;  %vm87_vm1 = vcmask 261120   ;;  %s559_s1 = inlined_call_operand.vmem [shape: bf16[32,128], index: 1, kind: input, shape index: {}]   ;;  %s560_s0 = inlined_call_operand.vmem [shape: bf16[112,32], index: 0, kind: input, shape index: {}]   ;;  %s561_s2 = inlined_call_operand.vmem [shape: f32[1,128], index: 2, kind: input, shape index: {}]   ;;  %s562_s3 = inlined_call_operand.vmem [shape: bf16[112,128], index: 3, kind: output, shape index: {}]  }
   0x1   :  { %381 = vmatprep.subr.bf16.mxu0 %v456_v0  ;;  %v419_v1 = vld [vmem:[%s559_s1 + $0x8] sm:$0xff]   ;;  %413 = vmatprep.subr.bf16.mxu1 %v456_v0  ;;  %v420_v2 = vld [vmem:[%s559_s1] sm:$0xff]   ;;  %v425_v7 = vld [vmem:[%s560_s0 + $0x10] sm:$0xff]  }
   0x2   :  { %385 = vmatprep.mubr.msk.bf16.mxu0 %vm457_vm0, %v456_v0  ;;  %401 = vmatprep.mubr.msk.bf16.mxu1 %vm457_vm0, %v456_v0  ;;  %v421_v3 = vld [vmem:[%s560_s0] sm:$0xff]   ;;  %v423_v5 = vld [vmem:[%s560_s0 + $0x8] sm:$0xff]   ;;  %v426_v8 = vld [vmem:[%s560_s0 + $0x30] sm:$0xff]  }
   0x3   :  { %382 = vmatpush3.bf16.msra.mxu0 %v419_v1  ;;  %415 = vmatpush3.bf16.msra.mxu1 %v419_v1  ;;  %v422_v4 = vld [vmem:[%s560_s0 + $0x20] sm:$0xff]   ;;  %v424_v6 = vld [vmem:[%s560_s0 + $0x28] sm:$0xff]   ;;  %v427_v9 = vld [vmem:[%s560_s0 + $0x18] sm:$0xff]  }
   0x4   :  { %383 = vmatprep.subr.bf16.mxu0 %v456_v0  ;;  %414 = vmatprep.subr.bf16.mxu1 %v456_v0  ;;  %v522_v10 = vld [vmem:[%s561_s2] ss:$0 sm:$0xff] }
   0x7   :  { %384 = vmatpush3.bf16.msra.mxu0 %v420_v2  ;;  %416 = vmatpush3.bf16.msra.mxu1 %v420_v2 }
   0xa   :  { %386 = vmatmul.mubr.msk.bf16.vlgmr.msra.gmra.mxu0 %vm87_vm1, %v421_v3  ;;  %402 = vmatmul.mubr.msk.bf16.vlgmr.msra.gmra.mxu1 %vm87_vm1, %v422_v4 }
   0xb   :  { %389 = vmatprep.mubr.msk.bf16.mxu0 %vm457_vm0, %v456_v0  ;;  %405 = vmatprep.mubr.msk.bf16.mxu1 %vm457_vm0, %v456_v0 }
  0x12   :  { %390 = vmatmul.mubr.msk.bf16.gmra.mxu0 %vm87_vm1, %v423_v5  ;;  %406 = vmatmul.mubr.msk.bf16.gmra.mxu1 %vm87_vm1, %v424_v6 }
  0x13   :  { %393 = vmatprep.mubr.msk.bf16.mxu0 %vm457_vm0, %v456_v0  ;;  %409 = vmatprep.mubr.msk.bf16.mxu1 %vm457_vm0, %v456_v0 }
  0x1a   :  { %394 = vmatmul.mubr.msk.bf16.gmra.mxu0 %vm87_vm1, %v425_v7  ;;  %410 = vmatmul.mubr.msk.bf16.gmra.mxu1 %vm87_vm1, %v426_v8 }
  0x1b   :  { %397 = vmatprep.mubr.msk.bf16.mxu0 %vm457_vm0, %v456_v0 }
  0x22   :  { %398 = vmatmul.mubr.msk.bf16.gmra.mxu0 %vm87_vm1, %v427_v9 }
  0xca   :  { %v143_v11 = vpop.f32.mrf.mxu0  ;;  %v175_v12 = vpop.f32.mrf.mxu1 }
  0xcb   :  { %v144_v13 = vadd.f32 %v522_v10, %v143_v11  ;;  %v176_v15 = vadd.f32 %v522_v10, %v175_v12 }
  0xcc   :  { %v387_v14 = vpop.f32.mrf.mxu0  ;;  %v403_v16 = vpop.f32.mrf.mxu1 }
  0xcd   :  { %428 = vtanh.f32 %v144_v13 }
  0xce   :  { %v146_v17 = vpop.f32.mrf.mxu0  ;;  %v178_v18 = vpop.f32.mrf.mxu1  ;;  %430 = vtanh.f32 %v176_v15 }
  0xcf   :  { %v147_v19 = vadd.f32 %v522_v10, %v146_v17  ;;  %v179_v20 = vadd.f32 %v522_v10, %v178_v18 }
  0xd0   :  { %v388_v21 = vpop.f32.mrf.mxu0  ;;  %v404_v22 = vpop.f32.mrf.mxu1 }
  0xd1   :  { %432 = vtanh.f32 %v147_v19 }
  0xd2   :  { %434 = vtanh.f32 %v179_v20  ;;  %v151_v23 = vpop.f32.mrf.mxu0  ;;  %v183_v24 = vpop.f32.mrf.mxu1 }
  0xd3   :  { %v152_v25 = vadd.f32 %v522_v10, %v151_v23  ;;  %v184_v27 = vadd.f32 %v522_v10, %v183_v24 }
  0xd4   :  { %v391_v26 = vpop.f32.mrf.mxu0  ;;  %v407_v28 = vpop.f32.mrf.mxu1 }
  0xd5   :  { %436 = vtanh.f32 %v152_v25 }
  0xd6   :  { %v154_v29 = vpop.f32.mrf.mxu0  ;;  %v186_v30 = vpop.f32.mrf.mxu1  ;;  %438 = vtanh.f32 %v184_v27 }
  0xd7   :  { %v155_v31 = vadd.f32 %v522_v10, %v154_v29  ;;  %v187_v32 = vadd.f32 %v522_v10, %v186_v30 }
  0xd8   :  { %v392_v33 = vpop.f32.mrf.mxu0  ;;  %v408_v34 = vpop.f32.mrf.mxu1 }
  0xd9   :  { %440 = vtanh.f32 %v155_v31 }
  0xda   :  { %442 = vtanh.f32 %v187_v32  ;;  %v159_v35 = vpop.f32.mrf.mxu0  ;;  %v191_v36 = vpop.f32.mrf.mxu1 }
  0xdb   :  { %v160_v37 = vadd.f32 %v522_v10, %v159_v35  ;;  %v429_v38 = vpop.eup %428  ;;  %v192_v40 = vadd.f32 %v522_v10, %v191_v36 }
  0xdc   :  { %v395_v39 = vpop.f32.mrf.mxu0  ;;  %v411_v41 = vpop.f32.mrf.mxu1 }
  0xdd   :  { %v431_v42 = vpop.eup %430  ;;  %444 = vtanh.f32 %v160_v37 }
  0xde   :  { %v433_v43 = vpop.eup %432  ;;  %v162_v44 = vpop.f32.mrf.mxu0  ;;  %446 = vtanh.f32 %v192_v40 }
  0xdf   :  { %v194_v45 = vpop.f32.mrf.mxu1  ;;  %v435_v46 = vpop.eup %434  ;;  %v334_v47 = vpack.c.bf16 %v433_v43, %v429_v38  ;;  %v163_v48 = vadd.f32 %v522_v10, %v162_v44 }
  0xe0   :  { %v195_v49 = vadd.f32 %v522_v10, %v194_v45  ;;  %v354_v50 = vpack.c.bf16 %v435_v46, %v431_v42  ;;  %v396_v51 = vpop.f32.mrf.mxu0 }
  0xe1   :  { %v412_v52 = vpop.f32.mrf.mxu1  ;;  %335 = vst [vmem:[%s562_s3] sm:$0xff] %v334_v47   ;;  %448 = vtanh.f32 %v163_v48 }
  0xe2   :  { %369 = vst [vmem:[%s562_s3 + $0x20] sm:$0xff] %v354_v50   ;;  %450 = vtanh.f32 %v195_v49  ;;  %v167_v53 = vpop.f32.mrf.mxu0  ;;  %v437_v54 = vpop.eup %436 }
  0xe3   :  { %v168_v55 = vadd.f32 %v522_v10, %v167_v53  ;;  %v439_v57 = vpop.eup %438 }
  0xe4   :  { %v399_v56 = vpop.f32.mrf.mxu0 }
  0xe5   :  { %452 = vtanh.f32 %v168_v55 }
  0xe6   :  { %v441_v58 = vpop.eup %440  ;;  %v170_v59 = vpop.f32.mrf.mxu0 }
  0xe7   :  { %v443_v60 = vpop.eup %442  ;;  %v339_v61 = vpack.c.bf16 %v441_v58, %v437_v54  ;;  %v171_v62 = vadd.f32 %v522_v10, %v170_v59 }
  0xe8   :  { %v359_v63 = vpack.c.bf16 %v443_v60, %v439_v57  ;;  %v400_v0 = vpop.f32.mrf.mxu0 }
  0xe9   :  { %366 = vst [vmem:[%s562_s3 + $0x8] sm:$0xff] %v339_v61   ;;  %454 = vtanh.f32 %v171_v62 }
  0xea   :  { %370 = vst [vmem:[%s562_s3 + $0x28] sm:$0xff] %v359_v63   ;;  %v445_v1 = vpop.eup %444 }
  0xeb   :  { %v447_v2 = vpop.eup %446 }
  0xee   :  { %v449_v3 = vpop.eup %448 }
  0xef   :  { %v451_v4 = vpop.eup %450  ;;  %v344_v5 = vpack.c.bf16 %v449_v3, %v445_v1 }
  0xf0   :  { %v364_v6 = vpack.c.bf16 %v451_v4, %v447_v2 }
  0xf1   :  { %367 = vst [vmem:[%s562_s3 + $0x10] sm:$0xff] %v344_v5  }
  0xf2   :  { %371 = vst [vmem:[%s562_s3 + $0x30] sm:$0xff] %v364_v6   ;;  %v453_v7 = vpop.eup %452 }
  0xf6   :  { %v455_v8 = vpop.eup %454 }
  0xf7   :  { %v349_v9 = vpack.c.bf16 %v455_v8, %v453_v7 }
  0xf9   :  { %368 = vst [vmem:[%s562_s3 + $0x18] sm:$0xff] %v349_v9  }

// kernel: ppm_deepsup_forward.8
= control target key start
LH: loop header
LB: loop body
LE: loop exit
PB: predicated region body
PF: predicated region fallthrough
CT: control target
= control target key end

     0   :  { %s11381_s1 = inlined_call_operand.vmem [shape: bf16[9,128,128], index: 1, kind: input, shape index: {}]   ;;  %s11382_s0 = inlined_call_operand.vmem [shape: bf16[448,128], index: 0, kind: input, shape index: {}]   ;;  %s11383_s2 = inlined_call_operand.vmem [shape: f32[1,128], index: 2, kind: input, shape index: {}]   ;;  %s11384_s3 = inlined_call_operand.vmem [shape: bf16[448,128], index: 3, kind: output, shape index: {}]  }
   0x1   :  { %v8413_v0 = vld [vmem:[%s11381_s1 + $0x38] sm:$0xff]   ;;  %v8414_v1 = vld [vmem:[%s11381_s1 + $0x30] sm:$0xff]   ;;  %v8415_v2 = vld [vmem:[%s11381_s1 + $0x28] sm:$0xff]  }
   0x2   :  { %7749 = vmatprep.subr.bf16.mxu0 %v8413_v0  ;;  %8397 = vmatprep.subr.bf16.mxu1 %v8413_v0  ;;  %v8416_v3 = vld [vmem:[%s11381_s1 + $0x20] sm:$0xff]   ;;  %v8703_v5 = vld [vmem:[%s11382_s0 + $0x70] sm:$0xff]   ;;  %v8417_v6 = vld [vmem:[%s11381_s1 + $0x18] sm:$0xff]  }
   0x3   :  { %7750 = vmatpush3.bf16.msra.mxu0 %v8413_v0  ;;  %8405 = vmatpush3.bf16.msra.mxu1 %v8413_v0  ;;  %v8698_v4 = vld [vmem:[%s11382_s0] sm:$0xff]   ;;  %v8418_v7 = vld [vmem:[%s11381_s1 + $0x10] sm:$0xff]   ;;  %v8419_v8 = vld [vmem:[%s11381_s1 + $0x8] sm:$0xff]  }
   0x4   :  { %7751 = vmatprep.subr.bf16.mxu0 %v8414_v1  ;;  %8398 = vmatprep.subr.bf16.mxu1 %v8414_v1  ;;  %v8420_v9 = vld [vmem:[%s11381_s1] sm:$0xff]   ;;  %v8425_v10 = vld [vmem:[%s11381_s1 + $0x78] sm:$0xff]   ;;  %v8725_v11 = vld [vmem:[%s11382_s0 + $0x8] sm:$0xff]  }
   0x5   :  { %7765 = vmatprep.mubr.bf16.mxu0 %v8698_v4  ;;  %7793 = vmatprep.mubr.bf16.mxu1 %v8703_v5  ;;  %v8426_v12 = vld [vmem:[%s11381_s1 + $0xb8] sm:$0xff]   ;;  %v8738_v14 = vld [vmem:[%s11382_s0 + $0x10] sm:$0xff]   ;;  %v8743_v15 = vld [vmem:[%s11382_s0 + $0x80] sm:$0xff]  }
   0x6   :  { %v8733_v13 = vld [vmem:[%s11382_s0 + $0x78] sm:$0xff]   ;;  %v8429_v16 = vld [vmem:[%s11381_s1 + $0x70] sm:$0xff]   ;;  %v8433_v18 = vld [vmem:[%s11381_s1 + $0x68] sm:$0xff]  }
   0x7   :  { %7752 = vmatpush3.bf16.msra.mxu0 %v8414_v1  ;;  %8406 = vmatpush3.bf16.msra.mxu1 %v8414_v1  ;;  %v8432_v17 = vld [vmem:[%s11381_s1 + $0xb0] sm:$0xff]   ;;  %v8761_v19 = vld [vmem:[%s11382_s0 + $0x18] sm:$0xff]   ;;  %v8438_v20 = vld [vmem:[%s11381_s1 + $0xa8] sm:$0xff]  }
   0x8   :  { %7753 = vmatprep.subr.bf16.mxu0 %v8415_v2  ;;  %8399 = vmatprep.subr.bf16.mxu1 %v8415_v2  ;;  %v8769_v21 = vld [vmem:[%s11382_s0 + $0x88] sm:$0xff]   ;;  %v8774_v22 = vld [vmem:[%s11382_s0 + $0x20] sm:$0xff]   ;;  %v8779_v23 = vld [vmem:[%s11382_s0 + $0x90] sm:$0xff]  }
   0x9   :  { %v8439_v24 = vld [vmem:[%s11381_s1 + $0x60] sm:$0xff]   ;;  %v8794_v26 = vld [vmem:[%s11382_s0 + $0x28] sm:$0xff]   ;;  %v8799_v27 = vld [vmem:[%s11382_s0 + $0x98] sm:$0xff]  }
   0xa   :  { %v8442_v25 = vld [vmem:[%s11381_s1 + $0xa0] sm:$0xff]   ;;  %v8445_v28 = vld [vmem:[%s11381_s1 + $0x58] sm:$0xff]   ;;  %v8810_v30 = vld [vmem:[%s11382_s0 + $0x30] sm:$0xff]  }
   0xb   :  { %7754 = vmatpush3.bf16.msra.mxu0 %v8415_v2  ;;  %8407 = vmatpush3.bf16.msra.mxu1 %v8415_v2  ;;  %v8446_v29 = vld [vmem:[%s11381_s1 + $0x98] sm:$0xff]   ;;  %v8815_v31 = vld [vmem:[%s11382_s0 + $0xa0] sm:$0xff]   ;;  %v8451_v32 = vld [vmem:[%s11381_s1 + $0x50] sm:$0xff]  }
   0xc   :  { %7755 = vmatprep.subr.bf16.mxu0 %v8416_v3  ;;  %8400 = vmatprep.subr.bf16.mxu1 %v8416_v3  ;;  %v8452_v33 = vld [vmem:[%s11381_s1 + $0x90] sm:$0xff]   ;;  %v8830_v34 = vld [vmem:[%s11382_s0 + $0x38] sm:$0xff]   ;;  %v8835_v35 = vld [vmem:[%s11382_s0 + $0xa8] sm:$0xff]  }
   0xd   :  { %v8457_v36 = vld [vmem:[%s11381_s1 + $0x48] sm:$0xff]   ;;  %v8846_v38 = vld [vmem:[%s11382_s0 + $0x40] sm:$0xff]   ;;  %v8851_v39 = vld [vmem:[%s11382_s0 + $0xb0] sm:$0xff]  }
   0xe   :  { %v8458_v37 = vld [vmem:[%s11381_s1 + $0x88] sm:$0xff]   ;;  %v8463_v40 = vld [vmem:[%s11381_s1 + $0x40] sm:$0xff]   ;;  %v8871_v43 = vld [vmem:[%s11382_s0 + $0xb8] sm:$0xff]  }
   0xf   :  { %7756 = vmatpush3.bf16.msra.mxu0 %v8416_v3  ;;  %8408 = vmatpush3.bf16.msra.mxu1 %v8416_v3  ;;  %v8464_v41 = vld [vmem:[%s11381_s1 + $0x80] sm:$0xff]   ;;  %v8866_v42 = vld [vmem:[%s11382_s0 + $0x48] sm:$0xff]   ;;  %v8465_v44 = vld [vmem:[%s11381_s1 + $0xf8] sm:$0xff]  }
  0x10   :  { %7757 = vmatprep.subr.bf16.mxu0 %v8417_v6  ;;  %8401 = vmatprep.subr.bf16.mxu1 %v8417_v6  ;;  %v8466_v45 = vld [vmem:[%s11381_s1 + $0x138] sm:$0xff]   ;;  %v8882_v46 = vld [vmem:[%s11382_s0 + $0x50] sm:$0xff]   ;;  %v8887_v47 = vld [vmem:[%s11382_s0 + $0xc0] sm:$0xff]  }
  0x11   :  { %v8896_v48 = vld [vmem:[%s11382_s0 + $0x58] sm:$0xff]   ;;  %v8901_v49 = vld [vmem:[%s11382_s0 + $0xc8] sm:$0xff]   ;;  %v8906_v50 = vld [vmem:[%s11382_s0 + $0x60] sm:$0xff]  }
  0x12   :  { %v8911_v51 = vld [vmem:[%s11382_s0 + $0xd0] sm:$0xff]   ;;  %v8920_v52 = vld [vmem:[%s11382_s0 + $0x68] sm:$0xff]   ;;  %v8925_v53 = vld [vmem:[%s11382_s0 + $0xd8] sm:$0xff]  }
  0x13   :  { %7758 = vmatpush3.bf16.msra.mxu0 %v8417_v6  ;;  %8409 = vmatpush3.bf16.msra.mxu1 %v8417_v6  ;;  %v8467_v54 = vld [vmem:[%s11381_s1 + $0xf0] sm:$0xff]   ;;  %v8469_v56 = vld [vmem:[%s11381_s1 + $0xe8] sm:$0xff]   ;;  %v8471_v58 = vld [vmem:[%s11381_s1 + $0xe0] sm:$0xff]  }
  0x14   :  { %7759 = vmatprep.subr.bf16.mxu0 %v8418_v7  ;;  %8402 = vmatprep.subr.bf16.mxu1 %v8418_v7  ;;  %v8468_v55 = vld [vmem:[%s11381_s1 + $0x130] sm:$0xff]   ;;  %v8470_v57 = vld [vmem:[%s11381_s1 + $0x128] sm:$0xff]   ;;  %v8472_v59 = vld [vmem:[%s11381_s1 + $0x120] sm:$0xff]  }
  0x15   :  { %v8473_v60 = vld [vmem:[%s11381_s1 + $0xd8] sm:$0xff]   ;;  %v8475_v62 = vld [vmem:[%s11381_s1 + $0xd0] sm:$0xff]   ;;  %v8477_v0 = vld [vmem:[%s11381_s1 + $0xc8] sm:$0xff]  }
  0x16   :  { %v8474_v61 = vld [vmem:[%s11381_s1 + $0x118] sm:$0xff]   ;;  %v8476_v63 = vld [vmem:[%s11381_s1 + $0x110] sm:$0xff]   ;;  %v8478_v1 = vld [vmem:[%s11381_s1 + $0x108] sm:$0xff]  }
  0x17   :  { %7760 = vmatpush3.bf16.msra.mxu0 %v8418_v7  ;;  %8410 = vmatpush3.bf16.msra.mxu1 %v8418_v7  ;;  %v8479_v2 = vld [vmem:[%s11381_s1 + $0xc0] sm:$0xff]   ;;  %v8481_v6 = vld [vmem:[%s11381_s1 + $0x178] sm:$0xff]  }
  0x18   :  { %7761 = vmatprep.subr.bf16.mxu0 %v8419_v8  ;;  %8403 = vmatprep.subr.bf16.mxu1 %v8419_v8  ;;  %v8480_v3 = vld [vmem:[%s11381_s1 + $0x100] sm:$0xff]   ;;  %v8482_v7 = vld [vmem:[%s11381_s1 + $0x1b8] sm:$0xff]  }
  0x1b   :  { %7762 = vmatpush3.bf16.msra.mxu0 %v8419_v8  ;;  %8411 = vmatpush3.bf16.msra.mxu1 %v8419_v8  ;;  %v8484_v8 = vld [vmem:[%s11381_s1 + $0x1b0] sm:$0xff]  }
  0x1c   :  { %7763 = vmatprep.subr.bf16.mxu0 %v8420_v9  ;;  %8404 = vmatprep.subr.bf16.mxu1 %v8420_v9 }
  0x1f   :  { %7764 = vmatpush3.bf16.msra.mxu0 %v8420_v9  ;;  %8412 = vmatpush3.bf16.msra.mxu1 %v8420_v9  ;;  %v8486_v9 = vld [vmem:[%s11381_s1 + $0x1a8] sm:$0xff]  }
  0x20   :  { %7821 = vmatprep.subr.bf16.mxu1 %v8425_v10  ;;  %7893 = vmatprep.subr.bf16.mxu0 %v8426_v12 }
  0x22   :  { %7766 = vmatmul.mubr.bf16.vlgmr.msra.gmra.mxu0 %v8725_v11  ;;  %7794 = vmatmul.mubr.bf16.vlgmr.msra.gmra.mxu1 %v8733_v13 }
  0x23   :  { %7822 = vmatpush3.bf16.msra.mxu1 %v8425_v10  ;;  %7894 = vmatpush3.bf16.msra.mxu0 %v8426_v12  ;;  %v8487_v10 = vld [vmem:[%s11381_s1 + $0x160] sm:$0xff]   ;;  %v8489_v12 = vld [vmem:[%s11381_s1 + $0x158] sm:$0xff]  }
  0x24   :  { %7769 = vmatprep.mubr.bf16.mxu0 %v8738_v14  ;;  %7797 = vmatprep.mubr.bf16.mxu1 %v8743_v15 }
  0x25   :  { %7823 = vmatprep.subr.bf16.mxu1 %v8429_v16  ;;  %7895 = vmatprep.subr.bf16.mxu0 %v8432_v17 }
  0x27   :  { %7824 = vmatpush3.bf16.msra.mxu1 %v8429_v16  ;;  %7896 = vmatpush3.bf16.msra.mxu0 %v8432_v17  ;;  %v8493_v16 = vld [vmem:[%s11381_s1 + $0x148] sm:$0xff]  }
  0x28   :  { %7825 = vmatprep.subr.bf16.mxu1 %v8433_v18  ;;  %7897 = vmatprep.subr.bf16.mxu0 %v8438_v20  ;;  %v8494_v17 = vld [vmem:[%s11381_s1 + $0x188] sm:$0xff]  }
  0x2a   :  { %7770 = vmatmul.mubr.bf16.gmra.mxu0 %v8761_v19  ;;  %7798 = vmatmul.mubr.bf16.gmra.mxu1 %v8769_v21 }
  0x2b   :  { %7773 = vmatprep.mubr.bf16.mxu0 %v8774_v22  ;;  %7801 = vmatprep.mubr.bf16.mxu1 %v8779_v23 }
  0x2c   :  { %7826 = vmatpush3.bf16.msra.mxu1 %v8433_v18  ;;  %7898 = vmatpush3.bf16.msra.mxu0 %v8438_v20  ;;  %v620_v18 = vlaneseq  ;;  %v8496_v20 = vld [vmem:[%s11381_s1 + $0x180] sm:$0xff]  }
  0x2d   :  { %7827 = vmatprep.subr.bf16.mxu1 %v8439_v24  ;;  %7899 = vmatprep.subr.bf16.mxu0 %v8442_v25 }
  0x30   :  { %7828 = vmatpush3.bf16.msra.mxu1 %v8439_v24  ;;  %7900 = vmatpush3.bf16.msra.mxu0 %v8442_v25 }
  0x31   :  { %7829 = vmatprep.subr.bf16.mxu1 %v8445_v28  ;;  %7901 = vmatprep.subr.bf16.mxu0 %v8446_v29 }
  0x32   :  { %7774 = vmatmul.mubr.bf16.gmra.mxu0 %v8794_v26  ;;  %7802 = vmatmul.mubr.bf16.gmra.mxu1 %v8799_v27 }
  0x33   :  { %7777 = vmatprep.mubr.bf16.mxu0 %v8810_v30  ;;  %7805 = vmatprep.mubr.bf16.mxu1 %v8815_v31 }
  0x34   :  { %7830 = vmatpush3.bf16.msra.mxu1 %v8445_v28  ;;  %7902 = vmatpush3.bf16.msra.mxu0 %v8446_v29 }
  0x35   :  { %7831 = vmatprep.subr.bf16.mxu1 %v8451_v32  ;;  %7903 = vmatprep.subr.bf16.mxu0 %v8452_v33 }
  0x38   :  { %7832 = vmatpush3.bf16.msra.mxu1 %v8451_v32  ;;  %7904 = vmatpush3.bf16.msra.mxu0 %v8452_v33 }
  0x39   :  { %7833 = vmatprep.subr.bf16.mxu1 %v8457_v36  ;;  %7905 = vmatprep.subr.bf16.mxu0 %v8458_v37 }
  0x3a   :  { %7778 = vmatmul.mubr.bf16.gmra.mxu0 %v8830_v34  ;;  %7806 = vmatmul.mubr.bf16.gmra.mxu1 %v8835_v35 }
  0x3b   :  { %7781 = vmatprep.mubr.bf16.mxu0 %v8846_v38  ;;  %7809 = vmatprep.mubr.bf16.mxu1 %v8851_v39 }
  0x3c   :  { %7834 = vmatpush3.bf16.msra.mxu1 %v8457_v36  ;;  %7906 = vmatpush3.bf16.msra.mxu0 %v8458_v37 }
  0x3d   :  { %7835 = vmatprep.subr.bf16.mxu1 %v8463_v40  ;;  %7907 = vmatprep.subr.bf16.mxu0 %v8464_v41 }
  0x40   :  { %7836 = vmatpush3.bf16.msra.mxu1 %v8463_v40  ;;  %7908 = vmatpush3.bf16.msra.mxu0 %v8464_v41 }
  0x41   :  { %7965 = vmatprep.subr.bf16.mxu1 %v8465_v44  ;;  %8037 = vmatprep.subr.bf16.mxu0 %v8466_v45 }
  0x42   :  { %7782 = vmatmul.mubr.bf16.gmra.mxu0 %v8866_v42  ;;  %7810 = vmatmul.mubr.bf16.gmra.mxu1 %v8871_v43 }
  0x43   :  { %7785 = vmatprep.mubr.bf16.mxu0 %v8882_v46  ;;  %7813 = vmatprep.mubr.bf16.mxu1 %v8887_v47 }
  0x4a   :  { %7786 = vmatmul.mubr.bf16.gmra.mxu0 %v8896_v48  ;;  %7814 = vmatmul.mubr.bf16.gmra.mxu1 %v8901_v49 }
  0x4b   :  { %7789 = vmatprep.mubr.bf16.mxu0 %v8906_v50  ;;  %7817 = vmatprep.mubr.bf16.mxu1 %v8911_v51 }
  0x52   :  { %7790 = vmatmul.mubr.bf16.gmra.mxu0 %v8920_v52  ;;  %7818 = vmatmul.mubr.bf16.gmra.mxu1 %v8925_v53 }
  0x53   :  { %7837 = vmatprep.mubr.bf16.mxu1 %v8698_v4  ;;  %7909 = vmatprep.mubr.bf16.mxu0 %v8698_v4 }
  0x5a   :  { %7838 = vmatmul.mubr.bf16.vlgmr.msra.gmra.mxu1 %v8725_v11  ;;  %7910 = vmatmul.mubr.bf16.vlgmr.msra.gmra.mxu0 %v8725_v11 }
  0x5b   :  { %7966 = vmatpush3.bf16.msra.mxu1 %v8465_v44  ;;  %8038 = vmatpush3.bf16.msra.mxu0 %v8466_v45 }
  0x5c   :  { %7841 = vmatprep.mubr.bf16.mxu1 %v8738_v14  ;;  %7913 = vmatprep.mubr.bf16.mxu0 %v8738_v14 }
  0x5d   :  { %7967 = vmatprep.subr.bf16.mxu1 %v8467_v54  ;;  %8039 = vmatprep.subr.bf16.mxu0 %v8468_v55 }
  0x5f   :  { %7968 = vmatpush3.bf16.msra.mxu1 %v8467_v54  ;;  %8040 = vmatpush3.bf16.msra.mxu0 %v8468_v55 }
  0x60   :  { %7969 = vmatprep.subr.bf16.mxu1 %v8469_v56  ;;  %8041 = vmatprep.subr.bf16.mxu0 %v8470_v57 }
  0x62   :  { %7842 = vmatmul.mubr.bf16.gmra.mxu1 %v8761_v19  ;;  %7914 = vmatmul.mubr.bf16.gmra.mxu0 %v8761_v19 }
  0x63   :  { %7845 = vmatprep.mubr.bf16.mxu1 %v8774_v22  ;;  %7917 = vmatprep.mubr.bf16.mxu0 %v8774_v22 }
  0x64   :  { %7970 = vmatpush3.bf16.msra.mxu1 %v8469_v56  ;;  %8042 = vmatpush3.bf16.msra.mxu0 %v8470_v57 }
  0x65   :  { %7971 = vmatprep.subr.bf16.mxu1 %v8471_v58  ;;  %8043 = vmatprep.subr.bf16.mxu0 %v8472_v59 }
  0x68   :  { %7972 = vmatpush3.bf16.msra.mxu1 %v8471_v58  ;;  %8044 = vmatpush3.bf16.msra.mxu0 %v8472_v59 }
  0x69   :  { %7973 = vmatprep.subr.bf16.mxu1 %v8473_v60  ;;  %8045 = vmatprep.subr.bf16.mxu0 %v8474_v61 }
  0x6a   :  { %7846 = vmatmul.mubr.bf16.gmra.mxu1 %v8794_v26  ;;  %7918 = vmatmul.mubr.bf16.gmra.mxu0 %v8794_v26 }
  0x6b   :  { %7849 = vmatprep.mubr.bf16.mxu1 %v8810_v30  ;;  %7921 = vmatprep.mubr.bf16.mxu0 %v8810_v30 }
  0x6c   :  { %7974 = vmatpush3.bf16.msra.mxu1 %v8473_v60  ;;  %8046 = vmatpush3.bf16.msra.mxu0 %v8474_v61 }
  0x6d   :  { %7975 = vmatprep.subr.bf16.mxu1 %v8475_v62  ;;  %8047 = vmatprep.subr.bf16.mxu0 %v8476_v63 }
  0x70   :  { %7976 = vmatpush3.bf16.msra.mxu1 %v8475_v62  ;;  %8048 = vmatpush3.bf16.msra.mxu0 %v8476_v63 }
  0x71   :  { %7977 = vmatprep.subr.bf16.mxu1 %v8477_v0  ;;  %8049 = vmatprep.subr.bf16.mxu0 %v8478_v1 }
  0x72   :  { %7850 = vmatmul.mubr.bf16.gmra.mxu1 %v8830_v34  ;;  %7922 = vmatmul.mubr.bf16.gmra.mxu0 %v8830_v34 }
  0x73   :  { %7853 = vmatprep.mubr.bf16.mxu1 %v8846_v38  ;;  %7925 = vmatprep.mubr.bf16.mxu0 %v8846_v38 }
  0x74   :  { %7978 = vmatpush3.bf16.msra.mxu1 %v8477_v0  ;;  %8050 = vmatpush3.bf16.msra.mxu0 %v8478_v1 }
  0x75   :  { %7979 = vmatprep.subr.bf16.mxu1 %v8479_v2  ;;  %8051 = vmatprep.subr.bf16.mxu0 %v8480_v3 }
  0x78   :  { %7980 = vmatpush3.bf16.msra.mxu1 %v8479_v2  ;;  %8052 = vmatpush3.bf16.msra.mxu0 %v8480_v3 }
  0x79   :  { %8109 = vmatprep.subr.bf16.mxu1 %v8481_v6  ;;  %8181 = vmatprep.subr.bf16.mxu0 %v8482_v7 }
  0x7a   :  { %7854 = vmatmul.mubr.bf16.gmra.mxu1 %v8866_v42  ;;  %7926 = vmatmul.mubr.bf16.gmra.mxu0 %v8866_v42 }
  0x7b   :  { %7857 = vmatprep.mubr.bf16.mxu1 %v8882_v46  ;;  %7929 = vmatprep.mubr.bf16.mxu0 %v8882_v46 }
  0x82   :  { %7858 = vmatmul.mubr.bf16.gmra.mxu1 %v8896_v48  ;;  %7930 = vmatmul.mubr.bf16.gmra.mxu0 %v8896_v48 }
  0x83   :  { %7861 = vmatprep.mubr.bf16.mxu1 %v8906_v50  ;;  %7933 = vmatprep.mubr.bf16.mxu0 %v8906_v50 }
  0x8a   :  { %7862 = vmatmul.mubr.bf16.gmra.mxu1 %v8920_v52  ;;  %7934 = vmatmul.mubr.bf16.gmra.mxu0 %v8920_v52 }
  0x8b   :  { %7865 = vmatprep.mubr.bf16.mxu1 %v8703_v5  ;;  %7937 = vmatprep.mubr.bf16.mxu0 %v8703_v5  ;;  %v8483_v5 = vld [vmem:[%s11381_s1 + $0x170] sm:$0xff]  }
  0x92   :  { %7866 = vmatmul.mubr.bf16.gmra.mxu1 %v8733_v13  ;;  %7938 = vmatmul.mubr.bf16.gmra.mxu0 %v8733_v13  ;;  %v8490_v13 = vld [vmem:[%s11381_s1 + $0x198] sm:$0xff]  }
  0x93   :  { %7869 = vmatprep.mubr.bf16.mxu1 %v8743_v15  ;;  %7941 = vmatprep.mubr.bf16.mxu0 %v8743_v15  ;;  %v8492_v15 = vld [vmem:[%s11381_s1 + $0x190] sm:$0xff]  }
  0x9a   :  { %7870 = vmatmul.mubr.bf16.gmra.mxu1 %v8769_v21  ;;  %7942 = vmatmul.mubr.bf16.gmra.mxu0 %v8769_v21 }
  0x9b   :  { %7873 = vmatprep.mubr.bf16.mxu1 %v8779_v23  ;;  %7945 = vmatprep.mubr.bf16.mxu0 %v8779_v23  ;;  %v9091_v23 = vshrl.u32 %v620_v18, 7 }
  0x9d   :  { %vm622_vm0 = vcmp.lt.s32.totalorder %v9091_v23, 7  ;;  %vm2115_vm1 = vcmp.lt.s32.totalorder %v9091_v23, 6  ;;  %vm2718_vm2 = vcmp.lt.s32.totalorder %v9091_v23, 5  ;;  %vm3321_vm3 = vcmp.lt.s32.totalorder %v9091_v23, 1 }
  0x9e   :  { %vm5017_vm4 = vcmp.lt.s32.totalorder %v9091_v23, 3  ;;  %vm5620_vm5 = vcmp.lt.s32.totalorder %v9091_v23, 2 }
  0xa2   :  { %7874 = vmatmul.mubr.bf16.gmra.mxu1 %v8799_v27  ;;  %7946 = vmatmul.mubr.bf16.gmra.mxu0 %v8799_v27  ;;  %v9107_v27 = vld [vmem:[%s11381_s1 + $0x238] sm:$0xff]  }
  0xa3   :  { %7877 = vmatprep.mubr.bf16.mxu1 %v8815_v31  ;;  %7949 = vmatprep.mubr.bf16.mxu0 %v8815_v31 }
  0xaa   :  { %7878 = vmatmul.mubr.bf16.gmra.mxu1 %v8835_v35  ;;  %7950 = vmatmul.mubr.bf16.gmra.mxu0 %v8835_v35 }
  0xab   :  { %7881 = vmatprep.mubr.bf16.mxu1 %v8851_v39  ;;  %7953 = vmatprep.mubr.bf16.mxu0 %v8851_v39 }
  0xb2   :  { %7882 = vmatmul.mubr.bf16.gmra.mxu1 %v8871_v43  ;;  %7954 = vmatmul.mubr.bf16.gmra.mxu0 %v8871_v43 }
  0xb3   :  { %7885 = vmatprep.mubr.bf16.mxu1 %v8887_v47  ;;  %7957 = vmatprep.mubr.bf16.mxu0 %v8887_v47 }
  0xba   :  { %7886 = vmatmul.mubr.bf16.gmra.mxu1 %v8901_v49  ;;  %7958 = vmatmul.mubr.bf16.gmra.mxu0 %v8901_v49 }
  0xbb   :  { %7889 = vmatprep.mubr.bf16.mxu1 %v8911_v51  ;;  %7961 = vmatprep.mubr.bf16.mxu0 %v8911_v51 }
  0xc2   :  { %7890 = vmatmul.mubr.bf16.gmra.mxu1 %v8925_v53  ;;  %7962 = vmatmul.mubr.bf16.gmra.mxu0 %v8925_v53 }
  0xc3   :  { %7981 = vmatprep.mubr.bf16.mxu1 %v8698_v4  ;;  %8053 = vmatprep.mubr.bf16.mxu0 %v8698_v4  ;;  %v8485_v4 = vld [vmem:[%s11381_s1 + $0x168] sm:$0xff]  }
  0xca   :  { %7982 = vmatmul.mubr.bf16.vlgmr.msra.gmra.mxu1 %v8725_v11  ;;  %8054 = vmatmul.mubr.bf16.vlgmr.msra.gmra.mxu0 %v8725_v11  ;;  %v8488_v11 = vld [vmem:[%s11381_s1 + $0x1a0] sm:$0xff]  }
  0xcb   :  { %8110 = vmatpush3.bf16.msra.mxu1 %v8481_v6  ;;  %8182 = vmatpush3.bf16.msra.mxu0 %v8482_v7 }
  0xcc   :  { %7985 = vmatprep.mubr.bf16.mxu1 %v8738_v14  ;;  %8057 = vmatprep.mubr.bf16.mxu0 %v8738_v14  ;;  %v8491_v14 = vld [vmem:[%s11381_s1 + $0x150] sm:$0xff]  }
  0xcd   :  { %8111 = vmatprep.subr.bf16.mxu1 %v8483_v5  ;;  %8183 = vmatprep.subr.bf16.mxu0 %v8484_v8 }
  0xcf   :  { %8112 = vmatpush3.bf16.msra.mxu1 %v8483_v5  ;;  %8184 = vmatpush3.bf16.msra.mxu0 %v8484_v8 }
  0xd0   :  { %8113 = vmatprep.subr.bf16.mxu1 %v8485_v4  ;;  %8185 = vmatprep.subr.bf16.mxu0 %v8486_v9 }
  0xd2   :  { %7986 = vmatmul.mubr.bf16.gmra.mxu1 %v8761_v19  ;;  %8058 = vmatmul.mubr.bf16.gmra.mxu0 %v8761_v19  ;;  %v8495_v19 = vld [vmem:[%s11381_s1 + $0x140] sm:$0xff]  }
  0xd3   :  { %7989 = vmatprep.mubr.bf16.mxu1 %v8774_v22  ;;  %8061 = vmatprep.mubr.bf16.mxu0 %v8774_v22 }
  0xd4   :  { %8114 = vmatpush3.bf16.msra.mxu1 %v8485_v4  ;;  %8186 = vmatpush3.bf16.msra.mxu0 %v8486_v9 }
  0xd5   :  { %8115 = vmatprep.subr.bf16.mxu1 %v8487_v10  ;;  %8187 = vmatprep.subr.bf16.mxu0 %v8488_v11 }
  0xd8   :  { %8116 = vmatpush3.bf16.msra.mxu1 %v8487_v10  ;;  %8188 = vmatpush3.bf16.msra.mxu0 %v8488_v11 }
  0xd9   :  { %8117 = vmatprep.subr.bf16.mxu1 %v8489_v12  ;;  %8189 = vmatprep.subr.bf16.mxu0 %v8490_v13 }
  0xda   :  { %7990 = vmatmul.mubr.bf16.gmra.mxu1 %v8794_v26  ;;  %8062 = vmatmul.mubr.bf16.gmra.mxu0 %v8794_v26  ;;  %v9102_v26 = vld [vmem:[%s11381_s1 + $0x1f8] sm:$0xff]  }
  0xdb   :  { %7993 = vmatprep.mubr.bf16.mxu1 %v8810_v30  ;;  %8065 = vmatprep.mubr.bf16.mxu0 %v8810_v30 }
  0xdc   :  { %8118 = vmatpush3.bf16.msra.mxu1 %v8489_v12  ;;  %8190 = vmatpush3.bf16.msra.mxu0 %v8490_v13 }
  0xdd   :  { %8119 = vmatprep.subr.bf16.mxu1 %v8491_v14  ;;  %8191 = vmatprep.subr.bf16.mxu0 %v8492_v15 }
  0xe0   :  { %8120 = vmatpush3.bf16.msra.mxu1 %v8491_v14  ;;  %8192 = vmatpush3.bf16.msra.mxu0 %v8492_v15 }
  0xe1   :  { %8121 = vmatprep.subr.bf16.mxu1 %v8493_v16  ;;  %8193 = vmatprep.subr.bf16.mxu0 %v8494_v17 }
  0xe2   :  { %v7767_v21 = vpop.f32.mrf.mxu0  ;;  %v7795_v22 = vpop.f32.mrf.mxu1  ;;  %7994 = vmatmul.mubr.bf16.gmra.mxu1 %v8830_v34  ;;  %8066 = vmatmul.mubr.bf16.gmra.mxu0 %v8830_v34 }
  0xe3   :  { %7997 = vmatprep.mubr.bf16.mxu1 %v8846_v38  ;;  %8069 = vmatprep.mubr.bf16.mxu0 %v8846_v38  ;;  %v566_v30 = vrot.slane %v7767_v21, 1  ;;  %v594_v32 = vrot.slane %v7795_v22, 1 }
  0xe4   :  { %v9095_v24 = vpop.f32.mrf.mxu0  ;;  %v9097_v25 = vpop.f32.mrf.mxu1  ;;  %8122 = vmatpush3.bf16.msra.mxu1 %v8493_v16  ;;  %8194 = vmatpush3.bf16.msra.mxu0 %v8494_v17 }
  0xe5   :  { %8123 = vmatprep.subr.bf16.mxu1 %v8495_v19  ;;  %8195 = vmatprep.subr.bf16.mxu0 %v8496_v20  ;;  %v11385_v36 = vrot.slane %v9095_v24, 1  ;;  %v11386_v37 = vrot.slane %v9097_v25, 1 }
  0xe6   :  { %v7768_v28 = vpop.f32.mrf.mxu0  ;;  %v7796_v29 = vpop.f32.mrf.mxu1 }
  0xe7   :  { %v567_v33 = vrot.slane %v7768_v28, 1  ;;  %v595_v34 = vrot.slane %v7796_v29, 1 }
  0xe8   :  { %v344_v38 = vpop.f32.mrf.mxu0  ;;  %v456_v40 = vpop.f32.mrf.mxu1  ;;  %8124 = vmatpush3.bf16.msra.mxu1 %v8495_v19  ;;  %8196 = vmatpush3.bf16.msra.mxu0 %v8496_v20 }
  0xe9   :  { %v9114_v41 = vsel %vm622_vm0, %v566_v30, %v567_v33  ;;  %v9118_v44 = vsel %vm622_vm0, %v594_v32, %v595_v34  ;;  %v565_v45 = vrot.slane %v344_v38, 1  ;;  %v593_v54 = vrot.slane %v456_v40, 1  ;;  %8253 = vmatprep.subr.bf16.mxu1 %v9102_v26  ;;  %8325 = vmatprep.subr.bf16.mxu0 %v9107_v27 }
  0xea   :  { %v7771_v55 = vpop.f32.mrf.mxu0  ;;  %v7799_v56 = vpop.f32.mrf.mxu1  ;;  %7998 = vmatmul.mubr.bf16.gmra.mxu1 %v8866_v42  ;;  %8070 = vmatmul.mubr.bf16.gmra.mxu0 %v8866_v42 }
  0xeb   :  { %v9126_v57 = vsel %vm622_vm0, %v565_v45, %v566_v30  ;;  %v9132_v58 = vsel %vm622_vm0, %v11385_v36, %v565_v45  ;;  %v9136_v59 = vsel %vm622_vm0, %v593_v54, %v594_v32  ;;  %v9142_v60 = vsel %vm622_vm0, %v11386_v37, %v593_v54  ;;  %8001 = vmatprep.mubr.bf16.mxu1 %v8882_v46 }
  0xec   :  { %v357_v42 = vpop.f32.mrf.mxu0  ;;  %v469_v61 = vpop.f32.mrf.mxu1  ;;  %8073 = vmatprep.mubr.bf16.mxu0 %v8882_v46  ;;  %v570_v0 = vrot.slane %v7771_v55, 1  ;;  %v598_v1 = vrot.slane %v7799_v56, 1 }
  0xed   :  { %v568_v62 = vrot.slane %v357_v42, 1  ;;  %v596_v63 = vrot.slane %v469_v61, 1 }
  0xee   :  { %v7772_v2 = vpop.f32.mrf.mxu0  ;;  %v7800_v3 = vpop.f32.mrf.mxu1 }
  0xef   :  { %v9148_v6 = vsel %vm622_vm0, %v567_v33, %v568_v62  ;;  %v9152_v7 = vsel %vm622_vm0, %v595_v34, %v596_v63  ;;  %v571_v5 = vrot.slane %v7772_v2, 1  ;;  %v599_v8 = vrot.slane %v7800_v3, 1 }
  0xf0   :  { %v360_v4 = vpop.f32.mrf.mxu0  ;;  %v472_v9 = vpop.f32.mrf.mxu1 }
  0xf1   :  { %v9156_v46 = vsel %vm622_vm0, %v570_v0, %v571_v5  ;;  %v9160_v10 = vsel %vm622_vm0, %v598_v1, %v599_v8  ;;  %v569_v11 = vrot.slane %v360_v4, 1  ;;  %v597_v12 = vrot.slane %v472_v9, 1 }
  0xf2   :  { %v7775_v13 = vpop.f32.mrf.mxu0  ;;  %v7803_v14 = vpop.f32.mrf.mxu1  ;;  %8002 = vmatmul.mubr.bf16.gmra.mxu1 %v8896_v48  ;;  %8074 = vmatmul.mubr.bf16.gmra.mxu0 %v8896_v48 }
  0xf3   :  { %v9166_v15 = vsel %vm622_vm0, %v569_v11, %v570_v0  ;;  %v9170_v16 = vsel %vm622_vm0, %v568_v62, %v569_v11  ;;  %v9174_v17 = vsel %vm622_vm0, %v597_v12, %v598_v1  ;;  %v9178_v18 = vsel %vm622_vm0, %v596_v63, %v597_v12  ;;  %8005 = vmatprep.mubr.bf16.mxu1 %v8906_v50 }
  0xf4   :  { %11427 = vst [vmem:[#allocation3_spill] sm:$0xff] %v9174_v17  ;;  %v373_v19 = vpop.f32.mrf.mxu0  ;;  %v485_v48 = vpop.f32.mrf.mxu1  ;;  %8077 = vmatprep.mubr.bf16.mxu0 %v8906_v50  ;;  %v574_v22 = vrot.slane %v7775_v13, 1  ;;  %v602_v28 = vrot.slane %v7803_v14, 1 }
  0xf5   :  { %v572_v20 = vrot.slane %v373_v19, 1  ;;  %v600_v21 = vrot.slane %v485_v48, 1 }
  0xf6   :  { %v7776_v29 = vpop.f32.mrf.mxu0  ;;  %v7804_v30 = vpop.f32.mrf.mxu1 }
  0xf7   :  { %v9184_v32 = vsel %vm622_vm0, %v571_v5, %v572_v20  ;;  %v9188_v33 = vsel %vm622_vm0, %v599_v8, %v600_v21  ;;  %v575_v34 = vrot.slane %v7776_v29, 1  ;;  %v603_v38 = vrot.slane %v7804_v30, 1 }
  0xf8   :  { %11428 = vst [vmem:[#allocation4_spill] sm:$0xff] %v9188_v33  ;;  %v376_v40 = vpop.f32.mrf.mxu0  ;;  %v488_v45 = vpop.f32.mrf.mxu1 }
  0xf9   :  { %v9192_v50 = vsel %vm622_vm0, %v574_v22, %v575_v34  ;;  %v9196_v54 = vsel %vm622_vm0, %v602_v28, %v603_v38  ;;  %v573_v55 = vrot.slane %v376_v40, 1  ;;  %v601_v56 = vrot.slane %v488_v45, 1 }
  0xfa   :  { %11429 = vst [vmem:[#allocation5_spill] sm:$0xff] %v9196_v54  ;;  %v7779_v42 = vpop.f32.mrf.mxu0  ;;  %v7807_v61 = vpop.f32.mrf.mxu1  ;;  %8006 = vmatmul.mubr.bf16.gmra.mxu1 %v8920_v52  ;;  %8078 = vmatmul.mubr.bf16.gmra.mxu0 %v8920_v52  ;;  %v9219_v52 = vld [vmem:[%s11382_s0 + $0x70] sm:$0xff]  }
  0xfb   :  { %v9202_v62 = vsel %vm622_vm0, %v573_v55, %v574_v22  ;;  %v9206_v63 = vsel %vm622_vm0, %v572_v20, %v573_v55  ;;  %v9210_v0 = vsel %vm622_vm0, %v601_v56, %v602_v28  ;;  %v9214_v1 = vsel %vm622_vm0, %v600_v21, %v601_v56  ;;  %11432 = vst [vmem:[#allocation8_spill] sm:$0xff] %v9219_v52 }
  0xfc   :  { %11430 = vst [vmem:[#allocation6_spill] sm:$0xff] %v9210_v0  ;;  %11431 = vst [vmem:[#allocation7_spill] sm:$0xff] %v9214_v1  ;;  %8009 = vmatprep.mubr.bf16.mxu1 %v9219_v52  ;;  %v389_v2 = vpop.f32.mrf.mxu0  ;;  %v501_v3 = vpop.f32.mrf.mxu1  ;;  %8081 = vmatprep.mubr.bf16.mxu0 %v9219_v52  ;;  %v578_v4 = vrot.slane %v7779_v42, 1  ;;  %v606_v9 = vrot.slane %v7807_v61, 1  ;;  %v8627_v61 = vld [vmem:[%s11382_s0 + $0x80] sm:$0xff]  }
  0xfd   :  { %v576_v5 = vrot.slane %v389_v2, 1  ;;  %v604_v8 = vrot.slane %v501_v3, 1 }
  0xfe   :  { %v7780_v11 = vpop.f32.mrf.mxu0  ;;  %v7808_v12 = vpop.f32.mrf.mxu1 }
  0xff   :  { %v9225_v13 = vsel %vm622_vm0, %v575_v34, %v576_v5  ;;  %v9229_v14 = vsel %vm622_vm0, %v603_v38, %v604_v8  ;;  %v579_v19 = vrot.slane %v7780_v11, 1  ;;  %v607_v48 = vrot.slane %v7808_v12, 1  ;;  %v8626_v38 = vld [vmem:[%s11382_s0 + $0x78] sm:$0xff]  }
 0x100   :  { %11433 = vst [vmem:[#allocation9_spill] sm:$0xff] %v9229_v14  ;;  %v392_v20 = vpop.f32.mrf.mxu0  ;;  %v504_v21 = vpop.f32.mrf.mxu1 }
 0x101   :  { %v9233_v22 = vsel %vm622_vm0, %v578_v4, %v579_v19  ;;  %v9237_v28 = vsel %vm622_vm0, %v606_v9, %v607_v48  ;;  %v577_v29 = vrot.slane %v392_v20, 1  ;;  %v605_v30 = vrot.slane %v504_v21, 1 }
 0x102   :  { %11434 = vst [vmem:[#allocation10_spill] sm:$0xff] %v9237_v28  ;;  %v7783_v34 = vpop.f32.mrf.mxu0  ;;  %v7811_v40 = vpop.f32.mrf.mxu1  ;;  %8010 = vmatmul.mubr.bf16.gmra.mxu1 %v8626_v38  ;;  %8082 = vmatmul.mubr.bf16.gmra.mxu0 %v8626_v38 }
 0x103   :  { %v9244_v45 = vsel %vm622_vm0, %v577_v29, %v578_v4  ;;  %v9248_v55 = vsel %vm622_vm0, %v576_v5, %v577_v29  ;;  %v9252_v56 = vsel %vm622_vm0, %v605_v30, %v606_v9  ;;  %v9256_v42 = vsel %vm622_vm0, %v604_v8, %v605_v30  ;;  %8013 = vmatprep.mubr.bf16.mxu1 %v8627_v61 }
 0x104   :  { %11435 = vst [vmem:[#allocation11_spill] sm:$0xff] %v9252_v56  ;;  %11436 = vst [vmem:[#allocation12_spill] sm:$0xff] %v9256_v42  ;;  %v405_v2 = vpop.f32.mrf.mxu0  ;;  %v517_v3 = vpop.f32.mrf.mxu1  ;;  %8085 = vmatprep.mubr.bf16.mxu0 %v8627_v61  ;;  %v582_v5 = vrot.slane %v7783_v34, 1  ;;  %v610_v12 = vrot.slane %v7811_v40, 1 }
 0x105   :  { %v580_v4 = vrot.slane %v405_v2, 1  ;;  %v608_v11 = vrot.slane %v517_v3, 1 }
 0x106   :  { %v7784_v20 = vpop.f32.mrf.mxu0  ;;  %v7812_v21 = vpop.f32.mrf.mxu1 }
 0x107   :  { %v9263_v9 = vsel %vm622_vm0, %v579_v19, %v580_v4  ;;  %v9267_v8 = vsel %vm622_vm0, %v607_v48, %v608_v11  ;;  %v583_v29 = vrot.slane %v7784_v20, 1  ;;  %v611_v30 = vrot.slane %v7812_v21, 1  ;;  %v8628_v48 = vld [vmem:[%s11382_s0 + $0x88] sm:$0xff]  }
 0x108   :  { %11437 = vst [vmem:[#allocation13_spill] sm:$0xff] %v9267_v8  ;;  %v408_v38 = vpop.f32.mrf.mxu0  ;;  %v520_v36 = vpop.f32.mrf.mxu1 }
 0x109   :  { %v9271_v61 = vsel %vm622_vm0, %v582_v5, %v583_v29  ;;  %v9275_v34 = vsel %vm622_vm0, %v610_v12, %v611_v30  ;;  %v581_v40 = vrot.slane %v408_v38, 1  ;;  %v609_v2 = vrot.slane %v520_v36, 1 }
 0x10a   :  { %11438 = vst [vmem:[#allocation14_spill] sm:$0xff] %v9275_v34  ;;  %v7787_v19 = vpop.f32.mrf.mxu0  ;;  %v7815_v3 = vpop.f32.mrf.mxu1  ;;  %8014 = vmatmul.mubr.bf16.gmra.mxu1 %v8628_v48  ;;  %8086 = vmatmul.mubr.bf16.gmra.mxu0 %v8628_v48  ;;  %v8629_v48 = vld [vmem:[%s11382_s0 + $0x90] sm:$0xff]  }
 0x10b   :  { %v9282_v20 = vsel %vm622_vm0, %v581_v40, %v582_v5  ;;  %v9286_v21 = vsel %vm622_vm0, %v580_v4, %v581_v40  ;;  %v9290_v38 = vsel %vm622_vm0, %v609_v2, %v610_v12  ;;  %v9294_v36 = vsel %vm622_vm0, %v608_v11, %v609_v2  ;;  %8017 = vmatprep.mubr.bf16.mxu1 %v8629_v48 }
 0x10c   :  { %11439 = vst [vmem:[#allocation15_spill] sm:$0xff] %v9290_v38  ;;  %11440 = vst [vmem:[#allocation16_spill] sm:$0xff] %v9294_v36  ;;  %v421_v37 = vpop.f32.mrf.mxu0  ;;  %v533_v5 = vpop.f32.mrf.mxu1  ;;  %8089 = vmatprep.mubr.bf16.mxu0 %v8629_v48  ;;  %v586_v4 = vrot.slane %v7787_v19, 1  ;;  %v614_v40 = vrot.slane %v7815_v3, 1 }
 0x10d   :  { %v584_v34 = vrot.slane %v421_v37, 1  ;;  %v612_v8 = vrot.slane %v533_v5, 1 }
 0x10e   :  { %v7788_v56 = vpop.f32.mrf.mxu0  ;;  %v7816_v42 = vpop.f32.mrf.mxu1 }
 0x10f   :  { %v9301_v12 = vsel %vm622_vm0, %v583_v29, %v584_v34  ;;  %v9305_v11 = vsel %vm622_vm0, %v611_v30, %v612_v8  ;;  %v587_v2 = vrot.slane %v7788_v56, 1  ;;  %v615_v38 = vrot.slane %v7816_v42, 1  ;;  %v8630_v30 = vld [vmem:[%s11382_s0 + $0x98] sm:$0xff]  }
 0x110   :  { %11441 = vst [vmem:[#allocation17_spill] sm:$0xff] %v9305_v11  ;;  %v424_v36 = vpop.f32.mrf.mxu0  ;;  %v536_v28 = vpop.f32.mrf.mxu1 }
 0x111   :  { %v9309_v37 = vsel %vm622_vm0, %v586_v4, %v587_v2  ;;  %v9313_v19 = vsel %vm622_vm0, %v614_v40, %v615_v38  ;;  %v585_v3 = vrot.slane %v424_v36, 1  ;;  %v613_v48 = vrot.slane %v536_v28, 1 }
 0x112   :  { %11442 = vst [vmem:[#allocation18_spill] sm:$0xff] %v9313_v19  ;;  %v7791_v29 = vpop.f32.mrf.mxu0  ;;  %v7819_v5 = vpop.f32.mrf.mxu1  ;;  %8018 = vmatmul.mubr.bf16.gmra.mxu1 %v8630_v30  ;;  %8090 = vmatmul.mubr.bf16.gmra.mxu0 %v8630_v30 }
 0x113   :  { %v9320_v56 = vsel %vm622_vm0, %v585_v3, %v586_v4  ;;  %v9324_v42 = vsel %vm622_vm0, %v584_v34, %v585_v3  ;;  %v9328_v36 = vsel %vm622_vm0, %v613_v48, %v614_v40  ;;  %v9332_v28 = vsel %vm622_vm0, %v612_v8, %v613_v48  ;;  %8021 = vmatprep.mubr.bf16.mxu1 %v8815_v31 }
 0x114   :  { %11443 = vst [vmem:[#allocation19_spill] sm:$0xff] %v9328_v36  ;;  %11444 = vst [vmem:[#allocation20_spill] sm:$0xff] %v9332_v28  ;;  %v437_v19 = vpop.f32.mrf.mxu0  ;;  %v549_v30 = vpop.f32.mrf.mxu1  ;;  %8093 = vmatprep.mubr.bf16.mxu0 %v8815_v31  ;;  %v590_v14 = vrot.slane %v7791_v29, 1  ;;  %v618_v0 = vrot.slane %v7819_v5, 1  ;;  %v11446_v31 = vrot.slane %v9097_v25, 1 }
 0x115   :  { %v588_v4 = vrot.slane %v437_v19, 1  ;;  %v616_v11 = vrot.slane %v549_v30, 1 }
 0x116   :  { %v7792_v34 = vpop.f32.mrf.mxu0  ;;  %v7820_v3 = vpop.f32.mrf.mxu1 }
 0x117   :  { %v9338_v40 = vsel %vm622_vm0, %v587_v2, %v588_v4  ;;  %v9342_v8 = vsel %vm622_vm0, %v615_v38, %v616_v11  ;;  %v591_v48 = vrot.slane %v7792_v34, 1  ;;  %v619_v36 = vrot.slane %v7820_v3, 1 }
 0x118   :  { %11445 = vst [vmem:[#allocation21_spill] sm:$0xff] %v9342_v8  ;;  %v440_v28 = vpop.f32.mrf.mxu0  ;;  %v552_v1 = vpop.f32.mrf.mxu1  ;;  %v11448_v38 = vrot.slane %v9095_v24, 1 }
 0x119   :  { %v9348_v19 = vsel %vm622_vm0, %v591_v48, %v11446_v31  ;;  %v9352_v29 = vsel %vm622_vm0, %v590_v14, %v591_v48  ;;  %v9356_v2 = vsel %vm622_vm0, %v618_v0, %v619_v36  ;;  %v589_v30 = vrot.slane %v440_v28, 1 }
 0x11a   :  { %11447 = vst [vmem:[#allocation22_spill] sm:$0xff] %v9356_v2  ;;  %v9362_v5 = vsel %vm622_vm0, %v619_v36, %v11448_v38  ;;  %v617_v25 = vrot.slane %v552_v1, 1  ;;  %v7839_v34 = vpop.f32.mrf.mxu1  ;;  %v7911_v3 = vpop.f32.mrf.mxu0  ;;  %8022 = vmatmul.mubr.bf16.gmra.mxu1 %v8835_v35  ;;  %8094 = vmatmul.mubr.bf16.gmra.mxu0 %v8835_v35 }
 0x11b   :  { %11449 = vst [vmem:[#allocation23_spill] sm:$0xff] %v9362_v5  ;;  %8025 = vmatprep.mubr.bf16.mxu1 %v8851_v39  ;;  %8097 = vmatprep.mubr.bf16.mxu0 %v8851_v39  ;;  %v9370_v48 = vsel %vm622_vm0, %v589_v30, %v590_v14  ;;  %v9374_v24 = vsel %vm622_vm0, %v588_v4, %v589_v30  ;;  %v2059_v4 = vrot.slane %v7839_v34, 2  ;;  %v2664_v31 = vrot.slane %v7911_v3, 3 }
 0x11c   :  { %v9378_v1 = vsel %vm622_vm0, %v617_v25, %v618_v0  ;;  %v9382_v36 = vsel %vm622_vm0, %v616_v11, %v617_v25  ;;  %v9384_v35 = vpop.f32.mrf.mxu1  ;;  %v9386_v28 = vpop.f32.mrf.mxu0 }
 0x11d   :  { %11450 = vst [vmem:[#allocation24_spill] sm:$0xff] %v9378_v1  ;;  %11451 = vst [vmem:[#allocation25_spill] sm:$0xff] %v9382_v36  ;;  %v11390_v0 = vrot.slane %v9384_v35, 2  ;;  %v11392_v1 = vrot.slane %v9386_v28, 3 }
 0x11e   :  { %11452 = vst [vmem:[#allocation26_spill] sm:$0xff] %v9384_v35  ;;  %11453 = vst [vmem:[#allocation27_spill] sm:$0xff] %v9386_v28  ;;  %v7840_v39 = vpop.f32.mrf.mxu1  ;;  %v7912_v14 = vpop.f32.mrf.mxu0 }
 0x11f   :  { %v2060_v38 = vrot.slane %v7840_v39, 2  ;;  %v2665_v30 = vrot.slane %v7912_v14, 3 }
 0x120   :  { %v1837_v11 = vpop.f32.mrf.mxu1  ;;  %v2442_v25 = vpop.f32.mrf.mxu0 }
 0x121   :  { %v2168_v36 = vsel %vm2115_vm1, %v2059_v4, %v2060_v38  ;;  %v2771_v5 = vsel %vm2718_vm2, %v2664_v31, %v2665_v30  ;;  %v2058_v2 = vrot.slane %v1837_v11, 2  ;;  %v2663_v8 = vrot.slane %v2442_v25, 3 }
 0x122   :  { %v2176_v52 = vadd.f32 %v2168_v36, %v9114_v41  ;;  %v7843_v34 = vpop.f32.mrf.mxu1  ;;  %v7915_v3 = vpop.f32.mrf.mxu0  ;;  %8026 = vmatmul.mubr.bf16.gmra.mxu1 %v8871_v43  ;;  %8098 = vmatmul.mubr.bf16.gmra.mxu0 %v8871_v43 }
 0x123   :  { %v2169_v39 = vsel %vm2115_vm1, %v2058_v2, %v2059_v4  ;;  %v2170_v14 = vsel %vm2115_vm1, %v11390_v0, %v2058_v2  ;;  %v2773_v11 = vsel %vm2718_vm2, %v11392_v1, %v2663_v8  ;;  %8029 = vmatprep.mubr.bf16.mxu1 %v8887_v47  ;;  %8101 = vmatprep.mubr.bf16.mxu0 %v8887_v47  ;;  %v2063_v1 = vrot.slane %v7843_v34, 2 }
 0x124   :  { %v2174_v41 = vadd.f32 %v2170_v14, %v9132_v58  ;;  %v1850_v43 = vpop.f32.mrf.mxu1  ;;  %v2455_v36 = vpop.f32.mrf.mxu0  ;;  %v2175_v4 = vadd.f32 %v2169_v39, %v9126_v57  ;;  %v2772_v25 = vsel %vm2718_vm2, %v2663_v8, %v2664_v31  ;;  %v9415_v0 = vadd.f32 %v2771_v5, %v2176_v52 }
 0x125   :  { %v2061_v35 = vrot.slane %v1850_v43, 2  ;;  %v2666_v2 = vrot.slane %v2455_v36, 3  ;;  %v2668_v54 = vrot.slane %v7915_v3, 3 }
 0x126   :  { %v9417_v28 = vadd.f32 %v2773_v11, %v2174_v41  ;;  %v7844_v33 = vpop.f32.mrf.mxu1  ;;  %v7916_v17 = vpop.f32.mrf.mxu0  ;;  %v9419_v47 = vadd.f32 %v2772_v25, %v2175_v4 }
 0x127   :  { %v2167_v58 = vsel %vm2115_vm1, %v2060_v38, %v2061_v35  ;;  %v2770_v57 = vsel %vm2718_vm2, %v2665_v30, %v2666_v2  ;;  %v2064_v39 = vrot.slane %v7844_v33, 2  ;;  %v2669_v8 = vrot.slane %v7916_v17, 3 }
 0x128   :  { %v2177_v31 = vadd.f32 %v2167_v58, %v9148_v6  ;;  %v1853_v52 = vpop.f32.mrf.mxu1  ;;  %v2458_v5 = vpop.f32.mrf.mxu0 }
 0x129   :  { %v2164_v34 = vsel %vm2115_vm1, %v2063_v1, %v2064_v39  ;;  %v2767_v3 = vsel %vm2718_vm2, %v2668_v54, %v2669_v8  ;;  %v2062_v14 = vrot.slane %v1853_v52, 2  ;;  %v2667_v11 = vrot.slane %v2458_v5, 3 }
 0x12a   :  { %v2180_v41 = vadd.f32 %v2164_v34, %v9156_v46  ;;  %v7847_v38 = vpop.f32.mrf.mxu1  ;;  %v7919_v43 = vpop.f32.mrf.mxu0  ;;  %8030 = vmatmul.mubr.bf16.gmra.mxu1 %v8901_v49  ;;  %8102 = vmatmul.mubr.bf16.gmra.mxu0 %v8901_v49  ;;  %v9433_v17 = vadd.f32 %v2770_v57, %v2177_v31 }
 0x12b   :  { %v2165_v6 = vsel %vm2115_vm1, %v2062_v14, %v2063_v1  ;;  %v2166_v33 = vsel %vm2115_vm1, %v2061_v35, %v2062_v14  ;;  %v2769_v30 = vsel %vm2718_vm2, %v2666_v2, %v2667_v11  ;;  %8033 = vmatprep.mubr.bf16.mxu1 %v8911_v51  ;;  %8105 = vmatprep.mubr.bf16.mxu0 %v8911_v51  ;;  %v2067_v2 = vrot.slane %v7847_v38, 2 }
 0x12c   :  { %v2178_v46 = vadd.f32 %v2166_v33, %v9170_v16  ;;  %v1866_v36 = vpop.f32.mrf.mxu1  ;;  %v2471_v4 = vpop.f32.mrf.mxu0  ;;  %v2179_v49 = vadd.f32 %v2165_v6, %v9166_v15  ;;  %v2768_v25 = vsel %vm2718_vm2, %v2667_v11, %v2668_v54  ;;  %v9447_v57 = vadd.f32 %v2767_v3, %v2180_v41 }
 0x12d   :  { %v2065_v1 = vrot.slane %v1866_v36, 2  ;;  %v2670_v58 = vrot.slane %v2471_v4, 3  ;;  %v2672_v31 = vrot.slane %v7919_v43, 3 }
 0x12e   :  { %v9449_v35 = vadd.f32 %v2769_v30, %v2178_v46  ;;  %v7848_v52 = vpop.f32.mrf.mxu1  ;;  %v7920_v5 = vpop.f32.mrf.mxu0  ;;  %v9451_v51 = vadd.f32 %v2768_v25, %v2179_v49 }
 0x12f   :  { %v2163_v16 = vsel %vm2115_vm1, %v2064_v39, %v2065_v1  ;;  %v2766_v15 = vsel %vm2718_vm2, %v2669_v8, %v2670_v58  ;;  %v2068_v34 = vrot.slane %v7848_v52, 2  ;;  %v2673_v54 = vrot.slane %v7920_v5, 3 }
 0x130   :  { %v2181_v14 = vadd.f32 %v2163_v16, %v9184_v32  ;;  %v1869_v3 = vpop.f32.mrf.mxu1  ;;  %v2474_v11 = vpop.f32.mrf.mxu0 }
 0x131   :  { %v2160_v41 = vsel %vm2115_vm1, %v2067_v2, %v2068_v34  ;;  %v2763_v38 = vsel %vm2718_vm2, %v2672_v31, %v2673_v54  ;;  %v2066_v43 = vrot.slane %v1869_v3, 2  ;;  %v2671_v6 = vrot.slane %v2474_v11, 3 }
 0x132   :  { %v2184_v33 = vadd.f32 %v2160_v41, %v9192_v50  ;;  %v7851_v39 = vpop.f32.mrf.mxu1  ;;  %v7923_v30 = vpop.f32.mrf.mxu0  ;;  %8034 = vmatmul.mubr.bf16.gmra.mxu1 %v8925_v53  ;;  %8106 = vmatmul.mubr.bf16.gmra.mxu0 %v8925_v53  ;;  %v9465_v8 = vadd.f32 %v2766_v15, %v2181_v14  ;;  %v8631_v50 = vld [vmem:[%s11382_s0] sm:$0xff]  }
 0x133   :  { %v2161_v32 = vsel %vm2115_vm1, %v2066_v43, %v2067_v2  ;;  %v2162_v46 = vsel %vm2115_vm1, %v2065_v1, %v2066_v43  ;;  %v2765_v36 = vsel %vm2718_vm2, %v2670_v58, %v2671_v6  ;;  %8125 = vmatprep.mubr.bf16.mxu1 %v8631_v50  ;;  %8197 = vmatprep.mubr.bf16.mxu0 %v8631_v50  ;;  %v2071_v16 = vrot.slane %v7851_v39, 2  ;;  %v8632_v50 = vld [vmem:[%s11382_s0 + $0x8] sm:$0xff]  }
 0x134   :  { %v2182_v4 = vadd.f32 %v2162_v46, %v9206_v63  ;;  %v1882_v53 = vpop.f32.mrf.mxu1  ;;  %v2487_v49 = vpop.f32.mrf.mxu0  ;;  %v2183_v25 = vadd.f32 %v2161_v32, %v9202_v62  ;;  %v2764_v2 = vsel %vm2718_vm2, %v2671_v6, %v2672_v31  ;;  %v9480_v5 = vadd.f32 %v2763_v38, %v2184_v33 }
 0x135   :  { %v2069_v52 = vrot.slane %v1882_v53, 2  ;;  %v2674_v1 = vrot.slane %v2487_v49, 3  ;;  %v2676_v15 = vrot.slane %v7923_v30, 3 }
 0x136   :  { %v9482_v58 = vadd.f32 %v2765_v36, %v2182_v4  ;;  %v7852_v14 = vpop.f32.mrf.mxu1  ;;  %v7924_v3 = vpop.f32.mrf.mxu0  ;;  %v9484_v11 = vadd.f32 %v2764_v2, %v2183_v25 }
 0x137   :  { %v2159_v63 = vsel %vm2115_vm1, %v2068_v34, %v2069_v52  ;;  %v2762_v62 = vsel %vm2718_vm2, %v2673_v54, %v2674_v1  ;;  %v2072_v41 = vrot.slane %v7852_v14, 2  ;;  %v2677_v31 = vrot.slane %v7924_v3, 3  ;;  %v8499_v34 = vld [vmem:[%s11381_s1 + $0x1f0] sm:$0xff]  }
 0x138   :  { %v2185_v43 = vadd.f32 %v2159_v63, %v9225_v13  ;;  %v1885_v38 = vpop.f32.mrf.mxu1  ;;  %v2490_v6 = vpop.f32.mrf.mxu0  ;;  %v8500_v54 = vld [vmem:[%s11381_s1 + $0x230] sm:$0xff]  }
 0x139   :  { %v2156_v33 = vsel %vm2115_vm1, %v2071_v16, %v2072_v41  ;;  %v2759_v39 = vsel %vm2718_vm2, %v2676_v15, %v2677_v31  ;;  %v2070_v30 = vrot.slane %v1885_v38, 2  ;;  %v2675_v32 = vrot.slane %v2490_v6, 3  ;;  %v8633_v3 = vld [vmem:[%s11382_s0 + $0x10] sm:$0xff]  }
 0x13a   :  { %v2188_v13 = vadd.f32 %v2156_v33, %v9233_v22  ;;  %v7855_v46 = vpop.f32.mrf.mxu1  ;;  %v9502_v36 = vpop.f32.mrf.mxu0  ;;  %8126 = vmatmul.mubr.bf16.vlgmr.msra.gmra.mxu1 %v8632_v50  ;;  %8198 = vmatmul.mubr.bf16.vlgmr.msra.gmra.mxu0 %v8632_v50  ;;  %v9507_v4 = vadd.f32 %v2762_v62, %v2185_v43 }
 0x13b   :  { %v2157_v53 = vsel %vm2115_vm1, %v2070_v30, %v2071_v16  ;;  %v2158_v49 = vsel %vm2115_vm1, %v2069_v52, %v2070_v30  ;;  %v2761_v22 = vsel %vm2718_vm2, %v2674_v1, %v2675_v32  ;;  %8254 = vmatpush3.bf16.msra.mxu1 %v9102_v26  ;;  %8326 = vmatpush3.bf16.msra.mxu0 %v9107_v27  ;;  %v8501_v52 = vld [vmem:[%s11381_s1 + $0x1e8] sm:$0xff]   ;;  %v2075_v43 = vrot.slane %v7855_v46, 2 }
 0x13c   :  { %v2186_v25 = vadd.f32 %v2158_v49, %v9248_v55  ;;  %v1898_v2 = vpop.f32.mrf.mxu1  ;;  %v2503_v14 = vpop.f32.mrf.mxu0  ;;  %8129 = vmatprep.mubr.bf16.mxu1 %v8633_v3  ;;  %8201 = vmatprep.mubr.bf16.mxu0 %v8633_v3  ;;  %v8502_v26 = vld [vmem:[%s11381_s1 + $0x228] sm:$0xff]   ;;  %v2187_v27 = vadd.f32 %v2157_v53, %v9244_v45  ;;  %v2760_v55 = vsel %vm2718_vm2, %v2675_v32, %v2676_v15  ;;  %v2680_v38 = vrot.slane %v9502_v36, 3 }
 0x13d   :  { %v2073_v1 = vrot.slane %v1898_v2, 2  ;;  %v2678_v16 = vrot.slane %v2503_v14, 3  ;;  %8255 = vmatprep.subr.bf16.mxu1 %v8499_v34  ;;  %8327 = vmatprep.subr.bf16.mxu0 %v8500_v54  ;;  %v9530_v63 = vadd.f32 %v2759_v39, %v2188_v13 }
 0x13e   :  { %v9532_v62 = vadd.f32 %v2761_v22, %v2186_v25  ;;  %v7856_v6 = vpop.f32.mrf.mxu1  ;;  %v7928_v33 = vpop.f32.mrf.mxu0  ;;  %v9535_v30 = vadd.f32 %v2760_v55, %v2187_v27  ;;  %v9558_v25 = vld [vmem:[%s11382_s0 + $0x18] sm:$0xff]   ;;  %v9573_v27 = vld [vmem:[%s11382_s0 + $0x20] sm:$0xff]  }
 0x13f   :  { %v2155_v45 = vsel %vm2115_vm1, %v2072_v41, %v2073_v1  ;;  %v2758_v15 = vsel %vm2718_vm2, %v2677_v31, %v2678_v16  ;;  %v2076_v32 = vrot.slane %v7856_v6, 2  ;;  %v2681_v50 = vrot.slane %v7928_v33, 3  ;;  %8256 = vmatpush3.bf16.msra.mxu1 %v8499_v34  ;;  %8328 = vmatpush3.bf16.msra.mxu0 %v8500_v54  ;;  %v8503_v31 = vld [vmem:[%s11381_s1 + $0x1e0] sm:$0xff]  }
 0x140   :  { %v2189_v39 = vadd.f32 %v2155_v45, %v9263_v9  ;;  %v1901_v13 = vpop.f32.mrf.mxu1  ;;  %v2506_v46 = vpop.f32.mrf.mxu0  ;;  %8257 = vmatprep.subr.bf16.mxu1 %v8501_v52  ;;  %8329 = vmatprep.subr.bf16.mxu0 %v8502_v26  ;;  %v8504_v9 = vld [vmem:[%s11381_s1 + $0x220] sm:$0xff]  }
 0x141   :  { %v2152_v36 = vsel %vm2115_vm1, %v2075_v43, %v2076_v32  ;;  %v2755_v53 = vsel %vm2718_vm2, %v2680_v38, %v2681_v50  ;;  %v2074_v41 = vrot.slane %v1901_v13, 2  ;;  %v2679_v49 = vrot.slane %v2506_v46, 3 }
 0x142   :  { %v2192_v34 = vadd.f32 %v2152_v36, %v9271_v61  ;;  %v7859_v54 = vpop.f32.mrf.mxu1  ;;  %v9553_v22 = vpop.f32.mrf.mxu0  ;;  %8130 = vmatmul.mubr.bf16.gmra.mxu1 %v9558_v25  ;;  %8202 = vmatmul.mubr.bf16.gmra.mxu0 %v9558_v25  ;;  %v9562_v2 = vadd.f32 %v2758_v15, %v2189_v39  ;;  %v8505_v15 = vld [vmem:[%s11381_s1 + $0x1d8] sm:$0xff]  }
 0x143   :  { %v2153_v14 = vsel %vm2115_vm1, %v2074_v41, %v2075_v43  ;;  %v2154_v61 = vsel %vm2115_vm1, %v2073_v1, %v2074_v41  ;;  %v2757_v3 = vsel %vm2718_vm2, %v2678_v16, %v2679_v49  ;;  %8133 = vmatprep.mubr.bf16.mxu1 %v9573_v27  ;;  %8205 = vmatprep.mubr.bf16.mxu0 %v9573_v27 }
 0x144   :  { %v2190_v55 = vadd.f32 %v2154_v61, %v9286_v21  ;;  %v1914_v6 = vpop.f32.mrf.mxu1  ;;  %v2519_v33 = vpop.f32.mrf.mxu0  ;;  %8258 = vmatpush3.bf16.msra.mxu1 %v8501_v52  ;;  %8330 = vmatpush3.bf16.msra.mxu0 %v8502_v26  ;;  %v2191_v1 = vadd.f32 %v2153_v14, %v9282_v20  ;;  %v2756_v16 = vsel %vm2718_vm2, %v2679_v49, %v2680_v38  ;;  %v8506_v21 = vld [vmem:[%s11381_s1 + $0x218] sm:$0xff]   ;;  %v2079_v20 = vrot.slane %v7859_v54, 2 }
 0x145   :  { %v2077_v43 = vrot.slane %v1914_v6, 2  ;;  %v2682_v45 = vrot.slane %v2519_v33, 3  ;;  %8259 = vmatprep.subr.bf16.mxu1 %v8503_v31  ;;  %8331 = vmatprep.subr.bf16.mxu0 %v8504_v9  ;;  %v9587_v39 = vadd.f32 %v2755_v53, %v2192_v34  ;;  %v2684_v26 = vrot.slane %v9553_v22, 3  ;;  %v9615_v6 = vld [vmem:[%s11382_s0 + $0x28] sm:$0xff]  }
 0x146   :  { %v9589_v52 = vadd.f32 %v2757_v3, %v2190_v55  ;;  %v7860_v38 = vpop.f32.mrf.mxu1  ;;  %v7932_v13 = vpop.f32.mrf.mxu0  ;;  %v9592_v46 = vadd.f32 %v2756_v16, %v2191_v1 }
 0x147   :  { %v2151_v36 = vsel %vm2115_vm1, %v2076_v32, %v2077_v43  ;;  %v2754_v41 = vsel %vm2718_vm2, %v2681_v50, %v2682_v45  ;;  %v2080_v49 = vrot.slane %v7860_v38, 2  ;;  %v2685_v14 = vrot.slane %v7932_v13, 3  ;;  %v8507_v32 = vld [vmem:[%s11381_s1 + $0x1d0] sm:$0xff]  }
 0x148   :  { %v2193_v53 = vadd.f32 %v2151_v36, %v9301_v12  ;;  %v1917_v34 = vpop.f32.mrf.mxu1  ;;  %v2522_v61 = vpop.f32.mrf.mxu0  ;;  %8260 = vmatpush3.bf16.msra.mxu1 %v8503_v31  ;;  %8332 = vmatpush3.bf16.msra.mxu0 %v8504_v9  ;;  %v8508_v12 = vld [vmem:[%s11381_s1 + $0x210] sm:$0xff]  }
 0x149   :  { %v2148_v54 = vsel %vm2115_vm1, %v2079_v20, %v2080_v49  ;;  %v2751_v22 = vsel %vm2718_vm2, %v2684_v26, %v2685_v14  ;;  %v2078_v3 = vrot.slane %v1917_v34, 2  ;;  %v2683_v55 = vrot.slane %v2522_v61, 3  ;;  %8261 = vmatprep.subr.bf16.mxu1 %v8505_v15  ;;  %8333 = vmatprep.subr.bf16.mxu0 %v8506_v21  ;;  %v9630_v38 = vld [vmem:[%s11382_s0 + $0x30] sm:$0xff]   ;;  %v8509_v34 = vld [vmem:[%s11381_s1 + $0x1c8] sm:$0xff]  }
 0x14a   :  { %v2196_v50 = vadd.f32 %v2148_v54, %v9309_v37  ;;  %v7863_v31 = vpop.f32.mrf.mxu1  ;;  %v9610_v9 = vpop.f32.mrf.mxu0  ;;  %8134 = vmatmul.mubr.bf16.gmra.mxu1 %v9615_v6  ;;  %8206 = vmatmul.mubr.bf16.gmra.mxu0 %v9615_v6  ;;  %v9619_v33 = vadd.f32 %v2754_v41, %v2193_v53 }
 0x14b   :  { %v2149_v1 = vsel %vm2115_vm1, %v2078_v3, %v2079_v20  ;;  %v2150_v37 = vsel %vm2115_vm1, %v2077_v43, %v2078_v3  ;;  %v2753_v16 = vsel %vm2718_vm2, %v2682_v45, %v2683_v55  ;;  %8137 = vmatprep.mubr.bf16.mxu1 %v9630_v38  ;;  %8209 = vmatprep.mubr.bf16.mxu0 %v9630_v38 }
 0x14c   :  { %v2194_v13 = vadd.f32 %v2150_v37, %v9324_v42  ;;  %v1930_v36 = vpop.f32.mrf.mxu1  ;;  %v2535_v41 = vpop.f32.mrf.mxu0  ;;  %8262 = vmatpush3.bf16.msra.mxu1 %v8505_v15  ;;  %8334 = vmatpush3.bf16.msra.mxu0 %v8506_v21  ;;  %v2195_v43 = vadd.f32 %v2149_v1, %v9320_v56  ;;  %v2752_v45 = vsel %vm2718_vm2, %v2683_v55, %v2684_v26  ;;  %v8510_v42 = vld [vmem:[%s11381_s1 + $0x208] sm:$0xff]   ;;  %v2083_v56 = vrot.slane %v7863_v31, 2 }
 0x14d   :  { %v2081_v20 = vrot.slane %v1930_v36, 2  ;;  %v2686_v53 = vrot.slane %v2535_v41, 3  ;;  %8263 = vmatprep.subr.bf16.mxu1 %v8507_v32  ;;  %8335 = vmatprep.subr.bf16.mxu0 %v8508_v12  ;;  %v9644_v61 = vadd.f32 %v2751_v22, %v2196_v50  ;;  %v2688_v21 = vrot.slane %v9610_v9, 3 }
 0x14e   :  { %v9646_v15 = vadd.f32 %v2753_v16, %v2194_v13  ;;  %v7864_v26 = vpop.f32.mrf.mxu1  ;;  %v7936_v54 = vpop.f32.mrf.mxu0  ;;  %v9649_v3 = vadd.f32 %v2752_v45, %v2195_v43  ;;  %v9670_v43 = vld [vmem:[%s11382_s0 + $0x38] sm:$0xff]  }
 0x14f   :  { %v2147_v55 = vsel %vm2115_vm1, %v2080_v49, %v2081_v20  ;;  %v2750_v1 = vsel %vm2718_vm2, %v2685_v14, %v2686_v53  ;;  %v2084_v37 = vrot.slane %v7864_v26, 2  ;;  %v2689_v36 = vrot.slane %v7936_v54, 3  ;;  %v8511_v49 = vld [vmem:[%s11381_s1 + $0x1c0] sm:$0xff]   ;;  %11454 = vst [vmem:[#allocation28_spill] sm:$0xff] %v9670_v43 }
 0x150   :  { %v2197_v22 = vadd.f32 %v2147_v55, %v9338_v40  ;;  %v1933_v50 = vpop.f32.mrf.mxu1  ;;  %v2538_v16 = vpop.f32.mrf.mxu0  ;;  %8264 = vmatpush3.bf16.msra.mxu1 %v8507_v32  ;;  %8336 = vmatpush3.bf16.msra.mxu0 %v8508_v12  ;;  %v8512_v40 = vld [vmem:[%s11381_s1 + $0x200] sm:$0xff]  }
 0x151   :  { %v2144_v31 = vsel %vm2115_vm1, %v2083_v56, %v2084_v37  ;;  %v2747_v9 = vsel %vm2718_vm2, %v2688_v21, %v2689_v36  ;;  %v2082_v13 = vrot.slane %v1933_v50, 2  ;;  %v2687_v41 = vrot.slane %v2538_v16, 3  ;;  %8265 = vmatprep.subr.bf16.mxu1 %v8509_v34  ;;  %8337 = vmatprep.subr.bf16.mxu0 %v8510_v42  ;;  %v9685_v55 = vld [vmem:[%s11382_s0 + $0x40] sm:$0xff]  }
 0x152   :  { %v2200_v14 = vadd.f32 %v2144_v31, %v9352_v29  ;;  %v7867_v32 = vpop.f32.mrf.mxu1  ;;  %v7939_v12 = vpop.f32.mrf.mxu0  ;;  %8138 = vmatmul.mubr.bf16.gmra.mxu1 %v9670_v43  ;;  %8210 = vmatmul.mubr.bf16.gmra.mxu0 %v9670_v43  ;;  %v9674_v45 = vadd.f32 %v2750_v1, %v2197_v22  ;;  %11456 = vst [vmem:[#allocation30_spill] sm:$0xff] %v9685_v55 }
 0x153   :  { %v2145_v26 = vsel %vm2115_vm1, %v2082_v13, %v2083_v56  ;;  %v2146_v54 = vsel %vm2115_vm1, %v2081_v20, %v2082_v13  ;;  %v2749_v29 = vsel %vm2718_vm2, %v2686_v53, %v2687_v41  ;;  %8141 = vmatprep.mubr.bf16.mxu1 %v9685_v55  ;;  %8213 = vmatprep.mubr.bf16.mxu0 %v9685_v55  ;;  %v2692_v55 = vrot.slane %v7939_v12, 3 }
 0x154   :  { %11455 = vst [vmem:[#allocation29_spill] sm:$0xff] %v9674_v45  ;;  %v2198_v1 = vadd.f32 %v2146_v54, %v9374_v24  ;;  %v1946_v22 = vpop.f32.mrf.mxu1  ;;  %v2551_v50 = vpop.f32.mrf.mxu0  ;;  %8266 = vmatpush3.bf16.msra.mxu1 %v8509_v34  ;;  %8338 = vmatpush3.bf16.msra.mxu0 %v8510_v42  ;;  %v2199_v20 = vadd.f32 %v2145_v26, %v9370_v48  ;;  %v2087_v45 = vrot.slane %v7867_v32, 2 }
 0x155   :  { %v2748_v53 = vsel %vm2718_vm2, %v2687_v41, %v2688_v21  ;;  %v2085_v56 = vrot.slane %v1946_v22, 2  ;;  %v2690_v16 = vrot.slane %v2551_v50, 3  ;;  %8267 = vmatprep.subr.bf16.mxu1 %v8511_v49  ;;  %8339 = vmatprep.subr.bf16.mxu0 %v8512_v40  ;;  %v9693_v31 = vadd.f32 %v2747_v9, %v2200_v14  ;;  %v9727_v50 = vld [vmem:[%s11382_s0 + $0x50] sm:$0xff]  }
 0x156   :  { %v9695_v13 = vadd.f32 %v2749_v29, %v2198_v1  ;;  %v7868_v24 = vpop.f32.mrf.mxu1  ;;  %v7940_v54 = vpop.f32.mrf.mxu0  ;;  %v9697_v43 = vadd.f32 %v2748_v53, %v2199_v20 }
 0x157   :  { %v2143_v48 = vsel %vm2115_vm1, %v2084_v37, %v2085_v56  ;;  %v2746_v34 = vsel %vm2718_vm2, %v2689_v36, %v2690_v16  ;;  %v2088_v42 = vrot.slane %v7868_v24, 2  ;;  %v2693_v21 = vrot.slane %v7940_v54, 3 }
 0x158   :  { %v2201_v41 = vadd.f32 %v2143_v48, %v9348_v19  ;;  %v1949_v9 = vpop.f32.mrf.mxu1  ;;  %v2554_v14 = vpop.f32.mrf.mxu0  ;;  %8268 = vmatpush3.bf16.msra.mxu1 %v8511_v49  ;;  %8340 = vmatpush3.bf16.msra.mxu0 %v8512_v40  ;;  %v9712_v19 = vld [vmem:[%s11382_s0 + $0x48] sm:$0xff]  }
 0x159   :  { %v2140_v32 = vsel %vm2115_vm1, %v2087_v45, %v2088_v42  ;;  %v2743_v12 = vsel %vm2718_vm2, %v2692_v55, %v2693_v21  ;;  %v2086_v26 = vrot.slane %v1949_v9, 2  ;;  %v2691_v29 = vrot.slane %v2554_v14, 3 }
 0x15a   :  { %v2204_v37 = vadd.f32 %v2140_v32, %v9118_v44  ;;  %v7871_v1 = vpop.f32.mrf.mxu1  ;;  %v7943_v36 = vpop.f32.mrf.mxu0  ;;  %8142 = vmatmul.mubr.bf16.gmra.mxu1 %v9712_v19  ;;  %8214 = vmatmul.mubr.bf16.gmra.mxu0 %v9712_v19  ;;  %v9716_v49 = vadd.f32 %v2746_v34, %v2201_v41 }
 0x15b   :  { %v2141_v40 = vsel %vm2115_vm1, %v2086_v26, %v2087_v45  ;;  %v2142_v22 = vsel %vm2115_vm1, %v2085_v56, %v2086_v26  ;;  %v2745_v44 = vsel %vm2718_vm2, %v2690_v16, %v2691_v29  ;;  %8145 = vmatprep.mubr.bf16.mxu1 %v9727_v50  ;;  %8217 = vmatprep.mubr.bf16.mxu0 %v9727_v50  ;;  %v2091_v41 = vrot.slane %v7871_v1, 2 }
 0x15c   :  { %v2202_v20 = vadd.f32 %v2142_v22, %v9142_v60  ;;  %v1962_v53 = vpop.f32.mrf.mxu1  ;;  %v2567_v24 = vpop.f32.mrf.mxu0  ;;  %v2203_v45 = vadd.f32 %v2141_v40, %v9136_v59  ;;  %v2744_v56 = vsel %vm2718_vm2, %v2691_v29, %v2692_v55  ;;  %v9735_v48 = vadd.f32 %v2743_v12, %v2204_v37 }
 0x15d   :  { %v2089_v54 = vrot.slane %v1962_v53, 2  ;;  %v2694_v16 = vrot.slane %v2567_v24, 3  ;;  %v2696_v9 = vrot.slane %v7943_v36, 3 }
 0x15e   :  { %v9737_v34 = vadd.f32 %v2745_v44, %v2202_v20  ;;  %v7872_v14 = vpop.f32.mrf.mxu1  ;;  %v7944_v32 = vpop.f32.mrf.mxu0  ;;  %v9739_v26 = vadd.f32 %v2744_v56, %v2203_v45  ;;  %v9769_v56 = vld [vmem:[%s11382_s0 + $0x60] sm:$0xff]  }
 0x15f   :  { %v2139_v60 = vsel %vm2115_vm1, %v2088_v42, %v2089_v54  ;;  %v2742_v59 = vsel %vm2718_vm2, %v2693_v21, %v2694_v16  ;;  %v2092_v40 = vrot.slane %v7872_v14, 2  ;;  %v2697_v55 = vrot.slane %v7944_v32, 3  ;;  %v9754_v21 = vld [vmem:[%s11382_s0 + $0x58] sm:$0xff]   ;;  %11459 = vst [vmem:[#allocation33_spill] sm:$0xff] %v9769_v56 }
 0x160   :  { %v2205_v29 = vadd.f32 %v2139_v60, %v9152_v7  ;;  %v1965_v12 = vpop.f32.mrf.mxu1  ;;  %v2570_v37 = vpop.f32.mrf.mxu0  ;;  %11457 = vst [vmem:[#allocation31_spill] sm:$0xff] %v9754_v21 }
 0x161   :  { %v2136_v1 = vsel %vm2115_vm1, %v2091_v41, %v2092_v40  ;;  %v2739_v36 = vsel %vm2718_vm2, %v2696_v9, %v2697_v55  ;;  %v2090_v22 = vrot.slane %v1965_v12, 2  ;;  %v2695_v44 = vrot.slane %v2570_v37, 3 }
 0x162   :  { %v2208_v20 = vadd.f32 %v2136_v1, %v9160_v10  ;;  %v7875_v42 = vpop.f32.mrf.mxu1  ;;  %v7947_v53 = vpop.f32.mrf.mxu0  ;;  %8146 = vmatmul.mubr.bf16.gmra.mxu1 %v9754_v21  ;;  %8218 = vmatmul.mubr.bf16.gmra.mxu0 %v9754_v21  ;;  %v9758_v7 = vadd.f32 %v2742_v59, %v2205_v29 }
 0x163   :  { %v2137_v24 = vsel %vm2115_vm1, %v2090_v22, %v2091_v41  ;;  %v2138_v45 = vsel %vm2115_vm1, %v2089_v54, %v2090_v22  ;;  %v2741_v10 = vsel %vm2718_vm2, %v2694_v16, %v2695_v44  ;;  %8149 = vmatprep.mubr.bf16.mxu1 %v9769_v56  ;;  %8221 = vmatprep.mubr.bf16.mxu0 %v9769_v56  ;;  %v11460_v41 = vld [vmem:[#allocation3_spill] sm:$0xff]  ;;  %v2095_v1 = vrot.slane %v7875_v42, 2 }
 0x164   :  { %11458 = vst [vmem:[#allocation32_spill] sm:$0xff] %v9758_v7  ;;  %v2206_v14 = vadd.f32 %v2138_v45, %v9178_v18  ;;  %v1978_v32 = vpop.f32.mrf.mxu1  ;;  %v2583_v60 = vpop.f32.mrf.mxu0  ;;  %v2207_v59 = vadd.f32 %v2137_v24, %v11460_v41  ;;  %v2740_v54 = vsel %vm2718_vm2, %v2695_v44, %v2696_v9  ;;  %v9777_v12 = vadd.f32 %v2739_v36, %v2208_v20  ;;  %v11464_v44 = vld [vmem:[#allocation4_spill] sm:$0xff] }
 0x165   :  { %v2093_v29 = vrot.slane %v1978_v32, 2  ;;  %v2698_v16 = vrot.slane %v2583_v60, 3  ;;  %v2700_v22 = vrot.slane %v7947_v53, 3  ;;  %v11465_v60 = vld [vmem:[#allocation5_spill] sm:$0xff] }
 0x166   :  { %11461 = vst [vmem:[#allocation3_spill] sm:$0xff] %v9777_v12  ;;  %v9779_v37 = vadd.f32 %v2741_v10, %v2206_v14  ;;  %v7876_v7 = vpop.f32.mrf.mxu1  ;;  %v7948_v21 = vpop.f32.mrf.mxu0  ;;  %v9781_v56 = vadd.f32 %v2740_v54, %v2207_v59 }
 0x167   :  { %v2135_v18 = vsel %vm2115_vm1, %v2092_v40, %v2093_v29  ;;  %v2738_v24 = vsel %vm2718_vm2, %v2697_v55, %v2698_v16  ;;  %v2096_v45 = vrot.slane %v7876_v7, 2  ;;  %v2701_v9 = vrot.slane %v7948_v21, 3  ;;  %v9796_v55 = vld [vmem:[%s11382_s0 + $0x68] sm:$0xff]  }
 0x168   :  { %11462 = vst [vmem:[#allocation34_spill] sm:$0xff] %v9779_v37  ;;  %11463 = vst [vmem:[#allocation35_spill] sm:$0xff] %v9781_v56  ;;  %v2209_v32 = vadd.f32 %v2135_v18, %v11464_v44  ;;  %v1981_v36 = vpop.f32.mrf.mxu1  ;;  %v2586_v20 = vpop.f32.mrf.mxu0  ;;  %v11468_v44 = vld [vmem:[#allocation8_spill] sm:$0xff] }
 0x169   :  { %v2132_v42 = vsel %vm2115_vm1, %v2095_v1, %v2096_v45  ;;  %v2735_v53 = vsel %vm2718_vm2, %v2700_v22, %v2701_v9  ;;  %v2094_v10 = vrot.slane %v1981_v36, 2  ;;  %v2699_v14 = vrot.slane %v2586_v20, 3  ;;  %11466 = vst [vmem:[#allocation4_spill] sm:$0xff] %v9796_v55  ;;  %v11469_v36 = vld [vmem:[#allocation7_spill] sm:$0xff] }
 0x16a   :  { %v2212_v41 = vadd.f32 %v2132_v42, %v11465_v60  ;;  %v7879_v40 = vpop.f32.mrf.mxu1  ;;  %v7951_v59 = vpop.f32.mrf.mxu0  ;;  %8150 = vmatmul.mubr.bf16.gmra.mxu1 %v9796_v55  ;;  %8222 = vmatmul.mubr.bf16.gmra.mxu0 %v9796_v55  ;;  %v9800_v21 = vadd.f32 %v2738_v24, %v2209_v32  ;;  %v11470_v55 = vld [vmem:[#allocation6_spill] sm:$0xff] }
 0x16b   :  { %v2133_v7 = vsel %vm2115_vm1, %v2094_v10, %v2095_v1  ;;  %v2134_v54 = vsel %vm2115_vm1, %v2093_v29, %v2094_v10  ;;  %v2737_v18 = vsel %vm2718_vm2, %v2698_v16, %v2699_v14  ;;  %8153 = vmatprep.mubr.bf16.mxu1 %v11468_v44  ;;  %8225 = vmatprep.mubr.bf16.mxu0 %v11468_v44  ;;  %v2099_v16 = vrot.slane %v7879_v40, 2 }
 0x16c   :  { %11467 = vst [vmem:[#allocation5_spill] sm:$0xff] %v9800_v21  ;;  %v2210_v20 = vadd.f32 %v2134_v54, %v11469_v36  ;;  %v1994_v42 = vpop.f32.mrf.mxu1  ;;  %v2599_v60 = vpop.f32.mrf.mxu0  ;;  %v2211_v24 = vadd.f32 %v2133_v7, %v11470_v55  ;;  %v2736_v32 = vsel %vm2718_vm2, %v2699_v14, %v2700_v22  ;;  %v9814_v12 = vadd.f32 %v2735_v53, %v2212_v41  ;;  %v11474_v14 = vld [vmem:[#allocation9_spill] sm:$0xff] }
 0x16d   :  { %v2097_v1 = vrot.slane %v1994_v42, 2  ;;  %v2702_v21 = vrot.slane %v2599_v60, 3  ;;  %v2704_v10 = vrot.slane %v7951_v59, 3  ;;  %v11475_v42 = vld [vmem:[#allocation10_spill] sm:$0xff] }
 0x16e   :  { %11471 = vst [vmem:[#allocation8_spill] sm:$0xff] %v9814_v12  ;;  %v9816_v29 = vadd.f32 %v2737_v18, %v2210_v20  ;;  %v7880_v37 = vpop.f32.mrf.mxu1  ;;  %v7952_v56 = vpop.f32.mrf.mxu0  ;;  %v9818_v44 = vadd.f32 %v2736_v32, %v2211_v24 }
 0x16f   :  { %v2131_v54 = vsel %vm2115_vm1, %v2096_v45, %v2097_v1  ;;  %v2734_v55 = vsel %vm2718_vm2, %v2701_v9, %v2702_v21  ;;  %v2100_v7 = vrot.slane %v7880_v37, 2  ;;  %v2705_v22 = vrot.slane %v7952_v56, 3  ;;  %v9833_v56 = vld [vmem:[%s11382_s0 + $0x78] sm:$0xff]  }
 0x170   :  { %11472 = vst [vmem:[#allocation7_spill] sm:$0xff] %v9816_v29  ;;  %11473 = vst [vmem:[#allocation6_spill] sm:$0xff] %v9818_v44  ;;  %v2213_v36 = vadd.f32 %v2131_v54, %v11474_v14  ;;  %v1997_v53 = vpop.f32.mrf.mxu1  ;;  %v2602_v41 = vpop.f32.mrf.mxu0  ;;  %v9848_v14 = vld [vmem:[%s11382_s0 + $0x80] sm:$0xff]  }
 0x171   :  { %v2128_v40 = vsel %vm2115_vm1, %v2099_v16, %v2100_v7  ;;  %v2731_v59 = vsel %vm2718_vm2, %v2704_v10, %v2705_v22  ;;  %v2098_v18 = vrot.slane %v1997_v53, 2  ;;  %v2703_v20 = vrot.slane %v2602_v41, 3  ;;  %11476 = vst [vmem:[#allocation9_spill] sm:$0xff] %v9833_v56  ;;  %11478 = vst [vmem:[#allocation36_spill] sm:$0xff] %v9848_v14 }
 0x172   :  { %v2216_v60 = vadd.f32 %v2128_v40, %v11475_v42  ;;  %v7883_v45 = vpop.f32.mrf.mxu1  ;;  %v7955_v24 = vpop.f32.mrf.mxu0  ;;  %8154 = vmatmul.mubr.bf16.gmra.mxu1 %v9833_v56  ;;  %8226 = vmatmul.mubr.bf16.gmra.mxu0 %v9833_v56  ;;  %v9837_v37 = vadd.f32 %v2734_v55, %v2213_v36  ;;  %v11479_v55 = vld [vmem:[#allocation12_spill] sm:$0xff] }
 0x173   :  { %v2129_v9 = vsel %vm2115_vm1, %v2098_v18, %v2099_v16  ;;  %v2130_v32 = vsel %vm2115_vm1, %v2097_v1, %v2098_v18  ;;  %v2733_v54 = vsel %vm2718_vm2, %v2702_v21, %v2703_v20  ;;  %8157 = vmatprep.mubr.bf16.mxu1 %v9848_v14  ;;  %8229 = vmatprep.mubr.bf16.mxu0 %v9848_v14  ;;  %v11480_v16 = vld [vmem:[#allocation11_spill] sm:$0xff]  ;;  %v2103_v56 = vrot.slane %v7883_v45, 2 }
 0x174   :  { %11477 = vst [vmem:[#allocation10_spill] sm:$0xff] %v9837_v37  ;;  %v2214_v36 = vadd.f32 %v2130_v32, %v11479_v55  ;;  %v2010_v53 = vpop.f32.mrf.mxu1  ;;  %v2615_v41 = vpop.f32.mrf.mxu0  ;;  %v2215_v40 = vadd.f32 %v2129_v9, %v11480_v16  ;;  %v2732_v1 = vsel %vm2718_vm2, %v2703_v20, %v2704_v10  ;;  %v9856_v42 = vadd.f32 %v2731_v59, %v2216_v60  ;;  %v11484_v20 = vld [vmem:[#allocation13_spill] sm:$0xff] }
 0x175   :  { %v2101_v18 = vrot.slane %v2010_v53, 2  ;;  %v2706_v21 = vrot.slane %v2615_v41, 3  ;;  %v2708_v12 = vrot.slane %v7955_v24, 3  ;;  %v11485_v41 = vld [vmem:[#allocation14_spill] sm:$0xff] }
 0x176   :  { %11481 = vst [vmem:[#allocation12_spill] sm:$0xff] %v9856_v42  ;;  %v9858_v37 = vadd.f32 %v2733_v54, %v2214_v36  ;;  %v7884_v29 = vpop.f32.mrf.mxu1  ;;  %v7956_v44 = vpop.f32.mrf.mxu0  ;;  %v9860_v14 = vadd.f32 %v2732_v1, %v2215_v40 }
 0x177   :  { %v2127_v32 = vsel %vm2115_vm1, %v2100_v7, %v2101_v18  ;;  %v2730_v9 = vsel %vm2718_vm2, %v2705_v22, %v2706_v21  ;;  %v2104_v55 = vrot.slane %v7884_v29, 2  ;;  %v2709_v10 = vrot.slane %v7956_v44, 3  ;;  %v9875_v29 = vld [vmem:[%s11382_s0 + $0x88] sm:$0xff]  }
 0x178   :  { %11482 = vst [vmem:[#allocation11_spill] sm:$0xff] %v9858_v37  ;;  %11483 = vst [vmem:[#allocation37_spill] sm:$0xff] %v9860_v14  ;;  %v2217_v53 = vadd.f32 %v2127_v32, %v11484_v20  ;;  %v2013_v59 = vpop.f32.mrf.mxu1  ;;  %v2618_v60 = vpop.f32.mrf.mxu0  ;;  %v9890_v20 = vld [vmem:[%s11382_s0 + $0x90] sm:$0xff]  }
 0x179   :  { %v2124_v45 = vsel %vm2115_vm1, %v2103_v56, %v2104_v55  ;;  %v2727_v24 = vsel %vm2718_vm2, %v2708_v12, %v2709_v10  ;;  %v2102_v54 = vrot.slane %v2013_v59, 2  ;;  %v2707_v36 = vrot.slane %v2618_v60, 3  ;;  %11486 = vst [vmem:[#allocation13_spill] sm:$0xff] %v9875_v29  ;;  %11488 = vst [vmem:[#allocation38_spill] sm:$0xff] %v9890_v20 }
 0x17a   :  { %v2220_v16 = vadd.f32 %v2124_v45, %v11485_v41  ;;  %v7887_v7 = vpop.f32.mrf.mxu1  ;;  %v7959_v40 = vpop.f32.mrf.mxu0  ;;  %8158 = vmatmul.mubr.bf16.gmra.mxu1 %v9875_v29  ;;  %8230 = vmatmul.mubr.bf16.gmra.mxu0 %v9875_v29  ;;  %v9879_v44 = vadd.f32 %v2730_v9, %v2217_v53  ;;  %v11489_v9 = vld [vmem:[#allocation16_spill] sm:$0xff] }
 0x17b   :  { %v2125_v22 = vsel %vm2115_vm1, %v2102_v54, %v2103_v56  ;;  %v2126_v1 = vsel %vm2115_vm1, %v2101_v18, %v2102_v54  ;;  %v2729_v32 = vsel %vm2718_vm2, %v2706_v21, %v2707_v36  ;;  %8161 = vmatprep.mubr.bf16.mxu1 %v9890_v20  ;;  %8233 = vmatprep.mubr.bf16.mxu0 %v9890_v20  ;;  %v11490_v56 = vld [vmem:[#allocation15_spill] sm:$0xff]  ;;  %v2107_v29 = vrot.slane %v7887_v7, 2 }
 0x17c   :  { %11487 = vst [vmem:[#allocation14_spill] sm:$0xff] %v9879_v44  ;;  %v2218_v53 = vadd.f32 %v2126_v1, %v11489_v9  ;;  %v2026_v59 = vpop.f32.mrf.mxu1  ;;  %v2631_v60 = vpop.f32.mrf.mxu0  ;;  %v2219_v45 = vadd.f32 %v2125_v22, %v11490_v56  ;;  %v2728_v18 = vsel %vm2718_vm2, %v2707_v36, %v2708_v12  ;;  %v9898_v41 = vadd.f32 %v2727_v24, %v2220_v16  ;;  %v11494_v36 = vld [vmem:[#allocation17_spill] sm:$0xff] }
 0x17d   :  { %v2105_v54 = vrot.slane %v2026_v59, 2  ;;  %v2710_v21 = vrot.slane %v2631_v60, 3  ;;  %v2712_v42 = vrot.slane %v7959_v40, 3  ;;  %v11495_v60 = vld [vmem:[#allocation18_spill] sm:$0xff] }
 0x17e   :  { %11491 = vst [vmem:[#allocation16_spill] sm:$0xff] %v9898_v41  ;;  %v9900_v44 = vadd.f32 %v2729_v32, %v2218_v53  ;;  %v7888_v37 = vpop.f32.mrf.mxu1  ;;  %v7960_v14 = vpop.f32.mrf.mxu0  ;;  %v9902_v20 = vadd.f32 %v2728_v18, %v2219_v45 }
 0x17f   :  { %v2123_v1 = vsel %vm2115_vm1, %v2104_v55, %v2105_v54  ;;  %v2726_v22 = vsel %vm2718_vm2, %v2709_v10, %v2710_v21  ;;  %v2108_v9 = vrot.slane %v7888_v37, 2  ;;  %v2713_v12 = vrot.slane %v7960_v14, 3  ;;  %v9919_v37 = vld [vmem:[%s11382_s0 + $0x98] sm:$0xff]  }
 0x180   :  { %11492 = vst [vmem:[#allocation15_spill] sm:$0xff] %v9900_v44  ;;  %11493 = vst [vmem:[#allocation39_spill] sm:$0xff] %v9902_v20  ;;  %v2221_v59 = vadd.f32 %v2123_v1, %v11494_v36  ;;  %v2029_v24 = vpop.f32.mrf.mxu1  ;;  %v2634_v16 = vpop.f32.mrf.mxu0  ;;  %v9934_v36 = vld [vmem:[%s11382_s0 + $0xa0] sm:$0xff]  }
 0x181   :  { %v2120_v7 = vsel %vm2115_vm1, %v2107_v29, %v2108_v9  ;;  %v2723_v40 = vsel %vm2718_vm2, %v2712_v42, %v2713_v12  ;;  %v2106_v32 = vrot.slane %v2029_v24, 2  ;;  %v2711_v53 = vrot.slane %v2634_v16, 3  ;;  %11496 = vst [vmem:[#allocation17_spill] sm:$0xff] %v9919_v37  ;;  %11498 = vst [vmem:[#allocation40_spill] sm:$0xff] %v9934_v36 }
 0x182   :  { %v2224_v56 = vadd.f32 %v2120_v7, %v11495_v60  ;;  %v7891_v55 = vpop.f32.mrf.mxu1  ;;  %v9914_v45 = vpop.f32.mrf.mxu0  ;;  %8162 = vmatmul.mubr.bf16.gmra.mxu1 %v9919_v37  ;;  %8234 = vmatmul.mubr.bf16.gmra.mxu0 %v9919_v37  ;;  %v9923_v14 = vadd.f32 %v2726_v22, %v2221_v59  ;;  %v11499_v22 = vld [vmem:[#allocation20_spill] sm:$0xff] }
 0x183   :  { %v2121_v10 = vsel %vm2115_vm1, %v2106_v32, %v2107_v29  ;;  %v2122_v18 = vsel %vm2115_vm1, %v2105_v54, %v2106_v32  ;;  %v2725_v1 = vsel %vm2718_vm2, %v2710_v21, %v2711_v53  ;;  %8165 = vmatprep.mubr.bf16.mxu1 %v9934_v36  ;;  %8237 = vmatprep.mubr.bf16.mxu0 %v9934_v36  ;;  %v11500_v29 = vld [vmem:[#allocation19_spill] sm:$0xff]  ;;  %v2111_v37 = vrot.slane %v7891_v55, 2 }
 0x184   :  { %11497 = vst [vmem:[#allocation18_spill] sm:$0xff] %v9923_v14  ;;  %v2222_v59 = vadd.f32 %v2122_v18, %v11499_v22  ;;  %v2042_v24 = vpop.f32.mrf.mxu1  ;;  %v2647_v16 = vpop.f32.mrf.mxu0  ;;  %v2223_v7 = vadd.f32 %v2121_v10, %v11500_v29  ;;  %v2724_v54 = vsel %vm2718_vm2, %v2711_v53, %v2712_v42  ;;  %v9942_v60 = vadd.f32 %v2723_v40, %v2224_v56  ;;  %v11503_v22 = vld [vmem:[#allocation21_spill] sm:$0xff] }
 0x185   :  { %v2109_v32 = vrot.slane %v2042_v24, 2  ;;  %v2714_v21 = vrot.slane %v2647_v16, 3  ;;  %v2716_v41 = vrot.slane %v9914_v45, 3  ;;  %v11504_v45 = vld [vmem:[#allocation26_spill] sm:$0xff]  ;;  %v11506_v16 = vld [vmem:[#allocation27_spill] sm:$0xff] }
 0x186   :  { %11501 = vst [vmem:[#allocation20_spill] sm:$0xff] %v9942_v60  ;;  %v9944_v14 = vadd.f32 %v2725_v1, %v2222_v59  ;;  %v7892_v44 = vpop.f32.mrf.mxu1  ;;  %v7964_v36 = vpop.f32.mrf.mxu0  ;;  %v9947_v20 = vadd.f32 %v2724_v54, %v2223_v7  ;;  %v11505_v59 = vrot.slane %v11504_v45, 2  ;;  %v11507_v29 = vrot.slane %v11506_v16, 3  ;;  %v11509_v7 = vld [vmem:[#allocation23_spill] sm:$0xff] }
 0x187   :  { %v2119_v18 = vsel %vm2115_vm1, %v2108_v9, %v2109_v32  ;;  %v2722_v10 = vsel %vm2718_vm2, %v2713_v12, %v2714_v21  ;;  %v2112_v42 = vrot.slane %v7892_v44, 2  ;;  %v2717_v53 = vrot.slane %v7964_v36, 3  ;;  %v11508_v12 = vld [vmem:[#allocation22_spill] sm:$0xff] }
 0x188   :  { %11502 = vst [vmem:[#allocation19_spill] sm:$0xff] %v9944_v14  ;;  %v2225_v40 = vadd.f32 %v2119_v18, %v11503_v22  ;;  %v2045_v56 = vpop.f32.mrf.mxu1  ;;  %v2650_v1 = vpop.f32.mrf.mxu0 }
 0x189   :  { %v2116_v55 = vsel %vm2115_vm1, %v2111_v37, %v2112_v42  ;;  %v2171_v24 = vsel %vm2115_vm1, %v2112_v42, %v11505_v59  ;;  %v2719_v9 = vsel %vm2718_vm2, %v2716_v41, %v2717_v53  ;;  %v2774_v44 = vsel %vm2718_vm2, %v2717_v53, %v11507_v29  ;;  %v9971_v42 = vld [vmem:[%s11382_s0 + $0xa8] sm:$0xff]   ;;  %v9978_v53 = vld [vmem:[%s11382_s0 + $0xb0] sm:$0xff]  }
 0x18a   :  { %v2172_v36 = vadd.f32 %v2116_v55, %v11508_v12  ;;  %v2173_v54 = vadd.f32 %v2171_v24, %v11509_v7  ;;  %v2110_v18 = vrot.slane %v2045_v56, 2  ;;  %v2715_v22 = vrot.slane %v2650_v1, 3  ;;  %v7983_v60 = vpop.f32.mrf.mxu1  ;;  %v8055_v14 = vpop.f32.mrf.mxu0  ;;  %11510 = vst [vmem:[#allocation21_spill] sm:$0xff] %v9971_v42  ;;  %8166 = vmatmul.mubr.bf16.gmra.mxu1 %v9971_v42  ;;  %8238 = vmatmul.mubr.bf16.gmra.mxu0 %v9971_v42  ;;  %v11514_v29 = vld [vmem:[#allocation25_spill] sm:$0xff] }
 0x18b   :  { %11511 = vst [vmem:[#allocation26_spill] sm:$0xff] %v9978_v53  ;;  %8169 = vmatprep.mubr.bf16.mxu1 %v9978_v53  ;;  %8241 = vmatprep.mubr.bf16.mxu0 %v9978_v53  ;;  %v9982_v56 = vadd.f32 %v2722_v10, %v2225_v40  ;;  %v11515_v10 = vld [vmem:[#allocation24_spill] sm:$0xff] }
 0x18c   :  { %v9984_v1 = vadd.f32 %v2719_v9, %v2172_v36  ;;  %v2117_v55 = vsel %vm2115_vm1, %v2110_v18, %v2111_v37  ;;  %v2118_v45 = vsel %vm2115_vm1, %v2109_v32, %v2110_v18  ;;  %v2721_v59 = vsel %vm2718_vm2, %v2714_v21, %v2715_v22  ;;  %v9992_v24 = vpop.f32.mrf.mxu1  ;;  %v9994_v16 = vpop.f32.mrf.mxu0 }
 0x18d   :  { %11512 = vst [vmem:[#allocation27_spill] sm:$0xff] %v9982_v56  ;;  %11513 = vst [vmem:[#allocation22_spill] sm:$0xff] %v9994_v16  ;;  %v2226_v12 = vadd.f32 %v2118_v45, %v11514_v29  ;;  %v2776_v7 = vadd.f32 %v2774_v44, %v2173_v54  ;;  %v2227_v40 = vadd.f32 %v2117_v55, %v11515_v10  ;;  %v3267_v18 = vrot.slane %v7983_v60, 7 }
 0x18e   :  { %v7984_v9 = vpop.f32.mrf.mxu1  ;;  %v8056_v36 = vpop.f32.mrf.mxu0  ;;  %v2720_v37 = vsel %vm2718_vm2, %v2715_v22, %v2716_v41  ;;  %v11417_v45 = vrot.slane %v9992_v24, 7  ;;  %v10012_v41 = vld [vmem:[%s11382_s0 + $0xb8] sm:$0xff]  }
 0x18f   :  { %v10001_v32 = vadd.f32 %v2721_v59, %v2226_v12  ;;  %v3268_v21 = vrot.slane %v7984_v9, 7  ;;  %v10003_v56 = vadd.f32 %v2720_v37, %v2227_v40  ;;  %11517 = vst [vmem:[#allocation25_spill] sm:$0xff] %v10012_v41 }
 0x190   :  { %v3045_v53 = vpop.f32.mrf.mxu1  ;;  %v3648_v16 = vpop.f32.mrf.mxu0 }
 0x191   :  { %11516 = vst [vmem:[#allocation23_spill] sm:$0xff] %v10001_v32  ;;  %v3374_v44 = vsel %vm3321_vm3, %v3267_v18, %v3268_v21  ;;  %v3266_v54 = vrot.slane %v3045_v53, 7 }
 0x192   :  { %v3381_v55 = vadd.f32 %v3374_v44, %v9419_v47  ;;  %v7987_v29 = vpop.f32.mrf.mxu1  ;;  %v8059_v10 = vpop.f32.mrf.mxu0  ;;  %8170 = vmatmul.mubr.bf16.gmra.mxu1 %v10012_v41  ;;  %8242 = vmatmul.mubr.bf16.gmra.mxu0 %v10012_v41  ;;  %v10025_v47 = vld [vmem:[%s11382_s0 + $0xc0] sm:$0xff]  }
 0x193   :  { %v3375_v60 = vsel %vm3321_vm3, %v3266_v54, %v3267_v18  ;;  %v3376_v22 = vsel %vm3321_vm3, %v11417_v45, %v3266_v54  ;;  %8173 = vmatprep.mubr.bf16.mxu1 %v10025_v47  ;;  %8245 = vmatprep.mubr.bf16.mxu0 %v10025_v47  ;;  %v3271_v41 = vrot.slane %v7987_v29, 7  ;;  %v10047_v29 = vld [vmem:[%s11382_s0 + $0xc8] sm:$0xff]  }
 0x194   :  { %v10029_v53 = vadd.f32 %v8056_v36, %v3381_v55  ;;  %v3380_v59 = vadd.f32 %v3375_v60, %v9417_v28  ;;  %v3379_v12 = vadd.f32 %v3376_v22, %v2776_v7  ;;  %v3058_v40 = vpop.f32.mrf.mxu1  ;;  %v3661_v9 = vpop.f32.mrf.mxu0 }
 0x195   :  { %v3269_v37 = vrot.slane %v3058_v40, 7 }
 0x196   :  { %11518 = vst [vmem:[#allocation24_spill] sm:$0xff] %v10029_v53  ;;  %v10032_v18 = vadd.f32 %v3648_v16, %v3379_v12  ;;  %v7988_v44 = vpop.f32.mrf.mxu1  ;;  %v8060_v54 = vpop.f32.mrf.mxu0  ;;  %v10034_v45 = vadd.f32 %v8055_v14, %v3380_v59 }
 0x197   :  { %v3373_v32 = vsel %vm3321_vm3, %v3268_v21, %v3269_v37  ;;  %v3272_v42 = vrot.slane %v7988_v44, 7 }
 0x198   :  { %v3382_v36 = vadd.f32 %v3373_v32, %v9415_v0  ;;  %v3061_v55 = vpop.f32.mrf.mxu1  ;;  %v3664_v53 = vpop.f32.mrf.mxu0 }
 0x199   :  { %v3370_v28 = vsel %vm3321_vm3, %v3271_v41, %v3272_v42  ;;  %v3270_v7 = vrot.slane %v3061_v55, 7 }
 0x19a   :  { %v10041_v60 = vadd.f32 %v3661_v9, %v3382_v36  ;;  %v3385_v16 = vadd.f32 %v3370_v28, %v9451_v51  ;;  %v7991_v22 = vpop.f32.mrf.mxu1  ;;  %v8063_v14 = vpop.f32.mrf.mxu0  ;;  %8174 = vmatmul.mubr.bf16.gmra.mxu1 %v10047_v29  ;;  %8246 = vmatmul.mubr.bf16.gmra.mxu0 %v10047_v29  ;;  %v10058_v51 = vld [vmem:[%s11382_s0 + $0xd0] sm:$0xff]  }
 0x19b   :  { %v3371_v0 = vsel %vm3321_vm3, %v3270_v7, %v3271_v41  ;;  %v3372_v32 = vsel %vm3321_vm3, %v3269_v37, %v3270_v7  ;;  %8177 = vmatprep.mubr.bf16.mxu1 %v10058_v51  ;;  %8249 = vmatprep.mubr.bf16.mxu0 %v10058_v51  ;;  %v3275_v28 = vrot.slane %v7991_v22, 7  ;;  %v10081_v22 = vld [vmem:[%s11382_s0 + $0xd8] sm:$0xff]  }
 0x19c   :  { %11519 = vst [vmem:[#allocation41_spill] sm:$0xff] %v10041_v60  ;;  %v10062_v21 = vadd.f32 %v8060_v54, %v3385_v16  ;;  %v3384_v59 = vadd.f32 %v3371_v0, %v9449_v35  ;;  %v3383_v12 = vadd.f32 %v3372_v32, %v9433_v17  ;;  %v3074_v40 = vpop.f32.mrf.mxu1  ;;  %v3677_v41 = vpop.f32.mrf.mxu0 }
 0x19d   :  { %v3273_v9 = vrot.slane %v3074_v40, 7 }
 0x19e   :  { %v10066_v44 = vadd.f32 %v3664_v53, %v3383_v12  ;;  %v7992_v37 = vpop.f32.mrf.mxu1  ;;  %v8064_v36 = vpop.f32.mrf.mxu0  ;;  %v10068_v55 = vadd.f32 %v8059_v10, %v3384_v59 }
 0x19f   :  { %v3369_v7 = vsel %vm3321_vm3, %v3272_v42, %v3273_v9  ;;  %v3276_v60 = vrot.slane %v7992_v37, 7 }
 0x1a0   :  { %v3386_v54 = vadd.f32 %v3369_v7, %v9447_v57  ;;  %v3077_v16 = vpop.f32.mrf.mxu1  ;;  %v3680_v35 = vpop.f32.mrf.mxu0 }
 0x1a1   :  { %v3366_v17 = vsel %vm3321_vm3, %v3275_v28, %v3276_v60  ;;  %v3274_v0 = vrot.slane %v3077_v16, 7 }
 0x1a2   :  { %v10075_v32 = vadd.f32 %v3677_v41, %v3386_v54  ;;  %v3389_v53 = vadd.f32 %v3366_v17, %v9484_v11  ;;  %v7995_v12 = vpop.f32.mrf.mxu1  ;;  %v8067_v10 = vpop.f32.mrf.mxu0  ;;  %8178 = vmatmul.mubr.bf16.gmra.mxu1 %v10081_v22  ;;  %8250 = vmatmul.mubr.bf16.gmra.mxu0 %v10081_v22  ;;  %v8658_v11 = vld [vmem:[%s11382_s0] sm:$0xff]  }
 0x1a3   :  { %v3367_v57 = vsel %vm3321_vm3, %v3274_v0, %v3275_v28  ;;  %v3368_v42 = vsel %vm3321_vm3, %v3273_v9, %v3274_v0  ;;  %8269 = vmatprep.mubr.bf16.mxu1 %v8658_v11  ;;  %8341 = vmatprep.mubr.bf16.mxu0 %v8658_v11  ;;  %v3279_v0 = vrot.slane %v7995_v12, 7  ;;  %v8659_v12 = vld [vmem:[%s11382_s0 + $0x8] sm:$0xff]  }
 0x1a4   :  { %11520 = vst [vmem:[#allocation42_spill] sm:$0xff] %v10075_v32  ;;  %v10092_v59 = vadd.f32 %v8064_v36, %v3389_v53  ;;  %v3388_v40 = vadd.f32 %v3367_v57, %v9482_v58  ;;  %v3387_v41 = vadd.f32 %v3368_v42, %v9465_v8  ;;  %v3090_v37 = vpop.f32.mrf.mxu1  ;;  %v3693_v7 = vpop.f32.mrf.mxu0 }
 0x1a5   :  { %v3277_v54 = vrot.slane %v3090_v37, 7 }
 0x1a6   :  { %v10096_v16 = vadd.f32 %v3680_v35, %v3387_v41  ;;  %v7996_v28 = vpop.f32.mrf.mxu1  ;;  %v8068_v17 = vpop.f32.mrf.mxu0  ;;  %v10098_v9 = vadd.f32 %v8063_v14, %v3388_v40 }
 0x1a7   :  { %v3365_v32 = vsel %vm3321_vm3, %v3276_v60, %v3277_v54  ;;  %v3280_v11 = vrot.slane %v7996_v28, 7 }
 0x1a8   :  { %v3390_v36 = vadd.f32 %v3365_v32, %v9480_v5  ;;  %v3093_v53 = vpop.f32.mrf.mxu1  ;;  %v3696_v58 = vpop.f32.mrf.mxu0  ;;  %v8660_v32 = vld [vmem:[%s11382_s0 + $0x10] sm:$0xff]  }
 0x1a9   :  { %v3362_v8 = vsel %vm3321_vm3, %v3279_v0, %v3280_v11  ;;  %v3278_v57 = vrot.slane %v3093_v53, 7 }
 0x1aa   :  { %v10105_v42 = vadd.f32 %v3693_v7, %v3390_v36  ;;  %v3393_v35 = vadd.f32 %v3362_v8, %v9535_v30  ;;  %v7999_v41 = vpop.f32.mrf.mxu1  ;;  %v8071_v14 = vpop.f32.mrf.mxu0  ;;  %8270 = vmatmul.mubr.bf16.vlgmr.msra.gmra.mxu1 %v8659_v12  ;;  %8342 = vmatmul.mubr.bf16.vlgmr.msra.gmra.mxu0 %v8659_v12 }
 0x1ab   :  { %v3363_v5 = vsel %vm3321_vm3, %v3278_v57, %v3279_v0  ;;  %v3364_v60 = vsel %vm3321_vm3, %v3277_v54, %v3278_v57  ;;  %8273 = vmatprep.mubr.bf16.mxu1 %v8660_v32  ;;  %8345 = vmatprep.mubr.bf16.mxu0 %v8660_v32  ;;  %v3283_v57 = vrot.slane %v7999_v41, 7 }
 0x1ac   :  { %v10118_v30 = vadd.f32 %v8068_v17, %v3393_v35  ;;  %v3392_v40 = vadd.f32 %v3363_v5, %v9532_v62  ;;  %v3391_v37 = vadd.f32 %v3364_v60, %v9507_v4  ;;  %v3106_v7 = vpop.f32.mrf.mxu1  ;;  %v3709_v28 = vpop.f32.mrf.mxu0 }
 0x1ad   :  { %v3281_v36 = vrot.slane %v3106_v7, 7 }
 0x1ae   :  { %v10122_v53 = vadd.f32 %v3696_v58, %v3391_v37  ;;  %v8000_v0 = vpop.f32.mrf.mxu1  ;;  %v8072_v8 = vpop.f32.mrf.mxu0  ;;  %v10124_v54 = vadd.f32 %v8067_v10, %v3392_v40 }
 0x1af   :  { %v3361_v12 = vsel %vm3321_vm3, %v3280_v11, %v3281_v36  ;;  %v3284_v32 = vrot.slane %v8000_v0, 7 }
 0x1b0   :  { %v3394_v17 = vadd.f32 %v3361_v12, %v9530_v63  ;;  %v3109_v35 = vpop.f32.mrf.mxu1  ;;  %v3712_v62 = vpop.f32.mrf.mxu0 }
 0x1b1   :  { %v3358_v4 = vsel %vm3321_vm3, %v3283_v57, %v3284_v32  ;;  %v3282_v5 = vrot.slane %v3109_v35, 7 }
 0x1b2   :  { %v10131_v60 = vadd.f32 %v3709_v28, %v3394_v17  ;;  %v3397_v58 = vadd.f32 %v3358_v4, %v9592_v46  ;;  %v8003_v37 = vpop.f32.mrf.mxu1  ;;  %v8075_v10 = vpop.f32.mrf.mxu0  ;;  %8274 = vmatmul.mubr.bf16.gmra.mxu1 %v9558_v25  ;;  %8346 = vmatmul.mubr.bf16.gmra.mxu0 %v9558_v25 }
 0x1b3   :  { %v3359_v11 = vsel %vm3321_vm3, %v3282_v5, %v3283_v57  ;;  %v3360_v63 = vsel %vm3321_vm3, %v3281_v36, %v3282_v5  ;;  %8277 = vmatprep.mubr.bf16.mxu1 %v9573_v27  ;;  %8349 = vmatprep.mubr.bf16.mxu0 %v9573_v27  ;;  %v3287_v36 = vrot.slane %v8003_v37, 7 }
 0x1b4   :  { %v10142_v41 = vadd.f32 %v8072_v8, %v3397_v58  ;;  %v3396_v46 = vadd.f32 %v3359_v11, %v9589_v52  ;;  %v3395_v40 = vadd.f32 %v3360_v63, %v9562_v2  ;;  %v3122_v7 = vpop.f32.mrf.mxu1  ;;  %v3725_v28 = vpop.f32.mrf.mxu0 }
 0x1b5   :  { %v3285_v0 = vrot.slane %v3122_v7, 7 }
 0x1b6   :  { %v10146_v25 = vadd.f32 %v3712_v62, %v3395_v40  ;;  %v8004_v12 = vpop.f32.mrf.mxu1  ;;  %v8076_v57 = vpop.f32.mrf.mxu0  ;;  %v10148_v17 = vadd.f32 %v8071_v14, %v3396_v46 }
 0x1b7   :  { %v3357_v35 = vsel %vm3321_vm3, %v3284_v32, %v3285_v0  ;;  %v3288_v27 = vrot.slane %v8004_v12, 7 }
 0x1b8   :  { %v3398_v8 = vadd.f32 %v3357_v35, %v9587_v39  ;;  %v3125_v4 = vpop.f32.mrf.mxu1  ;;  %v3728_v52 = vpop.f32.mrf.mxu0 }
 0x1b9   :  { %v3354_v2 = vsel %vm3321_vm3, %v3287_v36, %v3288_v27  ;;  %v3286_v5 = vrot.slane %v3125_v4, 7 }
 0x1ba   :  { %v10155_v58 = vadd.f32 %v3725_v28, %v3398_v8  ;;  %v3401_v62 = vadd.f32 %v3354_v2, %v9649_v3  ;;  %v8007_v11 = vpop.f32.mrf.mxu1  ;;  %v8079_v14 = vpop.f32.mrf.mxu0  ;;  %8278 = vmatmul.mubr.bf16.gmra.mxu1 %v9615_v6  ;;  %8350 = vmatmul.mubr.bf16.gmra.mxu0 %v9615_v6 }
 0x1bb   :  { %v3355_v32 = vsel %vm3321_vm3, %v3286_v5, %v3287_v36  ;;  %v3356_v39 = vsel %vm3321_vm3, %v3285_v0, %v3286_v5  ;;  %8281 = vmatprep.mubr.bf16.mxu1 %v9630_v38  ;;  %8353 = vmatprep.mubr.bf16.mxu0 %v9630_v38  ;;  %v3291_v0 = vrot.slane %v8007_v11, 7  ;;  %v11522_v11 = vld [vmem:[#allocation30_spill] sm:$0xff] }
 0x1bc   :  { %v10166_v37 = vadd.f32 %v8076_v57, %v3401_v62  ;;  %v3400_v3 = vadd.f32 %v3355_v32, %v9646_v15  ;;  %v3399_v63 = vadd.f32 %v3356_v39, %v9619_v33  ;;  %v3138_v46 = vpop.f32.mrf.mxu1  ;;  %v3741_v40 = vpop.f32.mrf.mxu0  ;;  %v11521_v62 = vld [vmem:[#allocation28_spill] sm:$0xff]  ;;  %v11523_v39 = vld [vmem:[#allocation29_spill] sm:$0xff] }
 0x1bd   :  { %v3289_v7 = vrot.slane %v3138_v46, 7 }
 0x1be   :  { %v10170_v6 = vadd.f32 %v3728_v52, %v3399_v63  ;;  %v8008_v28 = vpop.f32.mrf.mxu1  ;;  %v8080_v12 = vpop.f32.mrf.mxu0  ;;  %v10172_v36 = vadd.f32 %v8075_v10, %v3400_v3 }
 0x1bf   :  { %v3353_v35 = vsel %vm3321_vm3, %v3288_v27, %v3289_v7  ;;  %v3292_v38 = vrot.slane %v8008_v28, 7 }
 0x1c0   :  { %v3402_v57 = vadd.f32 %v3353_v35, %v9644_v61  ;;  %v3141_v8 = vpop.f32.mrf.mxu1  ;;  %v3744_v15 = vpop.f32.mrf.mxu0 }
 0x1c1   :  { %v3350_v33 = vsel %vm3321_vm3, %v3291_v0, %v3292_v38  ;;  %v3290_v4 = vrot.slane %v3141_v8, 7 }
 0x1c2   :  { %v10179_v2 = vadd.f32 %v3741_v40, %v3402_v57  ;;  %v3405_v52 = vadd.f32 %v3350_v33, %v9697_v43  ;;  %v8011_v5 = vpop.f32.mrf.mxu1  ;;  %v8083_v10 = vpop.f32.mrf.mxu0  ;;  %8282 = vmatmul.mubr.bf16.gmra.mxu1 %v11521_v62  ;;  %8354 = vmatmul.mubr.bf16.gmra.mxu0 %v11521_v62 }
 0x1c3   :  { %v3351_v27 = vsel %vm3321_vm3, %v3290_v4, %v3291_v0  ;;  %v3352_v61 = vsel %vm3321_vm3, %v3289_v7, %v3290_v4  ;;  %8285 = vmatprep.mubr.bf16.mxu1 %v11522_v11  ;;  %8357 = vmatprep.mubr.bf16.mxu0 %v11522_v11  ;;  %v3295_v7 = vrot.slane %v8011_v5, 7 }
 0x1c4   :  { %v10190_v32 = vadd.f32 %v8080_v12, %v3405_v52  ;;  %v3404_v43 = vadd.f32 %v3351_v27, %v9695_v13  ;;  %v3403_v3 = vadd.f32 %v3352_v61, %v11523_v39  ;;  %v3154_v63 = vpop.f32.mrf.mxu1  ;;  %v3757_v46 = vpop.f32.mrf.mxu0 }
 0x1c5   :  { %v3293_v40 = vrot.slane %v3154_v63, 7 }
 0x1c6   :  { %v10194_v28 = vadd.f32 %v3744_v15, %v3403_v3  ;;  %v8012_v35 = vpop.f32.mrf.mxu1  ;;  %v8084_v0 = vpop.f32.mrf.mxu0  ;;  %v10196_v57 = vadd.f32 %v8079_v14, %v3404_v43 }
 0x1c7   :  { %v3349_v8 = vsel %vm3321_vm3, %v3292_v38, %v3293_v40  ;;  %v3296_v33 = vrot.slane %v8012_v35, 7 }
 0x1c8   :  { %v3406_v12 = vadd.f32 %v3349_v8, %v9693_v31  ;;  %v3157_v4 = vpop.f32.mrf.mxu1  ;;  %v3760_v13 = vpop.f32.mrf.mxu0 }
 0x1c9   :  { %v3346_v52 = vsel %vm3321_vm3, %v3295_v7, %v3296_v33  ;;  %v3294_v62 = vrot.slane %v3157_v4, 7 }
 0x1ca   :  { %v10203_v27 = vadd.f32 %v3757_v46, %v3406_v12  ;;  %v3409_v15 = vadd.f32 %v3346_v52, %v9739_v26  ;;  %v8015_v61 = vpop.f32.mrf.mxu1  ;;  %v8087_v14 = vpop.f32.mrf.mxu0  ;;  %8286 = vmatmul.mubr.bf16.gmra.mxu1 %v9712_v19  ;;  %8358 = vmatmul.mubr.bf16.gmra.mxu0 %v9712_v19 }
 0x1cb   :  { %v3347_v38 = vsel %vm3321_vm3, %v3294_v62, %v3295_v7  ;;  %v3348_v31 = vsel %vm3321_vm3, %v3293_v40, %v3294_v62  ;;  %8289 = vmatprep.mubr.bf16.mxu1 %v9727_v50  ;;  %8361 = vmatprep.mubr.bf16.mxu0 %v9727_v50  ;;  %v3299_v40 = vrot.slane %v8015_v61, 7  ;;  %v11526_v61 = vld [vmem:[#allocation33_spill] sm:$0xff] }
 0x1cc   :  { %v10214_v5 = vadd.f32 %v8084_v0, %v3409_v15  ;;  %v3408_v26 = vadd.f32 %v3347_v38, %v9737_v34  ;;  %v3407_v11 = vadd.f32 %v3348_v31, %v9716_v49  ;;  %v3170_v43 = vpop.f32.mrf.mxu1  ;;  %v3773_v39 = vpop.f32.mrf.mxu0  ;;  %v11525_v15 = vld [vmem:[#allocation31_spill] sm:$0xff]  ;;  %v11528_v31 = vld [vmem:[#allocation34_spill] sm:$0xff] }
 0x1cd   :  { %v3297_v3 = vrot.slane %v3170_v43, 7 }
 0x1ce   :  { %v10218_v19 = vadd.f32 %v3760_v13, %v3407_v11  ;;  %v8016_v63 = vpop.f32.mrf.mxu1  ;;  %v8088_v46 = vpop.f32.mrf.mxu0  ;;  %v10220_v35 = vadd.f32 %v8083_v10, %v3408_v26  ;;  %v11524_v13 = vld [vmem:[#allocation35_spill] sm:$0xff]  ;;  %v11529_v11 = vld [vmem:[#allocation32_spill] sm:$0xff] }
 0x1cf   :  { %v3345_v7 = vsel %vm3321_vm3, %v3296_v33, %v3297_v3  ;;  %v3300_v50 = vrot.slane %v8016_v63, 7 }
 0x1d0   :  { %v3410_v0 = vadd.f32 %v3345_v7, %v9735_v48  ;;  %v3173_v8 = vpop.f32.mrf.mxu1  ;;  %v3776_v34 = vpop.f32.mrf.mxu0 }
 0x1d1   :  { %v3342_v49 = vsel %vm3321_vm3, %v3299_v40, %v3300_v50  ;;  %v3298_v12 = vrot.slane %v3173_v8, 7 }
 0x1d2   :  { %v10227_v4 = vadd.f32 %v3773_v39, %v3410_v0  ;;  %v3413_v52 = vadd.f32 %v3342_v49, %v11524_v13  ;;  %v8019_v62 = vpop.f32.mrf.mxu1  ;;  %v8091_v10 = vpop.f32.mrf.mxu0  ;;  %8290 = vmatmul.mubr.bf16.gmra.mxu1 %v11525_v15  ;;  %8362 = vmatmul.mubr.bf16.gmra.mxu0 %v11525_v15 }
 0x1d3   :  { %v3343_v33 = vsel %vm3321_vm3, %v3298_v12, %v3299_v40  ;;  %v3344_v48 = vsel %vm3321_vm3, %v3297_v3, %v3298_v12  ;;  %8293 = vmatprep.mubr.bf16.mxu1 %v11526_v61  ;;  %8365 = vmatprep.mubr.bf16.mxu0 %v11526_v61  ;;  %v3303_v3 = vrot.slane %v8019_v62, 7 }
 0x1d4   :  { %v10238_v38 = vadd.f32 %v8088_v46, %v3413_v52  ;;  %v3412_v26 = vadd.f32 %v3343_v33, %v11528_v31  ;;  %v3411_v43 = vadd.f32 %v3344_v48, %v11529_v11  ;;  %v3186_v39 = vpop.f32.mrf.mxu1  ;;  %v3789_v63 = vpop.f32.mrf.mxu0  ;;  %v11530_v46 = vld [vmem:[#allocation3_spill] sm:$0xff] }
 0x1d5   :  { %v3301_v7 = vrot.slane %v3186_v39, 7  ;;  %v8661_v39 = vld [vmem:[%s11382_s0 + $0x70] sm:$0xff]  }
 0x1d6   :  { %11527 = vst [vmem:[#allocation28_spill] sm:$0xff] %v10238_v38  ;;  %v10242_v0 = vadd.f32 %v3776_v34, %v3411_v43  ;;  %v8020_v8 = vpop.f32.mrf.mxu1  ;;  %v8092_v40 = vpop.f32.mrf.mxu0  ;;  %v10244_v49 = vadd.f32 %v8087_v14, %v3412_v26  ;;  %v11532_v34 = vld [vmem:[#allocation6_spill] sm:$0xff]  ;;  %v11533_v26 = vld [vmem:[#allocation4_spill] sm:$0xff] }
 0x1d7   :  { %v3341_v12 = vsel %vm3321_vm3, %v3300_v50, %v3301_v7  ;;  %v3304_v13 = vrot.slane %v8020_v8, 7  ;;  %v11535_v8 = vld [vmem:[#allocation7_spill] sm:$0xff] }
 0x1d8   :  { %v3414_v52 = vadd.f32 %v3341_v12, %v11530_v46  ;;  %v3189_v15 = vpop.f32.mrf.mxu1  ;;  %v3792_v33 = vpop.f32.mrf.mxu0  ;;  %v11536_v46 = vld [vmem:[#allocation5_spill] sm:$0xff] }
 0x1d9   :  { %v3338_v48 = vsel %vm3321_vm3, %v3303_v3, %v3304_v13  ;;  %v3302_v61 = vrot.slane %v3189_v15, 7 }
 0x1da   :  { %v10251_v31 = vadd.f32 %v3789_v63, %v3414_v52  ;;  %v3417_v11 = vadd.f32 %v3338_v48, %v11532_v34  ;;  %v8023_v43 = vpop.f32.mrf.mxu1  ;;  %v8095_v14 = vpop.f32.mrf.mxu0  ;;  %8294 = vmatmul.mubr.bf16.gmra.mxu1 %v11533_v26  ;;  %8366 = vmatmul.mubr.bf16.gmra.mxu0 %v11533_v26 }
 0x1db   :  { %v3339_v50 = vsel %vm3321_vm3, %v3302_v61, %v3303_v3  ;;  %v3340_v62 = vsel %vm3321_vm3, %v3301_v7, %v3302_v61  ;;  %8297 = vmatprep.mubr.bf16.mxu1 %v8661_v39  ;;  %8369 = vmatprep.mubr.bf16.mxu0 %v8661_v39  ;;  %v3307_v61 = vrot.slane %v8023_v43, 7  ;;  %v11543_v43 = vld [vmem:[#allocation36_spill] sm:$0xff] }
 0x1dc   :  { %11531 = vst [vmem:[#allocation30_spill] sm:$0xff] %v10251_v31  ;;  %v10263_v63 = vadd.f32 %v8092_v40, %v3417_v11  ;;  %v3416_v12 = vadd.f32 %v3339_v50, %v11535_v8  ;;  %v3415_v52 = vadd.f32 %v3340_v62, %v11536_v46  ;;  %v3202_v15 = vpop.f32.mrf.mxu1  ;;  %v3805_v48 = vpop.f32.mrf.mxu0  ;;  %v11539_v40 = vld [vmem:[#allocation8_spill] sm:$0xff] }
 0x1dd   :  { %v3305_v34 = vrot.slane %v3202_v15, 7 }
 0x1de   :  { %11534 = vst [vmem:[#allocation29_spill] sm:$0xff] %v10263_v63  ;;  %v10267_v26 = vadd.f32 %v3792_v33, %v3415_v52  ;;  %v8024_v3 = vpop.f32.mrf.mxu1  ;;  %v8096_v31 = vpop.f32.mrf.mxu0  ;;  %v10269_v7 = vadd.f32 %v8091_v10, %v3416_v12  ;;  %v11541_v33 = vld [vmem:[#allocation37_spill] sm:$0xff] }
 0x1df   :  { %v3337_v38 = vsel %vm3321_vm3, %v3304_v13, %v3305_v34  ;;  %v3308_v39 = vrot.slane %v8024_v3, 7  ;;  %v11542_v12 = vld [vmem:[#allocation9_spill] sm:$0xff] }
 0x1e0   :  { %11537 = vst [vmem:[#allocation35_spill] sm:$0xff] %v10267_v26  ;;  %11538 = vst [vmem:[#allocation31_spill] sm:$0xff] %v10269_v7  ;;  %v3418_v11 = vadd.f32 %v3337_v38, %v11539_v40  ;;  %v3205_v63 = vpop.f32.mrf.mxu1  ;;  %v3808_v50 = vpop.f32.mrf.mxu0  ;;  %v11546_v40 = vld [vmem:[#allocation10_spill] sm:$0xff] }
 0x1e1   :  { %v3334_v62 = vsel %vm3321_vm3, %v3307_v61, %v3308_v39  ;;  %v3306_v8 = vrot.slane %v3205_v63, 7 }
 0x1e2   :  { %v10276_v46 = vadd.f32 %v3805_v48, %v3418_v11  ;;  %v3421_v52 = vadd.f32 %v3334_v62, %v11541_v33  ;;  %v8027_v15 = vpop.f32.mrf.mxu1  ;;  %v8099_v10 = vpop.f32.mrf.mxu0  ;;  %8298 = vmatmul.mubr.bf16.gmra.mxu1 %v11542_v12  ;;  %8370 = vmatmul.mubr.bf16.gmra.mxu0 %v11542_v12  ;;  %v11545_v48 = vld [vmem:[#allocation11_spill] sm:$0xff] }
 0x1e3   :  { %v3335_v13 = vsel %vm3321_vm3, %v3306_v8, %v3307_v61  ;;  %v3336_v38 = vsel %vm3321_vm3, %v3305_v34, %v3306_v8  ;;  %8301 = vmatprep.mubr.bf16.mxu1 %v11543_v43  ;;  %8373 = vmatprep.mubr.bf16.mxu0 %v11543_v43  ;;  %v3311_v34 = vrot.slane %v8027_v15, 7  ;;  %v11553_v15 = vld [vmem:[#allocation38_spill] sm:$0xff] }
 0x1e4   :  { %11540 = vst [vmem:[#allocation33_spill] sm:$0xff] %v10276_v46  ;;  %v10287_v63 = vadd.f32 %v8096_v31, %v3421_v52  ;;  %v3420_v3 = vadd.f32 %v3335_v13, %v11545_v48  ;;  %v3419_v11 = vadd.f32 %v3336_v38, %v11546_v40  ;;  %v3218_v62 = vpop.f32.mrf.mxu1  ;;  %v3821_v33 = vpop.f32.mrf.mxu0  ;;  %v11549_v31 = vld [vmem:[#allocation12_spill] sm:$0xff] }
 0x1e5   :  { %v3309_v46 = vrot.slane %v3218_v62, 7 }
 0x1e6   :  { %11544 = vst [vmem:[#allocation34_spill] sm:$0xff] %v10287_v63  ;;  %v10291_v12 = vadd.f32 %v3808_v50, %v3419_v11  ;;  %v8028_v26 = vpop.f32.mrf.mxu1  ;;  %v8100_v61 = vpop.f32.mrf.mxu0  ;;  %v10293_v7 = vadd.f32 %v8095_v14, %v3420_v3  ;;  %v11551_v50 = vld [vmem:[#allocation39_spill] sm:$0xff]  ;;  %v11552_v3 = vld [vmem:[#allocation13_spill] sm:$0xff] }
 0x1e7   :  { %v3333_v8 = vsel %vm3321_vm3, %v3308_v39, %v3309_v46  ;;  %v3312_v43 = vrot.slane %v8028_v26, 7 }
 0x1e8   :  { %11547 = vst [vmem:[#allocation32_spill] sm:$0xff] %v10291_v12  ;;  %11548 = vst [vmem:[#allocation3_spill] sm:$0xff] %v10293_v7  ;;  %v3422_v52 = vadd.f32 %v3333_v8, %v11549_v31  ;;  %v3221_v63 = vpop.f32.mrf.mxu1  ;;  %v3824_v13 = vpop.f32.mrf.mxu0  ;;  %v11556_v31 = vld [vmem:[#allocation14_spill] sm:$0xff] }
 0x1e9   :  { %v3330_v38 = vsel %vm3321_vm3, %v3311_v34, %v3312_v43  ;;  %v3310_v48 = vrot.slane %v3221_v63, 7 }
 0x1ea   :  { %v10300_v40 = vadd.f32 %v3821_v33, %v3422_v52  ;;  %v3425_v11 = vadd.f32 %v3330_v38, %v11551_v50  ;;  %v8031_v62 = vpop.f32.mrf.mxu1  ;;  %v8103_v14 = vpop.f32.mrf.mxu0  ;;  %8302 = vmatmul.mubr.bf16.gmra.mxu1 %v11552_v3  ;;  %8374 = vmatmul.mubr.bf16.gmra.mxu0 %v11552_v3  ;;  %v11555_v33 = vld [vmem:[#allocation15_spill] sm:$0xff] }
 0x1eb   :  { %v3331_v26 = vsel %vm3321_vm3, %v3310_v48, %v3311_v34  ;;  %v3332_v39 = vsel %vm3321_vm3, %v3309_v46, %v3310_v48  ;;  %8305 = vmatprep.mubr.bf16.mxu1 %v11553_v15  ;;  %8377 = vmatprep.mubr.bf16.mxu0 %v11553_v15  ;;  %v3315_v46 = vrot.slane %v8031_v62, 7  ;;  %v11561_v62 = vld [vmem:[#allocation40_spill] sm:$0xff] }
 0x1ec   :  { %11550 = vst [vmem:[#allocation6_spill] sm:$0xff] %v10300_v40  ;;  %v10311_v63 = vadd.f32 %v8100_v61, %v3425_v11  ;;  %v3424_v8 = vadd.f32 %v3331_v26, %v11555_v33  ;;  %v3423_v52 = vadd.f32 %v3332_v39, %v11556_v31  ;;  %v3234_v38 = vpop.f32.mrf.mxu1  ;;  %v3837_v50 = vpop.f32.mrf.mxu0  ;;  %v11558_v61 = vld [vmem:[#allocation16_spill] sm:$0xff] }
 0x1ed   :  { %v3313_v40 = vrot.slane %v3234_v38, 7  ;;  %v11563_v38 = vld [vmem:[#allocation19_spill] sm:$0xff] }
 0x1ee   :  { %11554 = vst [vmem:[#allocation4_spill] sm:$0xff] %v10311_v63  ;;  %v10315_v3 = vadd.f32 %v3824_v13, %v3423_v52  ;;  %v8032_v12 = vpop.f32.mrf.mxu1  ;;  %v8104_v34 = vpop.f32.mrf.mxu0  ;;  %v10317_v7 = vadd.f32 %v8099_v10, %v3424_v8  ;;  %v11560_v8 = vld [vmem:[#allocation17_spill] sm:$0xff] }
 0x1ef   :  { %v3329_v48 = vsel %vm3321_vm3, %v3312_v43, %v3313_v40  ;;  %v3316_v15 = vrot.slane %v8032_v12, 7 }
 0x1f0   :  { %11557 = vst [vmem:[#allocation7_spill] sm:$0xff] %v10315_v3  ;;  %v3426_v11 = vadd.f32 %v3329_v48, %v11558_v61  ;;  %v3237_v63 = vpop.f32.mrf.mxu1  ;;  %v3840_v26 = vpop.f32.mrf.mxu0 }
 0x1f1   :  { %v3326_v39 = vsel %vm3321_vm3, %v3315_v46, %v3316_v15  ;;  %v3314_v33 = vrot.slane %v3237_v63, 7 }
 0x1f2   :  { %v10324_v31 = vadd.f32 %v3837_v50, %v3426_v11  ;;  %v3429_v13 = vadd.f32 %v3326_v39, %v9947_v20  ;;  %v8035_v52 = vpop.f32.mrf.mxu1  ;;  %v8107_v10 = vpop.f32.mrf.mxu0  ;;  %8306 = vmatmul.mubr.bf16.gmra.mxu1 %v11560_v8  ;;  %8378 = vmatmul.mubr.bf16.gmra.mxu0 %v11560_v8  ;;  %v11564_v50 = vld [vmem:[#allocation18_spill] sm:$0xff] }
 0x1f3   :  { %v3327_v12 = vsel %vm3321_vm3, %v3314_v33, %v3315_v46  ;;  %v3328_v43 = vsel %vm3321_vm3, %v3313_v40, %v3314_v33  ;;  %8309 = vmatprep.mubr.bf16.mxu1 %v11561_v62  ;;  %8381 = vmatprep.mubr.bf16.mxu0 %v11561_v62  ;;  %v3319_v40 = vrot.slane %v8035_v52, 7 }
 0x1f4   :  { %11559 = vst [vmem:[#allocation5_spill] sm:$0xff] %v10324_v31  ;;  %v10335_v63 = vadd.f32 %v8104_v34, %v3429_v13  ;;  %v3428_v20 = vadd.f32 %v3327_v12, %v11563_v38  ;;  %v3427_v48 = vadd.f32 %v3328_v43, %v11564_v50  ;;  %v3250_v61 = vpop.f32.mrf.mxu1  ;;  %v3853_v11 = vpop.f32.mrf.mxu0  ;;  %v11565_v34 = vld [vmem:[#allocation20_spill] sm:$0xff]  ;;  %v11566_v43 = vrot.slane %v9992_v24, 7 }
 0x1f5   :  { %v3317_v39 = vrot.slane %v3250_v61, 7 }
 0x1f6   :  { %11562 = vst [vmem:[#allocation8_spill] sm:$0xff] %v10335_v63  ;;  %v10339_v8 = vadd.f32 %v3840_v26, %v3427_v48  ;;  %v8036_v31 = vpop.f32.mrf.mxu1  ;;  %v8108_v46 = vpop.f32.mrf.mxu0  ;;  %v10341_v3 = vadd.f32 %v8103_v14, %v3428_v20  ;;  %v11568_v48 = vld [vmem:[#allocation21_spill] sm:$0xff] }
 0x1f7   :  { %v3325_v33 = vsel %vm3321_vm3, %v3316_v15, %v3317_v39  ;;  %v3320_v62 = vrot.slane %v8036_v31, 7 }
 0x1f8   :  { %v3430_v13 = vadd.f32 %v3325_v33, %v11565_v34  ;;  %v3253_v63 = vpop.f32.mrf.mxu1  ;;  %v3856_v12 = vpop.f32.mrf.mxu0  ;;  %v11569_v33 = vld [vmem:[#allocation26_spill] sm:$0xff] }
 0x1f9   :  { %v3377_v38 = vsel %vm3321_vm3, %v3320_v62, %v11566_v43  ;;  %v3322_v26 = vsel %vm3321_vm3, %v3319_v40, %v3320_v62  ;;  %v3318_v50 = vrot.slane %v3253_v63, 7 }
 0x1fa   :  { %v10352_v14 = vadd.f32 %v3853_v11, %v3430_v13  ;;  %v3378_v52 = vadd.f32 %v3377_v38, %v9984_v1  ;;  %v3433_v15 = vadd.f32 %v3322_v26, %v10003_v56  ;;  %v8127_v31 = vpop.f32.mrf.mxu1  ;;  %v8199_v20 = vpop.f32.mrf.mxu0  ;;  %8310 = vmatmul.mubr.bf16.gmra.mxu1 %v11568_v48  ;;  %8382 = vmatmul.mubr.bf16.gmra.mxu0 %v11568_v48  ;;  %v11571_v1 = vld [vmem:[#allocation23_spill] sm:$0xff] }
 0x1fb   :  { %v3323_v24 = vsel %vm3321_vm3, %v3318_v50, %v3319_v40  ;;  %v3324_v61 = vsel %vm3321_vm3, %v3317_v39, %v3318_v50  ;;  %8313 = vmatprep.mubr.bf16.mxu1 %v11569_v33  ;;  %8385 = vmatprep.mubr.bf16.mxu0 %v11569_v33  ;;  %v11572_v11 = vld [vmem:[#allocation27_spill] sm:$0xff]  ;;  %v4360_v26 = vrot.slane %v8127_v31, 1  ;;  %v4963_v50 = vrot.slane %v8199_v20, 5  ;;  %v11576_v31 = vld [vmem:[#allocation22_spill] sm:$0xff] }
 0x1fc   :  { %11567 = vst [vmem:[#allocation37_spill] sm:$0xff] %v10352_v14  ;;  %v10364_v63 = vadd.f32 %v8108_v46, %v3433_v15  ;;  %v3432_v56 = vadd.f32 %v3323_v24, %v11571_v1  ;;  %v3431_v62 = vadd.f32 %v3324_v61, %v11572_v11  ;;  %v10368_v34 = vpop.f32.mrf.mxu1  ;;  %v10370_v13 = vpop.f32.mrf.mxu0  ;;  %v3868_v20 = vadd.f32 %v11576_v31, %v3378_v52 }
 0x1fd   :  { %11573 = vst [vmem:[#allocation36_spill] sm:$0xff] %v10370_v13  ;;  %v11422_v48 = vrot.slane %v10368_v34, 1 }
 0x1fe   :  { %11570 = vst [vmem:[#allocation9_spill] sm:$0xff] %v10364_v63  ;;  %v10372_v43 = vadd.f32 %v3856_v12, %v3431_v62  ;;  %v8128_v40 = vpop.f32.mrf.mxu1  ;;  %v8200_v38 = vpop.f32.mrf.mxu0  ;;  %v10375_v39 = vadd.f32 %v8107_v10, %v3432_v56 }
 0x1ff   :  { %v4361_v46 = vrot.slane %v8128_v40, 1  ;;  %v4964_v15 = vrot.slane %v8200_v38, 5  ;;  %v11577_v38 = vld [vmem:[#allocation25_spill] sm:$0xff] }
 0x200   :  { %11574 = vst [vmem:[#allocation11_spill] sm:$0xff] %v10372_v43  ;;  %11575 = vst [vmem:[#allocation10_spill] sm:$0xff] %v10375_v39  ;;  %v4138_v61 = vpop.f32.mrf.mxu1  ;;  %v4741_v33 = vpop.f32.mrf.mxu0 }
 0x201   :  { %v4467_v12 = vsel %vm622_vm0, %v4360_v26, %v4361_v46  ;;  %v5070_v1 = vsel %vm5017_vm4, %v4963_v50, %v4964_v15  ;;  %v4359_v11 = vrot.slane %v4138_v61, 1  ;;  %v4962_v62 = vrot.slane %v4741_v33, 5 }
 0x202   :  { %v4473_v10 = vadd.f32 %v4467_v12, %v10034_v45  ;;  %v8131_v56 = vpop.f32.mrf.mxu1  ;;  %v8203_v40 = vpop.f32.mrf.mxu0  ;;  %8314 = vmatmul.mubr.bf16.gmra.mxu1 %v11577_v38  ;;  %8386 = vmatmul.mubr.bf16.gmra.mxu0 %v11577_v38  ;;  %v11578_v45 = vrot.slane %v10370_v13, 5 }
 0x203   :  { %v4468_v24 = vsel %vm622_vm0, %v4359_v11, %v4360_v26  ;;  %v4469_v43 = vsel %vm622_vm0, %v11422_v48, %v4359_v11  ;;  %v5071_v61 = vsel %vm5017_vm4, %v4962_v62, %v4963_v50  ;;  %8317 = vmatprep.mubr.bf16.mxu1 %v10025_v47  ;;  %8389 = vmatprep.mubr.bf16.mxu0 %v10025_v47  ;;  %v4364_v50 = vrot.slane %v8131_v56, 1 }
 0x204   :  { %v10399_v52 = vsel %vm5017_vm4, %v11578_v45, %v4962_v62  ;;  %v4471_v33 = vadd.f32 %v4469_v43, %v3868_v20  ;;  %v4472_v12 = vadd.f32 %v4468_v24, %v10032_v18  ;;  %v4151_v26 = vpop.f32.mrf.mxu1  ;;  %v4754_v31 = vpop.f32.mrf.mxu0  ;;  %v4967_v14 = vrot.slane %v8203_v40, 5  ;;  %v11579_v20 = vld [vmem:[#allocation24_spill] sm:$0xff] }
 0x205   :  { %v4362_v38 = vrot.slane %v4151_v26, 1  ;;  %v4965_v11 = vrot.slane %v4754_v31, 5 }
 0x206   :  { %v10404_v48 = vadd.f32 %v5071_v61, %v4471_v33  ;;  %v8132_v63 = vpop.f32.mrf.mxu1  ;;  %v8204_v39 = vpop.f32.mrf.mxu0  ;;  %v10406_v13 = vadd.f32 %v5070_v1, %v4472_v12 }
 0x207   :  { %v4466_v62 = vsel %vm622_vm0, %v4361_v46, %v4362_v38  ;;  %v5069_v18 = vsel %vm5017_vm4, %v4964_v15, %v4965_v11  ;;  %v4365_v43 = vrot.slane %v8132_v63, 1  ;;  %v4968_v24 = vrot.slane %v8204_v39, 5 }
 0x208   :  { %v4474_v47 = vadd.f32 %v4466_v62, %v11579_v20  ;;  %v10413_v45 = vadd.f32 %v5069_v18, %v4473_v10  ;;  %v4154_v61 = vpop.f32.mrf.mxu1  ;;  %v4757_v33 = vpop.f32.mrf.mxu0 }
 0x209   :  { %v4463_v56 = vsel %vm622_vm0, %v4364_v50, %v4365_v43  ;;  %v5066_v1 = vsel %vm5017_vm4, %v4967_v14, %v4968_v24  ;;  %v4363_v40 = vrot.slane %v4154_v61, 1  ;;  %v4966_v12 = vrot.slane %v4757_v33, 5 }
 0x20a   :  { %v4477_v46 = vadd.f32 %v4463_v56, %v10068_v55  ;;  %v8135_v26 = vpop.f32.mrf.mxu1  ;;  %v8207_v15 = vpop.f32.mrf.mxu0  ;;  %8318 = vmatmul.mubr.bf16.gmra.mxu1 %v10047_v29  ;;  %8390 = vmatmul.mubr.bf16.gmra.mxu0 %v10047_v29  ;;  %v11580_v55 = vld [vmem:[#allocation41_spill] sm:$0xff] }
 0x20b   :  { %v4464_v63 = vsel %vm622_vm0, %v4363_v40, %v4364_v50  ;;  %v4465_v39 = vsel %vm622_vm0, %v4362_v38, %v4363_v40  ;;  %v5067_v10 = vsel %vm5017_vm4, %v4966_v12, %v4967_v14  ;;  %v5068_v31 = vsel %vm5017_vm4, %v4965_v11, %v4966_v12  ;;  %8321 = vmatprep.mubr.bf16.mxu1 %v10058_v51 }
 0x20c   :  { %v4475_v62 = vadd.f32 %v4465_v39, %v11580_v55  ;;  %v4476_v18 = vadd.f32 %v4464_v63, %v10066_v44  ;;  %v10433_v20 = vadd.f32 %v5068_v31, %v4474_v47  ;;  %v4167_v29 = vpop.f32.mrf.mxu1  ;;  %v4770_v61 = vpop.f32.mrf.mxu0  ;;  %8393 = vmatprep.mubr.bf16.mxu0 %v10058_v51  ;;  %v4368_v14 = vrot.slane %v8135_v26, 1 }
 0x20d   :  { %v4366_v50 = vrot.slane %v4167_v29, 1  ;;  %v4969_v38 = vrot.slane %v4770_v61, 5  ;;  %v4971_v56 = vrot.slane %v8207_v15, 5 }
 0x20e   :  { %v10436_v33 = vadd.f32 %v5067_v10, %v4475_v62  ;;  %v8136_v40 = vpop.f32.mrf.mxu1  ;;  %v8208_v11 = vpop.f32.mrf.mxu0  ;;  %v10438_v12 = vadd.f32 %v5066_v1, %v4476_v18 }
 0x20f   :  { %v4462_v39 = vsel %vm622_vm0, %v4365_v43, %v4366_v50  ;;  %v5065_v44 = vsel %vm5017_vm4, %v4968_v24, %v4969_v38  ;;  %v4369_v47 = vrot.slane %v8136_v40, 1  ;;  %v4972_v63 = vrot.slane %v8208_v11, 5  ;;  %v11582_v40 = vld [vmem:[#allocation42_spill] sm:$0xff] }
 0x210   :  { %v4478_v51 = vadd.f32 %v4462_v39, %v10062_v21  ;;  %v10445_v31 = vadd.f32 %v5065_v44, %v4477_v46  ;;  %v4170_v10 = vpop.f32.mrf.mxu1  ;;  %v4773_v55 = vpop.f32.mrf.mxu0 }
 0x211   :  { %v4459_v26 = vsel %vm622_vm0, %v4368_v14, %v4369_v47  ;;  %v5062_v1 = vsel %vm5017_vm4, %v4971_v56, %v4972_v63  ;;  %v4367_v15 = vrot.slane %v4170_v10, 1  ;;  %v4970_v62 = vrot.slane %v4773_v55, 5 }
 0x212   :  { %11581 = vst [vmem:[#allocation12_spill] sm:$0xff] %v10445_v31  ;;  %v4481_v43 = vadd.f32 %v4459_v26, %v10098_v9  ;;  %v8139_v18 = vpop.f32.mrf.mxu1  ;;  %v8211_v24 = vpop.f32.mrf.mxu0  ;;  %8322 = vmatmul.mubr.bf16.gmra.mxu1 %v10081_v22  ;;  %8394 = vmatmul.mubr.bf16.gmra.mxu0 %v10081_v22 }
 0x213   :  { %v4460_v21 = vsel %vm622_vm0, %v4367_v15, %v4368_v14  ;;  %v4461_v46 = vsel %vm622_vm0, %v4366_v50, %v4367_v15  ;;  %v5063_v29 = vsel %vm5017_vm4, %v4970_v62, %v4971_v56  ;;  %v5064_v61 = vsel %vm5017_vm4, %v4969_v38, %v4970_v62 }
 0x214   :  { %v4479_v9 = vadd.f32 %v4461_v46, %v11582_v40  ;;  %v4480_v11 = vadd.f32 %v4460_v21, %v10096_v16  ;;  %v10464_v39 = vadd.f32 %v5064_v61, %v4478_v51  ;;  %v4183_v44 = vpop.f32.mrf.mxu1  ;;  %v4786_v22 = vpop.f32.mrf.mxu0  ;;  %v4372_v26 = vrot.slane %v8139_v18, 1 }
 0x215   :  { %v4370_v10 = vrot.slane %v4183_v44, 1  ;;  %v4973_v55 = vrot.slane %v4786_v22, 5  ;;  %v4975_v50 = vrot.slane %v8211_v24, 5 }
 0x216   :  { %v10466_v14 = vadd.f32 %v5063_v29, %v4479_v9  ;;  %v8140_v15 = vpop.f32.mrf.mxu1  ;;  %v8212_v31 = vpop.f32.mrf.mxu0  ;;  %v10468_v56 = vadd.f32 %v5062_v1, %v4480_v11 }
 0x217   :  { %v4458_v38 = vsel %vm622_vm0, %v4369_v47, %v4370_v10  ;;  %v5061_v16 = vsel %vm5017_vm4, %v4972_v63, %v4973_v55  ;;  %v4373_v51 = vrot.slane %v8140_v15, 1  ;;  %v4976_v62 = vrot.slane %v8212_v31, 5 }
 0x218   :  { %v4482_v21 = vadd.f32 %v4458_v38, %v10092_v59  ;;  %v10475_v46 = vadd.f32 %v5061_v16, %v4481_v43  ;;  %v4186_v29 = vpop.f32.mrf.mxu1  ;;  %v4789_v61 = vpop.f32.mrf.mxu0 }
 0x219   :  { %v4455_v18 = vsel %vm622_vm0, %v4372_v26, %v4373_v51  ;;  %v5058_v1 = vsel %vm5017_vm4, %v4975_v50, %v4976_v62  ;;  %v4371_v24 = vrot.slane %v4186_v29, 1  ;;  %v4974_v40 = vrot.slane %v4789_v61, 5 }
 0x21a   :  { %v4485_v47 = vadd.f32 %v4455_v18, %v10124_v54  ;;  %v8143_v9 = vpop.f32.mrf.mxu1  ;;  %v8215_v63 = vpop.f32.mrf.mxu0 }
 0x21b   :  { %v4456_v31 = vsel %vm622_vm0, %v4371_v24, %v4372_v26  ;;  %v4457_v59 = vsel %vm622_vm0, %v4370_v10, %v4371_v24  ;;  %v5059_v43 = vsel %vm5017_vm4, %v4974_v40, %v4975_v50  ;;  %v5060_v11 = vsel %vm5017_vm4, %v4973_v55, %v4974_v40 }
 0x21c   :  { %v4483_v44 = vadd.f32 %v4457_v59, %v10105_v42  ;;  %v4484_v22 = vadd.f32 %v4456_v31, %v10122_v53  ;;  %v10492_v15 = vadd.f32 %v5060_v11, %v4482_v21  ;;  %v4199_v54 = vpop.f32.mrf.mxu1  ;;  %v4802_v38 = vpop.f32.mrf.mxu0  ;;  %v4376_v61 = vrot.slane %v8143_v9, 1 }
 0x21d   :  { %v4374_v16 = vrot.slane %v4199_v54, 1  ;;  %v4977_v29 = vrot.slane %v4802_v38, 5  ;;  %v4979_v10 = vrot.slane %v8215_v63, 5 }
 0x21e   :  { %v10494_v26 = vadd.f32 %v5059_v43, %v4483_v44  ;;  %v8144_v18 = vpop.f32.mrf.mxu1  ;;  %v8216_v24 = vpop.f32.mrf.mxu0  ;;  %v10496_v50 = vadd.f32 %v5058_v1, %v4484_v22 }
 0x21f   :  { %v4454_v55 = vsel %vm622_vm0, %v4373_v51, %v4374_v16  ;;  %v5057_v42 = vsel %vm5017_vm4, %v4976_v62, %v4977_v29  ;;  %v4377_v53 = vrot.slane %v8144_v18, 1  ;;  %v4980_v21 = vrot.slane %v8216_v24, 5 }
 0x220   :  { %v4486_v40 = vadd.f32 %v4454_v55, %v10118_v30  ;;  %v10503_v31 = vadd.f32 %v5057_v42, %v4485_v47  ;;  %v4202_v59 = vpop.f32.mrf.mxu1  ;;  %v4805_v43 = vpop.f32.mrf.mxu0 }
 0x221   :  { %v4451_v9 = vsel %vm622_vm0, %v4376_v61, %v4377_v53  ;;  %v5054_v1 = vsel %vm5017_vm4, %v4979_v10, %v4980_v21  ;;  %v4375_v63 = vrot.slane %v4202_v59, 1  ;;  %v4978_v11 = vrot.slane %v4805_v43, 5 }
 0x222   :  { %v4489_v51 = vadd.f32 %v4451_v9, %v10148_v17  ;;  %v8147_v44 = vpop.f32.mrf.mxu1  ;;  %v8219_v62 = vpop.f32.mrf.mxu0 }
 0x223   :  { %v4452_v22 = vsel %vm622_vm0, %v4375_v63, %v4376_v61  ;;  %v4453_v30 = vsel %vm622_vm0, %v4374_v16, %v4375_v63  ;;  %v5055_v47 = vsel %vm5017_vm4, %v4978_v11, %v4979_v10  ;;  %v5056_v54 = vsel %vm5017_vm4, %v4977_v29, %v4978_v11 }
 0x224   :  { %v4487_v38 = vadd.f32 %v4453_v30, %v10131_v60  ;;  %v4488_v18 = vadd.f32 %v4452_v22, %v10146_v25  ;;  %v10520_v24 = vadd.f32 %v5056_v54, %v4486_v40  ;;  %v4215_v17 = vpop.f32.mrf.mxu1  ;;  %v4818_v55 = vpop.f32.mrf.mxu0  ;;  %v4380_v43 = vrot.slane %v8147_v44, 1 }
 0x225   :  { %v4378_v42 = vrot.slane %v4215_v17, 1  ;;  %v4981_v59 = vrot.slane %v4818_v55, 5  ;;  %v4983_v16 = vrot.slane %v8219_v62, 5 }
 0x226   :  { %v10522_v61 = vadd.f32 %v5055_v47, %v4487_v38  ;;  %v8148_v9 = vpop.f32.mrf.mxu1  ;;  %v8220_v63 = vpop.f32.mrf.mxu0  ;;  %v10524_v10 = vadd.f32 %v5054_v1, %v4488_v18 }
 0x227   :  { %v4450_v29 = vsel %vm622_vm0, %v4377_v53, %v4378_v42  ;;  %v5053_v60 = vsel %vm5017_vm4, %v4980_v21, %v4981_v59  ;;  %v4381_v25 = vrot.slane %v8148_v9, 1  ;;  %v4984_v40 = vrot.slane %v8220_v63, 5 }
 0x228   :  { %v4490_v11 = vadd.f32 %v4450_v29, %v10142_v41  ;;  %v10531_v22 = vadd.f32 %v5053_v60, %v4489_v51  ;;  %v4218_v30 = vpop.f32.mrf.mxu1  ;;  %v4821_v47 = vpop.f32.mrf.mxu0 }
 0x229   :  { %v4447_v44 = vsel %vm622_vm0, %v4380_v43, %v4381_v25  ;;  %v5050_v1 = vsel %vm5017_vm4, %v4983_v16, %v4984_v40  ;;  %v4379_v62 = vrot.slane %v4218_v30, 1  ;;  %v4982_v54 = vrot.slane %v4821_v47, 5 }
 0x22a   :  { %v4493_v53 = vadd.f32 %v4447_v44, %v10172_v36  ;;  %v8151_v38 = vpop.f32.mrf.mxu1  ;;  %v8223_v21 = vpop.f32.mrf.mxu0 }
 0x22b   :  { %v4448_v18 = vsel %vm622_vm0, %v4379_v62, %v4380_v43  ;;  %v4449_v41 = vsel %vm622_vm0, %v4378_v42, %v4379_v62  ;;  %v5051_v51 = vsel %vm5017_vm4, %v4982_v54, %v4983_v16  ;;  %v5052_v17 = vsel %vm5017_vm4, %v4981_v59, %v4982_v54 }
 0x22c   :  { %v4491_v55 = vadd.f32 %v4449_v41, %v10155_v58  ;;  %v4492_v9 = vadd.f32 %v4448_v18, %v10170_v6  ;;  %v10548_v63 = vadd.f32 %v5052_v17, %v4490_v11  ;;  %v4231_v36 = vpop.f32.mrf.mxu1  ;;  %v4834_v29 = vpop.f32.mrf.mxu0  ;;  %v4384_v47 = vrot.slane %v8151_v38, 1 }
 0x22d   :  { %v4382_v60 = vrot.slane %v4231_v36, 1  ;;  %v4985_v30 = vrot.slane %v4834_v29, 5  ;;  %v4987_v42 = vrot.slane %v8223_v21, 5 }
 0x22e   :  { %v10550_v43 = vadd.f32 %v5051_v51, %v4491_v55  ;;  %v8152_v44 = vpop.f32.mrf.mxu1  ;;  %v8224_v62 = vpop.f32.mrf.mxu0  ;;  %v10552_v16 = vadd.f32 %v5050_v1, %v4492_v9 }
 0x22f   :  { %v4446_v59 = vsel %vm622_vm0, %v4381_v25, %v4382_v60  ;;  %v5049_v58 = vsel %vm5017_vm4, %v4984_v40, %v4985_v30  ;;  %v4385_v6 = vrot.slane %v8152_v44, 1  ;;  %v4988_v11 = vrot.slane %v8224_v62, 5 }
 0x230   :  { %v4494_v54 = vadd.f32 %v4446_v59, %v10166_v37  ;;  %v10559_v18 = vadd.f32 %v5049_v58, %v4493_v53  ;;  %v4234_v41 = vpop.f32.mrf.mxu1  ;;  %v4837_v51 = vpop.f32.mrf.mxu0 }
 0x231   :  { %v4443_v38 = vsel %vm622_vm0, %v4384_v47, %v4385_v6  ;;  %v5046_v1 = vsel %vm5017_vm4, %v4987_v42, %v4988_v11  ;;  %v4383_v21 = vrot.slane %v4234_v41, 1  ;;  %v4986_v17 = vrot.slane %v4837_v51, 5 }
 0x232   :  { %v4497_v25 = vadd.f32 %v4443_v38, %v10196_v57  ;;  %v8155_v55 = vpop.f32.mrf.mxu1  ;;  %v8227_v40 = vpop.f32.mrf.mxu0 }
 0x233   :  { %v4444_v9 = vsel %vm622_vm0, %v4383_v21, %v4384_v47  ;;  %v4445_v37 = vsel %vm622_vm0, %v4382_v60, %v4383_v21  ;;  %v5047_v53 = vsel %vm5017_vm4, %v4986_v17, %v4987_v42  ;;  %v5048_v36 = vsel %vm5017_vm4, %v4985_v30, %v4986_v17 }
 0x234   :  { %v4495_v29 = vadd.f32 %v4445_v37, %v10179_v2  ;;  %v4496_v44 = vadd.f32 %v4444_v9, %v10194_v28  ;;  %v10576_v62 = vadd.f32 %v5048_v36, %v4494_v54  ;;  %v4247_v57 = vpop.f32.mrf.mxu1  ;;  %v4850_v59 = vpop.f32.mrf.mxu0  ;;  %v4388_v51 = vrot.slane %v8155_v55, 1 }
 0x235   :  { %v4386_v58 = vrot.slane %v4247_v57, 1  ;;  %v4989_v41 = vrot.slane %v4850_v59, 5  ;;  %v4991_v60 = vrot.slane %v8227_v40, 5 }
 0x236   :  { %v10578_v47 = vadd.f32 %v5047_v53, %v4495_v29  ;;  %v8156_v38 = vpop.f32.mrf.mxu1  ;;  %v8228_v21 = vpop.f32.mrf.mxu0  ;;  %v10580_v42 = vadd.f32 %v5046_v1, %v4496_v44 }
 0x237   :  { %v4442_v30 = vsel %vm622_vm0, %v4385_v6, %v4386_v58  ;;  %v5045_v2 = vsel %vm5017_vm4, %v4988_v11, %v4989_v41  ;;  %v4389_v28 = vrot.slane %v8156_v38, 1  ;;  %v4992_v54 = vrot.slane %v8228_v21, 5 }
 0x238   :  { %v4498_v17 = vadd.f32 %v4442_v30, %v10190_v32  ;;  %v10587_v9 = vadd.f32 %v5045_v2, %v4497_v25  ;;  %v4250_v37 = vpop.f32.mrf.mxu1  ;;  %v4853_v53 = vpop.f32.mrf.mxu0 }
 0x239   :  { %v4439_v55 = vsel %vm622_vm0, %v4388_v51, %v4389_v28  ;;  %v5042_v1 = vsel %vm5017_vm4, %v4991_v60, %v4992_v54  ;;  %v4387_v40 = vrot.slane %v4250_v37, 1  ;;  %v4990_v36 = vrot.slane %v4853_v53, 5 }
 0x23a   :  { %v4501_v6 = vadd.f32 %v4439_v55, %v10220_v35  ;;  %v8159_v29 = vpop.f32.mrf.mxu1  ;;  %v8231_v11 = vpop.f32.mrf.mxu0 }
 0x23b   :  { %v4440_v44 = vsel %vm622_vm0, %v4387_v40, %v4388_v51  ;;  %v4441_v32 = vsel %vm622_vm0, %v4386_v58, %v4387_v40  ;;  %v5043_v25 = vsel %vm5017_vm4, %v4990_v36, %v4991_v60  ;;  %v5044_v57 = vsel %vm5017_vm4, %v4989_v41, %v4990_v36 }
 0x23c   :  { %v4499_v59 = vadd.f32 %v4441_v32, %v10203_v27  ;;  %v4500_v38 = vadd.f32 %v4440_v44, %v10218_v19  ;;  %v10604_v21 = vadd.f32 %v5044_v57, %v4498_v17  ;;  %v4263_v35 = vpop.f32.mrf.mxu1  ;;  %v4866_v30 = vpop.f32.mrf.mxu0  ;;  %v4392_v53 = vrot.slane %v8159_v29, 1 }
 0x23d   :  { %v4390_v2 = vrot.slane %v4263_v35, 1  ;;  %v4993_v37 = vrot.slane %v4866_v30, 5  ;;  %v4995_v58 = vrot.slane %v8231_v11, 5 }
 0x23e   :  { %v10606_v51 = vadd.f32 %v5043_v25, %v4499_v59  ;;  %v8160_v55 = vpop.f32.mrf.mxu1  ;;  %v8232_v40 = vpop.f32.mrf.mxu0  ;;  %v10608_v60 = vadd.f32 %v5042_v1, %v4500_v38 }
 0x23f   :  { %v4438_v41 = vsel %vm622_vm0, %v4389_v28, %v4390_v2  ;;  %v5041_v27 = vsel %vm5017_vm4, %v4992_v54, %v4993_v37  ;;  %v4393_v19 = vrot.slane %v8160_v55, 1  ;;  %v4996_v17 = vrot.slane %v8232_v40, 5 }
 0x240   :  { %v4502_v36 = vadd.f32 %v4438_v41, %v10214_v5  ;;  %v10615_v44 = vadd.f32 %v5041_v27, %v4501_v6  ;;  %v4266_v32 = vpop.f32.mrf.mxu1  ;;  %v4869_v25 = vpop.f32.mrf.mxu0 }
 0x241   :  { %v4435_v29 = vsel %vm622_vm0, %v4392_v53, %v4393_v19  ;;  %v5038_v1 = vsel %vm5017_vm4, %v4995_v58, %v4996_v17  ;;  %v4391_v11 = vrot.slane %v4266_v32, 1  ;;  %v4994_v57 = vrot.slane %v4869_v25, 5 }
 0x242   :  { %v4505_v28 = vadd.f32 %v4435_v29, %v10244_v49  ;;  %v8163_v59 = vpop.f32.mrf.mxu1  ;;  %v8235_v54 = vpop.f32.mrf.mxu0 }
 0x243   :  { %v4436_v38 = vsel %vm622_vm0, %v4391_v11, %v4392_v53  ;;  %v4437_v5 = vsel %vm622_vm0, %v4390_v2, %v4391_v11  ;;  %v5039_v6 = vsel %vm5017_vm4, %v4994_v57, %v4995_v58  ;;  %v5040_v35 = vsel %vm5017_vm4, %v4993_v37, %v4994_v57  ;;  %v11586_v57 = vld [vmem:[#allocation28_spill] sm:$0xff] }
 0x244   :  { %v4503_v30 = vadd.f32 %v4437_v5, %v10227_v4  ;;  %v4504_v55 = vadd.f32 %v4436_v38, %v10242_v0  ;;  %v10632_v40 = vadd.f32 %v5040_v35, %v4502_v36  ;;  %v4279_v49 = vpop.f32.mrf.mxu1  ;;  %v4882_v41 = vpop.f32.mrf.mxu0  ;;  %v4396_v25 = vrot.slane %v8163_v59, 1 }
 0x245   :  { %v4394_v27 = vrot.slane %v4279_v49, 1  ;;  %v4997_v32 = vrot.slane %v4882_v41, 5  ;;  %v4999_v2 = vrot.slane %v8235_v54, 5 }
 0x246   :  { %11583 = vst [vmem:[#allocation39_spill] sm:$0xff] %v10632_v40  ;;  %v10634_v53 = vadd.f32 %v5039_v6, %v4503_v30  ;;  %v8164_v29 = vpop.f32.mrf.mxu1  ;;  %v8236_v11 = vpop.f32.mrf.mxu0  ;;  %v10636_v58 = vadd.f32 %v5038_v1, %v4504_v55 }
 0x247   :  { %v4434_v37 = vsel %vm622_vm0, %v4393_v19, %v4394_v27  ;;  %v5037_v4 = vsel %vm5017_vm4, %v4996_v17, %v4997_v32  ;;  %v4397_v0 = vrot.slane %v8164_v29, 1  ;;  %v5000_v36 = vrot.slane %v8236_v11, 5  ;;  %v11588_v19 = vld [vmem:[#allocation31_spill] sm:$0xff] }
 0x248   :  { %11584 = vst [vmem:[#allocation13_spill] sm:$0xff] %v10634_v53  ;;  %11585 = vst [vmem:[#allocation38_spill] sm:$0xff] %v10636_v58  ;;  %v4506_v38 = vadd.f32 %v4434_v37, %v11586_v57  ;;  %v10643_v5 = vadd.f32 %v5037_v4, %v4505_v28  ;;  %v4282_v6 = vpop.f32.mrf.mxu1  ;;  %v4885_v35 = vpop.f32.mrf.mxu0  ;;  %v11589_v37 = vld [vmem:[#allocation30_spill] sm:$0xff]  ;;  %v11590_v57 = vld [vmem:[#allocation35_spill] sm:$0xff] }
 0x249   :  { %v4431_v59 = vsel %vm622_vm0, %v4396_v25, %v4397_v0  ;;  %v5034_v1 = vsel %vm5017_vm4, %v4999_v2, %v5000_v36  ;;  %v4395_v54 = vrot.slane %v4282_v6, 1  ;;  %v4998_v30 = vrot.slane %v4885_v35, 5 }
 0x24a   :  { %11587 = vst [vmem:[#allocation15_spill] sm:$0xff] %v10643_v5  ;;  %v4509_v55 = vadd.f32 %v4431_v59, %v11588_v19  ;;  %v8167_v49 = vpop.f32.mrf.mxu1  ;;  %v8239_v17 = vpop.f32.mrf.mxu0 }
 0x24b   :  { %v4432_v41 = vsel %vm622_vm0, %v4395_v54, %v4396_v25  ;;  %v4433_v28 = vsel %vm622_vm0, %v4394_v27, %v4395_v54  ;;  %v5035_v29 = vsel %vm5017_vm4, %v4998_v30, %v4999_v2  ;;  %v5036_v11 = vsel %vm5017_vm4, %v4997_v32, %v4998_v30 }
 0x24c   :  { %v4507_v4 = vadd.f32 %v4433_v28, %v11589_v37  ;;  %v4508_v6 = vadd.f32 %v4432_v41, %v11590_v57  ;;  %v10660_v35 = vadd.f32 %v5036_v11, %v4506_v38  ;;  %v4295_v59 = vpop.f32.mrf.mxu1  ;;  %v4898_v19 = vpop.f32.mrf.mxu0  ;;  %v4400_v40 = vrot.slane %v8167_v49, 1  ;;  %v11594_v28 = vld [vmem:[#allocation29_spill] sm:$0xff] }
 0x24d   :  { %v4398_v5 = vrot.slane %v4295_v59, 1  ;;  %v5001_v53 = vrot.slane %v4898_v19, 5  ;;  %v5003_v27 = vrot.slane %v8239_v17, 5 }
 0x24e   :  { %11591 = vst [vmem:[#allocation14_spill] sm:$0xff] %v10660_v35  ;;  %v10662_v25 = vadd.f32 %v5035_v29, %v4507_v4  ;;  %v8168_v54 = vpop.f32.mrf.mxu1  ;;  %v8240_v58 = vpop.f32.mrf.mxu0  ;;  %v10664_v2 = vadd.f32 %v5034_v1, %v4508_v6 }
 0x24f   :  { %v4430_v32 = vsel %vm622_vm0, %v4397_v0, %v4398_v5  ;;  %v5033_v30 = vsel %vm5017_vm4, %v5000_v36, %v5001_v53  ;;  %v4401_v38 = vrot.slane %v8168_v54, 1  ;;  %v5004_v41 = vrot.slane %v8240_v58, 5  ;;  %v11596_v0 = vld [vmem:[#allocation3_spill] sm:$0xff] }
 0x250   :  { %11592 = vst [vmem:[#allocation16_spill] sm:$0xff] %v10662_v25  ;;  %11593 = vst [vmem:[#allocation17_spill] sm:$0xff] %v10664_v2  ;;  %v4510_v11 = vadd.f32 %v4430_v32, %v11594_v28  ;;  %v10671_v37 = vadd.f32 %v5033_v30, %v4509_v55  ;;  %v4298_v29 = vpop.f32.mrf.mxu1  ;;  %v4901_v4 = vpop.f32.mrf.mxu0  ;;  %v11597_v32 = vld [vmem:[#allocation33_spill] sm:$0xff]  ;;  %v11598_v28 = vld [vmem:[#allocation32_spill] sm:$0xff] }
 0x251   :  { %v4427_v49 = vsel %vm622_vm0, %v4400_v40, %v4401_v38  ;;  %v5030_v1 = vsel %vm5017_vm4, %v5003_v27, %v5004_v41  ;;  %v4399_v17 = vrot.slane %v4298_v29, 1  ;;  %v5002_v57 = vrot.slane %v4901_v4, 5 }
 0x252   :  { %11595 = vst [vmem:[#allocation40_spill] sm:$0xff] %v10671_v37  ;;  %v4513_v6 = vadd.f32 %v4427_v49, %v11596_v0  ;;  %v8171_v59 = vpop.f32.mrf.mxu1  ;;  %v8243_v36 = vpop.f32.mrf.mxu0 }
 0x253   :  { %v4428_v58 = vsel %vm622_vm0, %v4399_v17, %v4400_v40  ;;  %v4429_v55 = vsel %vm622_vm0, %v4398_v5, %v4399_v17  ;;  %v5031_v19 = vsel %vm5017_vm4, %v5002_v57, %v5003_v27  ;;  %v5032_v54 = vsel %vm5017_vm4, %v5001_v53, %v5002_v57 }
 0x254   :  { %v4511_v30 = vadd.f32 %v4429_v55, %v11597_v32  ;;  %v4512_v29 = vadd.f32 %v4428_v58, %v11598_v28  ;;  %v10688_v4 = vadd.f32 %v5032_v54, %v4510_v11  ;;  %v4311_v49 = vpop.f32.mrf.mxu1  ;;  %v4914_v0 = vpop.f32.mrf.mxu0  ;;  %v4404_v35 = vrot.slane %v8171_v59, 1  ;;  %v11601_v55 = vld [vmem:[#allocation34_spill] sm:$0xff] }
 0x255   :  { %v4402_v37 = vrot.slane %v4311_v49, 1  ;;  %v5005_v25 = vrot.slane %v4914_v0, 5  ;;  %v5007_v5 = vrot.slane %v8243_v36, 5 }
 0x256   :  { %11599 = vst [vmem:[#allocation19_spill] sm:$0xff] %v10688_v4  ;;  %v10690_v40 = vadd.f32 %v5031_v19, %v4511_v30  ;;  %v8172_v17 = vpop.f32.mrf.mxu1  ;;  %v8244_v2 = vpop.f32.mrf.mxu0  ;;  %v10692_v27 = vadd.f32 %v5030_v1, %v4512_v29 }
 0x257   :  { %v4426_v53 = vsel %vm622_vm0, %v4401_v38, %v4402_v37  ;;  %v5029_v57 = vsel %vm5017_vm4, %v5004_v41, %v5005_v25  ;;  %v4405_v11 = vrot.slane %v8172_v17, 1  ;;  %v5008_v58 = vrot.slane %v8244_v2, 5  ;;  %v11603_v17 = vld [vmem:[#allocation6_spill] sm:$0xff] }
 0x258   :  { %11600 = vst [vmem:[#allocation18_spill] sm:$0xff] %v10690_v40  ;;  %v4514_v54 = vadd.f32 %v4426_v53, %v11601_v55  ;;  %v10699_v32 = vadd.f32 %v5029_v57, %v4513_v6  ;;  %v4314_v19 = vpop.f32.mrf.mxu1  ;;  %v4917_v30 = vpop.f32.mrf.mxu0  ;;  %v11604_v57 = vld [vmem:[#allocation7_spill] sm:$0xff] }
 0x259   :  { %v4423_v59 = vsel %vm622_vm0, %v4404_v35, %v4405_v11  ;;  %v5026_v1 = vsel %vm5017_vm4, %v5007_v5, %v5008_v58  ;;  %v4403_v36 = vrot.slane %v4314_v19, 1  ;;  %v5006_v28 = vrot.slane %v4917_v30, 5 }
 0x25a   :  { %11602 = vst [vmem:[#allocation20_spill] sm:$0xff] %v10699_v32  ;;  %v4517_v38 = vadd.f32 %v4423_v59, %v10317_v7  ;;  %v8175_v29 = vpop.f32.mrf.mxu1  ;;  %v8247_v41 = vpop.f32.mrf.mxu0 }
 0x25b   :  { %v4424_v2 = vsel %vm622_vm0, %v4403_v36, %v4404_v35  ;;  %v4425_v6 = vsel %vm622_vm0, %v4402_v37, %v4403_v36  ;;  %v5027_v49 = vsel %vm5017_vm4, %v5006_v28, %v5007_v5  ;;  %v5028_v0 = vsel %vm5017_vm4, %v5005_v25, %v5006_v28 }
 0x25c   :  { %v4515_v53 = vadd.f32 %v4425_v6, %v11603_v17  ;;  %v4516_v55 = vadd.f32 %v4424_v2, %v11604_v57  ;;  %v10716_v19 = vadd.f32 %v5028_v0, %v4514_v54  ;;  %v4327_v7 = vpop.f32.mrf.mxu1  ;;  %v4930_v30 = vpop.f32.mrf.mxu0  ;;  %v4408_v40 = vrot.slane %v8175_v29, 1  ;;  %v11606_v6 = vld [vmem:[#allocation4_spill] sm:$0xff] }
 0x25d   :  { %v4406_v59 = vrot.slane %v4327_v7, 1  ;;  %v5009_v32 = vrot.slane %v4930_v30, 5  ;;  %v5011_v37 = vrot.slane %v8247_v41, 5 }
 0x25e   :  { %v10718_v35 = vadd.f32 %v5027_v49, %v4515_v53  ;;  %v8176_v36 = vpop.f32.mrf.mxu1  ;;  %v8248_v4 = vpop.f32.mrf.mxu0  ;;  %v10720_v5 = vadd.f32 %v5026_v1, %v4516_v55 }
 0x25f   :  { %v4422_v25 = vsel %vm622_vm0, %v4405_v11, %v4406_v59  ;;  %v5025_v28 = vsel %vm5017_vm4, %v5008_v58, %v5009_v32  ;;  %v4409_v54 = vrot.slane %v8176_v36, 1  ;;  %v5012_v2 = vrot.slane %v8248_v4, 5  ;;  %v11608_v36 = vld [vmem:[#allocation5_spill] sm:$0xff] }
 0x260   :  { %11605 = vst [vmem:[#allocation21_spill] sm:$0xff] %v10718_v35  ;;  %v4518_v0 = vadd.f32 %v4422_v25, %v11606_v6  ;;  %v10727_v17 = vadd.f32 %v5025_v28, %v4517_v38  ;;  %v4330_v49 = vpop.f32.mrf.mxu1  ;;  %v4933_v53 = vpop.f32.mrf.mxu0 }
 0x261   :  { %v4419_v29 = vsel %vm622_vm0, %v4408_v40, %v4409_v54  ;;  %v5022_v1 = vsel %vm5017_vm4, %v5011_v37, %v5012_v2  ;;  %v4407_v41 = vrot.slane %v4330_v49, 1  ;;  %v5010_v57 = vrot.slane %v4933_v53, 5 }
 0x262   :  { %11607 = vst [vmem:[#allocation26_spill] sm:$0xff] %v10727_v17  ;;  %v4521_v11 = vadd.f32 %v4419_v29, %v10341_v3  ;;  %v8179_v55 = vpop.f32.mrf.mxu1  ;;  %v8251_v58 = vpop.f32.mrf.mxu0 }
 0x263   :  { %v4420_v4 = vsel %vm622_vm0, %v4407_v41, %v4408_v40  ;;  %v4421_v38 = vsel %vm622_vm0, %v4406_v59, %v4407_v41  ;;  %v5023_v7 = vsel %vm5017_vm4, %v5010_v57, %v5011_v37  ;;  %v5024_v30 = vsel %vm5017_vm4, %v5009_v32, %v5010_v57 }
 0x264   :  { %v4519_v25 = vadd.f32 %v4421_v38, %v11608_v36  ;;  %v4520_v28 = vadd.f32 %v4420_v4, %v10339_v8  ;;  %v10744_v6 = vadd.f32 %v5024_v30, %v4518_v0  ;;  %v4343_v3 = vpop.f32.mrf.mxu1  ;;  %v4946_v49 = vpop.f32.mrf.mxu0  ;;  %v4412_v17 = vrot.slane %v8179_v55, 1  ;;  %v11609_v4 = vld [vmem:[#allocation8_spill] sm:$0xff] }
 0x265   :  { %v4410_v53 = vrot.slane %v4343_v3, 1  ;;  %v5013_v29 = vrot.slane %v4946_v49, 5  ;;  %v5015_v59 = vrot.slane %v8251_v58, 5  ;;  %v11615_v3 = vld [vmem:[#allocation9_spill] sm:$0xff] }
 0x266   :  { %v10746_v40 = vadd.f32 %v5023_v7, %v4519_v25  ;;  %v8180_v41 = vpop.f32.mrf.mxu1  ;;  %v8252_v35 = vpop.f32.mrf.mxu0  ;;  %v10748_v37 = vadd.f32 %v5022_v1, %v4520_v28  ;;  %v11611_v1 = vrot.slane %v10368_v34, 1 }
 0x267   :  { %v4418_v32 = vsel %vm622_vm0, %v4409_v54, %v4410_v53  ;;  %v5021_v8 = vsel %vm5017_vm4, %v5012_v2, %v5013_v29  ;;  %v4413_v0 = vrot.slane %v8180_v41, 1  ;;  %v5016_v57 = vrot.slane %v8252_v35, 5  ;;  %v11612_v2 = vld [vmem:[#allocation36_spill] sm:$0xff] }
 0x268   :  { %v4522_v38 = vadd.f32 %v4418_v32, %v11609_v4  ;;  %v10755_v30 = vadd.f32 %v5021_v8, %v4521_v11  ;;  %v4346_v7 = vpop.f32.mrf.mxu1  ;;  %v4949_v36 = vpop.f32.mrf.mxu0  ;;  %v11613_v25 = vrot.slane %v11612_v2, 5  ;;  %v11614_v11 = vld [vmem:[#allocation10_spill] sm:$0xff] }
 0x269   :  { %v4415_v55 = vsel %vm622_vm0, %v4412_v17, %v4413_v0  ;;  %v4470_v58 = vsel %vm622_vm0, %v4413_v0, %v11611_v1  ;;  %v5018_v54 = vsel %vm5017_vm4, %v5015_v59, %v5016_v57  ;;  %v4411_v41 = vrot.slane %v4346_v7, 1 }
 0x26a   :  { %11610 = vst [vmem:[#allocation23_spill] sm:$0xff] %v10755_v30  ;;  %v5073_v35 = vsel %vm5017_vm4, %v5016_v57, %v11613_v25  ;;  %v4525_v28 = vadd.f32 %v4415_v55, %v11614_v11  ;;  %v4526_v49 = vadd.f32 %v4470_v58, %v11615_v3  ;;  %v5014_v32 = vrot.slane %v4949_v36, 5  ;;  %v8271_v8 = vpop.f32.mrf.mxu1  ;;  %v8343_v4 = vpop.f32.mrf.mxu0  ;;  %v11619_v58 = vld [vmem:[#allocation37_spill] sm:$0xff]  ;;  %v11620_v36 = vld [vmem:[#allocation11_spill] sm:$0xff] }
 0x26b   :  { %v4416_v0 = vsel %vm622_vm0, %v4411_v41, %v4412_v17  ;;  %v4417_v1 = vsel %vm622_vm0, %v4410_v53, %v4411_v41  ;;  %v5566_v17 = vrot.slane %v8271_v8, 6 }
 0x26c   :  { %v10771_v34 = vadd.f32 %v5073_v35, %v4525_v28  ;;  %v5019_v2 = vsel %vm5017_vm4, %v5014_v32, %v5015_v59  ;;  %v10779_v57 = vpop.f32.mrf.mxu1  ;;  %v10781_v55 = vpop.f32.mrf.mxu0  ;;  %v4523_v7 = vadd.f32 %v4417_v1, %v11619_v58  ;;  %v4524_v25 = vadd.f32 %v4416_v0, %v11620_v36 }
 0x26d   :  { %11617 = vst [vmem:[#allocation22_spill] sm:$0xff] %v10779_v57  ;;  %11618 = vst [vmem:[#allocation25_spill] sm:$0xff] %v10781_v55  ;;  %v5020_v35 = vsel %vm5017_vm4, %v5013_v29, %v5014_v32  ;;  %v5129_v59 = vadd.f32 %v10399_v52, %v4526_v49  ;;  %v6169_v1 = vrot.slane %v8343_v4, 7  ;;  %v11424_v0 = vrot.slane %v10779_v57, 6  ;;  %v10805_v4 = vld [vmem:[%s11383_s2] ss:$0 sm:$0xff] }
 0x26e   :  { %11616 = vst [vmem:[#allocation27_spill] sm:$0xff] %v10771_v34  ;;  %v10787_v11 = vadd.f32 %v5020_v35, %v4522_v38  ;;  %v8272_v28 = vpop.f32.mrf.mxu1  ;;  %v8344_v53 = vpop.f32.mrf.mxu0  ;;  %v10791_v3 = vadd.f32 %v5019_v2, %v4523_v7  ;;  %v10793_v30 = vadd.f32 %v5018_v54, %v4524_v25  ;;  %v6167_v38 = vrot.slane %v10781_v55, 7 }
 0x26f   :  { %v5567_v41 = vrot.slane %v8272_v28, 6  ;;  %v6170_v34 = vrot.slane %v8344_v53, 7 }
 0x270   :  { %11621 = vst [vmem:[#allocation24_spill] sm:$0xff] %v10787_v11  ;;  %11622 = vst [vmem:[#allocation41_spill] sm:$0xff] %v10791_v3  ;;  %v5344_v58 = vpop.f32.mrf.mxu1  ;;  %v5947_v29 = vpop.f32.mrf.mxu0 }
 0x271   :  { %11623 = vst [vmem:[#allocation42_spill] sm:$0xff] %v10793_v30  ;;  %v5673_v32 = vsel %vm5620_vm5, %v5566_v17, %v5567_v41  ;;  %v5565_v8 = vrot.slane %v5344_v58, 6  ;;  %v6168_v36 = vrot.slane %v5947_v29, 7  ;;  %v6275_v54 = vsel %vm3321_vm3, %v6169_v1, %v6170_v34 }
 0x272   :  { %v5678_v52 = vadd.f32 %v5673_v32, %v10406_v13  ;;  %v8275_v49 = vpop.f32.mrf.mxu1  ;;  %v8347_v2 = vpop.f32.mrf.mxu0 }
 0x273   :  { %v5674_v7 = vsel %vm5620_vm5, %v5565_v8, %v5566_v17  ;;  %v5675_v25 = vsel %vm5620_vm5, %v11424_v0, %v5565_v8  ;;  %v6277_v13 = vsel %vm3321_vm3, %v6167_v38, %v6168_v36  ;;  %v6276_v32 = vsel %vm3321_vm3, %v6168_v36, %v6169_v1 }
 0x274   :  { %v6280_v35 = vadd.f32 %v6275_v54, %v5678_v52  ;;  %v5677_v28 = vadd.f32 %v5674_v7, %v10404_v48  ;;  %v5732_v53 = vadd.f32 %v5675_v25, %v5129_v59  ;;  %v5357_v58 = vpop.f32.mrf.mxu1  ;;  %v5960_v29 = vpop.f32.mrf.mxu0  ;;  %v5570_v57 = vrot.slane %v8275_v49, 6 }
 0x275   :  { %v5568_v17 = vrot.slane %v5357_v58, 6  ;;  %v6171_v11 = vrot.slane %v5960_v29, 7  ;;  %v6173_v7 = vrot.slane %v8347_v2, 7 }
 0x276   :  { %v6458_v3 = vadd.f32 %v10805_v4, %v6280_v35  ;;  %v6279_v30 = vadd.f32 %v6276_v32, %v5677_v28  ;;  %v10821_v8 = vadd.f32 %v6277_v13, %v5732_v53  ;;  %v8276_v0 = vpop.f32.mrf.mxu1  ;;  %v8348_v55 = vpop.f32.mrf.mxu0 }
 0x277   :  { %v5672_v52 = vsel %vm5620_vm5, %v5567_v41, %v5568_v17  ;;  %v5571_v48 = vrot.slane %v8276_v0, 6  ;;  %v6174_v59 = vrot.slane %v8348_v55, 7  ;;  %v6274_v36 = vsel %vm3321_vm3, %v6170_v34, %v6171_v11 }
 0x278   :  { %v6457_v54 = vadd.f32 %v10805_v4, %v6279_v30  ;;  %v5679_v1 = vadd.f32 %v5672_v52, %v10413_v45  ;;  %v5360_v25 = vpop.f32.mrf.mxu1  ;;  %v5963_v35 = vpop.f32.mrf.mxu0  ;;  %8513 = vtanh.f32 %v6458_v3 }
 0x279   :  { %v5669_v13 = vsel %vm5620_vm5, %v5570_v57, %v5571_v48  ;;  %v5569_v49 = vrot.slane %v5360_v25, 6  ;;  %v6172_v28 = vrot.slane %v5963_v35, 7  ;;  %v6271_v45 = vsel %vm3321_vm3, %v6173_v7, %v6174_v59 }
 0x27a   :  { %8515 = vtanh.f32 %v6457_v54  ;;  %v6281_v41 = vadd.f32 %v6274_v36, %v5679_v1  ;;  %v5682_v55 = vadd.f32 %v5669_v13, %v10438_v12  ;;  %v8279_v0 = vpop.f32.mrf.mxu1  ;;  %v8351_v30 = vpop.f32.mrf.mxu0 }
 0x27b   :  { %v5670_v34 = vsel %vm5620_vm5, %v5569_v49, %v5570_v57  ;;  %v5671_v3 = vsel %vm5620_vm5, %v5568_v17, %v5569_v49  ;;  %v6272_v52 = vsel %vm3321_vm3, %v6172_v28, %v6173_v7  ;;  %v6273_v54 = vsel %vm3321_vm3, %v6171_v11, %v6172_v28  ;;  %v11624_v28 = vld [vmem:[#allocation12_spill] sm:$0xff] }
 0x27c   :  { %v6459_v2 = vadd.f32 %v10805_v4, %v6281_v41  ;;  %v6284_v53 = vadd.f32 %v6271_v45, %v5682_v55  ;;  %v5680_v58 = vadd.f32 %v5671_v3, %v10433_v20  ;;  %v5681_v29 = vadd.f32 %v5670_v34, %v10436_v33  ;;  %v5373_v32 = vpop.f32.mrf.mxu1  ;;  %v5976_v12 = vpop.f32.mrf.mxu0 }
 0x27d   :  { %v5574_v1 = vrot.slane %v8279_v0, 6  ;;  %v5572_v57 = vrot.slane %v5373_v32, 6  ;;  %v6177_v35 = vrot.slane %v8351_v30, 7  ;;  %v6175_v33 = vrot.slane %v5976_v12, 7 }
 0x27e   :  { %v6462_v36 = vadd.f32 %v10805_v4, %v6284_v53  ;;  %v6282_v17 = vadd.f32 %v6273_v54, %v5680_v58  ;;  %v6283_v25 = vadd.f32 %v6272_v52, %v5681_v29  ;;  %v8280_v13 = vpop.f32.mrf.mxu1  ;;  %v8352_v49 = vpop.f32.mrf.mxu0  ;;  %8517 = vtanh.f32 %v6459_v2 }
 0x27f   :  { %v5668_v20 = vsel %vm5620_vm5, %v5571_v48, %v5572_v57  ;;  %v5575_v41 = vrot.slane %v8280_v13, 6  ;;  %v6178_v55 = vrot.slane %v8352_v49, 7  ;;  %v6270_v30 = vsel %vm3321_vm3, %v6174_v59, %v6175_v33 }
 0x280   :  { %v6460_v7 = vadd.f32 %v10805_v4, %v6282_v17  ;;  %v6461_v11 = vadd.f32 %v10805_v4, %v6283_v25  ;;  %v5683_v0 = vadd.f32 %v5668_v20, %v11624_v28  ;;  %v5376_v45 = vpop.f32.mrf.mxu1  ;;  %v5979_v34 = vpop.f32.mrf.mxu0  ;;  %8519 = vtanh.f32 %v6462_v36 }
 0x281   :  { %v5665_v3 = vsel %vm5620_vm5, %v5574_v1, %v5575_v41  ;;  %v5573_v48 = vrot.slane %v5376_v45, 6  ;;  %v6176_v58 = vrot.slane %v5979_v34, 7  ;;  %v6267_v12 = vsel %vm3321_vm3, %v6177_v35, %v6178_v55 }
 0x282   :  { %8521 = vtanh.f32 %v6460_v7  ;;  %v6285_v53 = vadd.f32 %v6270_v30, %v5683_v0  ;;  %v5686_v2 = vadd.f32 %v5665_v3, %v10468_v56  ;;  %v8283_v29 = vpop.f32.mrf.mxu1  ;;  %v8355_v32 = vpop.f32.mrf.mxu0 }
 0x283   :  { %8523 = vtanh.f32 %v6461_v11  ;;  %v5666_v52 = vsel %vm5620_vm5, %v5573_v48, %v5574_v1  ;;  %v5667_v59 = vsel %vm5620_vm5, %v5572_v57, %v5573_v48  ;;  %v6268_v49 = vsel %vm3321_vm3, %v6176_v58, %v6177_v35 }
 0x284   :  { %v6463_v54 = vadd.f32 %v10805_v4, %v6285_v53  ;;  %v6288_v36 = vadd.f32 %v6267_v12, %v5686_v2  ;;  %v5684_v17 = vadd.f32 %v5667_v59, %v10464_v39  ;;  %v5685_v56 = vadd.f32 %v5666_v52, %v10466_v14  ;;  %v5389_v25 = vpop.f32.mrf.mxu1  ;;  %v5992_v13 = vpop.f32.mrf.mxu0 }
 0x285   :  { %v6269_v20 = vsel %vm3321_vm3, %v6175_v33, %v6176_v58  ;;  %v5578_v7 = vrot.slane %v8283_v29, 6  ;;  %v5576_v1 = vrot.slane %v5389_v25, 6  ;;  %v8514_v11 = vpop.eup %8513  ;;  %v6181_v45 = vrot.slane %v8355_v32, 7 }
 0x286   :  { %v6466_v57 = vadd.f32 %v10805_v4, %v6288_v36  ;;  %v6286_v28 = vadd.f32 %v6269_v20, %v5684_v17  ;;  %v6287_v0 = vadd.f32 %v6268_v49, %v5685_v56  ;;  %v8284_v34 = vpop.f32.mrf.mxu1  ;;  %v8356_v39 = vpop.f32.mrf.mxu0  ;;  %v6179_v3 = vrot.slane %v5992_v13, 7 }
 0x287   :  { %v8516_v30 = vpop.eup %8515  ;;  %v5664_v14 = vsel %vm5620_vm5, %v5575_v41, %v5576_v1  ;;  %v5579_v48 = vrot.slane %v8284_v34, 6  ;;  %v6182_v35 = vrot.slane %v8356_v39, 7  ;;  %8525 = vtanh.f32 %v6463_v54 }
 0x288   :  { %v7261_v53 = vpack.c.bf16 %v8514_v11, %v8516_v30  ;;  %v6464_v33 = vadd.f32 %v10805_v4, %v6286_v28  ;;  %v6465_v2 = vadd.f32 %v10805_v4, %v6287_v0  ;;  %v5392_v58 = vpop.f32.mrf.mxu1  ;;  %v5995_v29 = vpop.f32.mrf.mxu0  ;;  %8527 = vtanh.f32 %v6466_v57 }
 0x289   :  { %v5687_v32 = vadd.f32 %v5664_v14, %v10475_v46  ;;  %v6266_v12 = vsel %vm3321_vm3, %v6178_v55, %v6179_v3  ;;  %v5661_v41 = vsel %vm5620_vm5, %v5578_v7, %v5579_v48  ;;  %v5577_v59 = vrot.slane %v5392_v58, 6 }
 0x28a   :  { %7262 = vst [vmem:[%s11384_s3] sm:$0xff] %v7261_v53   ;;  %8529 = vtanh.f32 %v6464_v33  ;;  %v5690_v52 = vadd.f32 %v5661_v41, %v10496_v50  ;;  %v6180_v54 = vrot.slane %v5995_v29, 7  ;;  %v8287_v36 = vpop.f32.mrf.mxu1  ;;  %v10883_v17 = vpop.f32.mrf.mxu0  ;;  %v6263_v55 = vsel %vm3321_vm3, %v6181_v45, %v6182_v35 }
 0x28b   :  { %8531 = vtanh.f32 %v6465_v2  ;;  %v6289_v46 = vadd.f32 %v6266_v12, %v5687_v32  ;;  %v5582_v56 = vrot.slane %v8287_v36, 6  ;;  %v5662_v13 = vsel %vm5620_vm5, %v5577_v59, %v5578_v7  ;;  %v8518_v57 = vpop.eup %8517 }
 0x28c   :  { %v6292_v25 = vadd.f32 %v6263_v55, %v5690_v52  ;;  %v5663_v49 = vsel %vm5620_vm5, %v5576_v1, %v5577_v59  ;;  %v6185_v50 = vrot.slane %v10883_v17, 7  ;;  %v5405_v20 = vpop.f32.mrf.mxu1  ;;  %v6008_v11 = vpop.f32.mrf.mxu0  ;;  %v5689_v34 = vadd.f32 %v5662_v13, %v10494_v26 }
 0x28d   :  { %v6467_v28 = vadd.f32 %v10805_v4, %v6289_v46  ;;  %v5688_v0 = vadd.f32 %v5663_v49, %v10492_v15  ;;  %v6264_v39 = vsel %vm3321_vm3, %v6180_v54, %v6181_v45  ;;  %v8520_v30 = vpop.eup %8519  ;;  %v6265_v1 = vsel %vm3321_vm3, %v6179_v3, %v6180_v54 }
 0x28e   :  { %v6470_v7 = vadd.f32 %v10805_v4, %v6292_v25  ;;  %v5580_v14 = vrot.slane %v5405_v20, 6  ;;  %v6183_v53 = vrot.slane %v6008_v11, 7  ;;  %v8288_v33 = vpop.f32.mrf.mxu1  ;;  %v10900_v2 = vpop.f32.mrf.mxu0  ;;  %v6291_v15 = vadd.f32 %v6264_v39, %v5689_v34 }
 0x28f   :  { %v8522_v58 = vpop.eup %8521  ;;  %8533 = vtanh.f32 %v6467_v28  ;;  %v6290_v29 = vadd.f32 %v6265_v1, %v5688_v0  ;;  %v5583_v32 = vrot.slane %v8288_v33, 6 }
 0x290   :  { %v8524_v26 = vpop.eup %8523  ;;  %v7266_v12 = vpack.c.bf16 %v8522_v58, %v8518_v57  ;;  %8535 = vtanh.f32 %v6470_v7  ;;  %v5660_v45 = vsel %vm5620_vm5, %v5579_v48, %v5580_v14  ;;  %v6262_v41 = vsel %vm3321_vm3, %v6182_v35, %v6183_v53  ;;  %v5408_v3 = vpop.f32.mrf.mxu1 }
 0x291   :  { %v6011_v52 = vpop.f32.mrf.mxu0  ;;  %v7271_v59 = vpack.c.bf16 %v8520_v30, %v8524_v26  ;;  %v6468_v54 = vadd.f32 %v10805_v4, %v6290_v29  ;;  %v6469_v36 = vadd.f32 %v10805_v4, %v6291_v15  ;;  %v5691_v17 = vadd.f32 %v5660_v45, %v10503_v31 }
 0x292   :  { %7398 = vst [vmem:[%s11384_s3 + $0x8] sm:$0xff] %v7266_v12   ;;  %v5657_v46 = vsel %vm5620_vm5, %v5582_v56, %v5583_v32  ;;  %v6186_v48 = vrot.slane %v10900_v2, 7  ;;  %v5581_v55 = vrot.slane %v5408_v3, 6  ;;  %v6184_v35 = vrot.slane %v6011_v52, 7  ;;  %v10915_v25 = vpop.f32.mrf.mxu1 }
 0x293   :  { %v10917_v13 = vpop.f32.mrf.mxu0  ;;  %7399 = vst [vmem:[%s11384_s3 + $0x10] sm:$0xff] %v7271_v59   ;;  %8537 = vtanh.f32 %v6468_v54  ;;  %v6293_v31 = vadd.f32 %v6262_v41, %v5691_v17  ;;  %v5694_v49 = vadd.f32 %v5657_v46, %v10524_v10  ;;  %v5586_v20 = vrot.slane %v10915_v25, 6 }
 0x294   :  { %8539 = vtanh.f32 %v6469_v36  ;;  %v6259_v11 = vsel %vm3321_vm3, %v6185_v50, %v6186_v48  ;;  %v5658_v57 = vsel %vm5620_vm5, %v5581_v55, %v5582_v56  ;;  %v5659_v28 = vsel %vm5620_vm5, %v5580_v14, %v5581_v55  ;;  %v5421_v0 = vpop.f32.mrf.mxu1  ;;  %v8526_v39 = vpop.eup %8525 }
 0x295   :  { %v6024_v34 = vpop.f32.mrf.mxu0  ;;  %v6471_v30 = vadd.f32 %v10805_v4, %v6293_v31  ;;  %v6296_v7 = vadd.f32 %v6259_v11, %v5694_v49  ;;  %v5692_v10 = vadd.f32 %v5659_v28, %v10520_v24  ;;  %v5693_v1 = vadd.f32 %v5658_v57, %v10522_v61  ;;  %v8528_v33 = vpop.eup %8527 }
 0x296   :  { %v6260_v2 = vsel %vm3321_vm3, %v6184_v35, %v6185_v50  ;;  %v6261_v56 = vsel %vm3321_vm3, %v6183_v53, %v6184_v35  ;;  %v6189_v58 = vrot.slane %v10917_v13, 7  ;;  %v5584_v14 = vrot.slane %v5421_v0, 6  ;;  %v10938_v29 = vpop.f32.mrf.mxu1 }
 0x297   :  { %v10940_v15 = vpop.f32.mrf.mxu0  ;;  %v8530_v26 = vpop.eup %8529  ;;  %8541 = vtanh.f32 %v6471_v30  ;;  %v6474_v24 = vadd.f32 %v10805_v4, %v6296_v7  ;;  %v6294_v12 = vadd.f32 %v6261_v56, %v5692_v10  ;;  %v6295_v61 = vadd.f32 %v6260_v2, %v5693_v1 }
 0x298   :  { %v8532_v45 = vpop.eup %8531  ;;  %v7276_v41 = vpack.c.bf16 %v8530_v26, %v8526_v39  ;;  %v5656_v50 = vsel %vm5620_vm5, %v5583_v32, %v5584_v14  ;;  %v6187_v3 = vrot.slane %v6024_v34, 7  ;;  %v5587_v53 = vrot.slane %v10938_v29, 6  ;;  %v5424_v52 = vpop.f32.mrf.mxu1 }
 0x299   :  { %v6027_v59 = vpop.f32.mrf.mxu0  ;;  %v7281_v54 = vpack.c.bf16 %v8528_v33, %v8532_v45  ;;  %8543 = vtanh.f32 %v6474_v24  ;;  %v6472_v36 = vadd.f32 %v10805_v4, %v6294_v12  ;;  %v6473_v17 = vadd.f32 %v10805_v4, %v6295_v61 }
 0x29a   :  { %7400 = vst [vmem:[%s11384_s3 + $0x18] sm:$0xff] %v7276_v41   ;;  %v5695_v46 = vadd.f32 %v5656_v50, %v10531_v22  ;;  %v6258_v32 = vsel %vm3321_vm3, %v6186_v48, %v6187_v3  ;;  %v5653_v55 = vsel %vm5620_vm5, %v5586_v20, %v5587_v53  ;;  %v6190_v35 = vrot.slane %v10940_v15, 7  ;;  %v10957_v25 = vpop.f32.mrf.mxu1 }
 0x29b   :  { %v10959_v13 = vpop.f32.mrf.mxu0  ;;  %7401 = vst [vmem:[%s11384_s3 + $0x20] sm:$0xff] %v7281_v54   ;;  %8545 = vtanh.f32 %v6472_v36  ;;  %v5698_v31 = vadd.f32 %v5653_v55, %v10552_v16  ;;  %v5585_v22 = vrot.slane %v5424_v52, 6  ;;  %v6188_v49 = vrot.slane %v6027_v59, 7 }
 0x29c   :  { %v8534_v11 = vpop.eup %8533  ;;  %8547 = vtanh.f32 %v6473_v17  ;;  %v6297_v48 = vadd.f32 %v6258_v32, %v5695_v46  ;;  %v6255_v57 = vsel %vm3321_vm3, %v6189_v58, %v6190_v35  ;;  %v5590_v28 = vrot.slane %v10957_v25, 6  ;;  %v5437_v0 = vpop.f32.mrf.mxu1 }
 0x29d   :  { %v6040_v34 = vpop.f32.mrf.mxu0  ;;  %v8536_v39 = vpop.eup %8535  ;;  %v6300_v30 = vadd.f32 %v6255_v57, %v5698_v31  ;;  %v5654_v7 = vsel %vm5620_vm5, %v5585_v22, %v5586_v20  ;;  %v5655_v16 = vsel %vm5620_vm5, %v5584_v14, %v5585_v22  ;;  %v6256_v10 = vsel %vm3321_vm3, %v6188_v49, %v6189_v58 }
 0x29e   :  { %v6475_v1 = vadd.f32 %v10805_v4, %v6297_v48  ;;  %v5696_v33 = vadd.f32 %v5655_v16, %v10548_v63  ;;  %v5697_v2 = vadd.f32 %v5654_v7, %v10550_v43  ;;  %v6257_v56 = vsel %vm3321_vm3, %v6187_v3, %v6188_v49  ;;  %v10979_v29 = vpop.f32.mrf.mxu1 }
 0x29f   :  { %v10981_v15 = vpop.f32.mrf.mxu0  ;;  %v6478_v20 = vadd.f32 %v10805_v4, %v6300_v30  ;;  %v6193_v14 = vrot.slane %v10959_v13, 7  ;;  %v5588_v26 = vrot.slane %v5437_v0, 6  ;;  %v6191_v24 = vrot.slane %v6040_v34, 7 }
 0x2a0   :  { %v8538_v58 = vpop.eup %8537  ;;  %8549 = vtanh.f32 %v6475_v1  ;;  %v6298_v12 = vadd.f32 %v6257_v56, %v5696_v33  ;;  %v6299_v61 = vadd.f32 %v6256_v10, %v5697_v2  ;;  %v5591_v63 = vrot.slane %v10979_v29, 6  ;;  %v5440_v43 = vpop.f32.mrf.mxu1 }
 0x2a1   :  { %v6043_v45 = vpop.f32.mrf.mxu0  ;;  %v8540_v41 = vpop.eup %8539  ;;  %v7286_v50 = vpack.c.bf16 %v8538_v58, %v8534_v11  ;;  %8551 = vtanh.f32 %v6478_v20  ;;  %v5652_v3 = vsel %vm5620_vm5, %v5587_v53, %v5588_v26  ;;  %v6254_v52 = vsel %vm3321_vm3, %v6190_v35, %v6191_v24 }
 0x2a2   :  { %v7291_v59 = vpack.c.bf16 %v8536_v39, %v8540_v41  ;;  %v6476_v54 = vadd.f32 %v10805_v4, %v6298_v12  ;;  %v6477_v36 = vadd.f32 %v10805_v4, %v6299_v61  ;;  %v5699_v17 = vadd.f32 %v5652_v3, %v10559_v18  ;;  %v10993_v46 = vpop.f32.mrf.mxu1 }
 0x2a3   :  { %v10995_v32 = vpop.f32.mrf.mxu0  ;;  %7402 = vst [vmem:[%s11384_s3 + $0x28] sm:$0xff] %v7286_v50   ;;  %v5649_v53 = vsel %vm5620_vm5, %v5590_v28, %v5591_v63  ;;  %v6194_v55 = vrot.slane %v10981_v15, 7  ;;  %v5589_v35 = vrot.slane %v5440_v43, 6  ;;  %v6192_v25 = vrot.slane %v6043_v45, 7 }
 0x2a4   :  { %v8542_v13 = vpop.eup %8541  ;;  %7403 = vst [vmem:[%s11384_s3 + $0x30] sm:$0xff] %v7291_v59   ;;  %8553 = vtanh.f32 %v6476_v54  ;;  %v6301_v18 = vadd.f32 %v6254_v52, %v5699_v17  ;;  %v5702_v31 = vadd.f32 %v5649_v53, %v10580_v42  ;;  %v5594_v22 = vrot.slane %v10993_v46, 6  ;;  %v5453_v49 = vpop.f32.mrf.mxu1 }
 0x2a5   :  { %v11008_v11 = vpop.f32.mrf.mxu0  ;;  %8555 = vtanh.f32 %v6477_v36  ;;  %v6251_v48 = vsel %vm3321_vm3, %v6193_v14, %v6194_v55  ;;  %v5650_v57 = vsel %vm5620_vm5, %v5589_v35, %v5590_v28  ;;  %v5651_v0 = vsel %vm5620_vm5, %v5588_v26, %v5589_v35 }
 0x2a6   :  { %v8544_v34 = vpop.eup %8543  ;;  %v6479_v39 = vadd.f32 %v10805_v4, %v6301_v18  ;;  %v6304_v30 = vadd.f32 %v6251_v48, %v5702_v31  ;;  %v5700_v42 = vadd.f32 %v5651_v0, %v10576_v62  ;;  %v5701_v7 = vadd.f32 %v5650_v57, %v10578_v47  ;;  %v11019_v16 = vpop.f32.mrf.mxu1 }
 0x2a7   :  { %v11021_v10 = vpop.f32.mrf.mxu0  ;;  %v6252_v1 = vsel %vm3321_vm3, %v6192_v25, %v6193_v14  ;;  %v6253_v28 = vsel %vm3321_vm3, %v6191_v24, %v6192_v25  ;;  %v6197_v33 = vrot.slane %v10995_v32, 7  ;;  %v5592_v2 = vrot.slane %v5453_v49, 6 }
 0x2a8   :  { %v8546_v56 = vpop.eup %8545  ;;  %8557 = vtanh.f32 %v6479_v39  ;;  %v6482_v29 = vadd.f32 %v10805_v4, %v6304_v30  ;;  %v6302_v62 = vadd.f32 %v6253_v28, %v5700_v42  ;;  %v6303_v15 = vadd.f32 %v6252_v1, %v5701_v7  ;;  %v5456_v47 = vpop.f32.mrf.mxu1 }
 0x2a9   :  { %v6059_v20 = vpop.f32.mrf.mxu0  ;;  %v8548_v26 = vpop.eup %8547  ;;  %v7296_v58 = vpack.c.bf16 %v8546_v56, %v8542_v13  ;;  %v5648_v12 = vsel %vm5620_vm5, %v5591_v63, %v5592_v2  ;;  %v6195_v14 = vrot.slane %v11008_v11, 7  ;;  %v5595_v24 = vrot.slane %v11019_v16, 6 }
 0x2aa   :  { %v7301_v61 = vpack.c.bf16 %v8544_v34, %v8548_v26  ;;  %8559 = vtanh.f32 %v6482_v29  ;;  %v6480_v43 = vadd.f32 %v10805_v4, %v6302_v62  ;;  %v6481_v45 = vadd.f32 %v10805_v4, %v6303_v15  ;;  %v11035_v41 = vpop.f32.mrf.mxu1 }
 0x2ab   :  { %v11037_v50 = vpop.f32.mrf.mxu0  ;;  %7404 = vst [vmem:[%s11384_s3 + $0x38] sm:$0xff] %v7296_v58   ;;  %v5703_v63 = vadd.f32 %v5648_v12, %v10587_v9  ;;  %v6250_v3 = vsel %vm3321_vm3, %v6194_v55, %v6195_v14  ;;  %v5645_v52 = vsel %vm5620_vm5, %v5594_v22, %v5595_v24  ;;  %v6198_v59 = vrot.slane %v11021_v10, 7 }
 0x2ac   :  { %7405 = vst [vmem:[%s11384_s3 + $0x40] sm:$0xff] %v7301_v61   ;;  %8561 = vtanh.f32 %v6480_v43  ;;  %v5706_v54 = vadd.f32 %v5645_v52, %v10608_v60  ;;  %v5593_v36 = vrot.slane %v5456_v47, 6  ;;  %v6196_v17 = vrot.slane %v6059_v20, 7  ;;  %v5469_v46 = vpop.f32.mrf.mxu1 }
 0x2ad   :  { %v11052_v32 = vpop.f32.mrf.mxu0  ;;  %v8550_v9 = vpop.eup %8549  ;;  %8563 = vtanh.f32 %v6481_v45  ;;  %v6305_v53 = vadd.f32 %v6250_v3, %v5703_v63  ;;  %v6247_v55 = vsel %vm3321_vm3, %v6197_v33, %v6198_v59  ;;  %v5598_v35 = vrot.slane %v11035_v41, 6  ;;  %v11625_v41 = vld [vmem:[#allocation38_spill] sm:$0xff] }
 0x2ae   :  { %v8552_v25 = vpop.eup %8551  ;;  %v6308_v13 = vadd.f32 %v6247_v55, %v5706_v54  ;;  %v5646_v18 = vsel %vm5620_vm5, %v5593_v36, %v5594_v22  ;;  %v5647_v60 = vsel %vm5620_vm5, %v5592_v2, %v5593_v36  ;;  %v6248_v31 = vsel %vm3321_vm3, %v6196_v17, %v6197_v33  ;;  %v11063_v49 = vpop.f32.mrf.mxu1  ;;  %v11627_v55 = vld [vmem:[#allocation13_spill] sm:$0xff] }
 0x2af   :  { %v11065_v11 = vpop.f32.mrf.mxu0  ;;  %v6483_v48 = vadd.f32 %v10805_v4, %v6305_v53  ;;  %v5704_v57 = vadd.f32 %v5647_v60, %v10604_v21  ;;  %v5705_v0 = vadd.f32 %v5646_v18, %v10606_v51  ;;  %v6249_v34 = vsel %vm3321_vm3, %v6195_v14, %v6196_v17 }
 0x2b0   :  { %v6486_v22 = vadd.f32 %v10805_v4, %v6308_v13  ;;  %v6201_v39 = vrot.slane %v11037_v50, 7  ;;  %v5596_v30 = vrot.slane %v5469_v46, 6  ;;  %v6199_v42 = vrot.slane %v11052_v32, 7  ;;  %v5472_v7 = vpop.f32.mrf.mxu1 }
 0x2b1   :  { %v6075_v16 = vpop.f32.mrf.mxu0  ;;  %v8554_v10 = vpop.eup %8553  ;;  %8565 = vtanh.f32 %v6483_v48  ;;  %v6306_v1 = vadd.f32 %v6249_v34, %v5704_v57  ;;  %v6307_v28 = vadd.f32 %v6248_v31, %v5705_v0  ;;  %v5599_v21 = vrot.slane %v11063_v49, 6 }
 0x2b2   :  { %v8556_v33 = vpop.eup %8555  ;;  %v7306_v51 = vpack.c.bf16 %v8554_v10, %v8550_v9  ;;  %8567 = vtanh.f32 %v6486_v22  ;;  %v5644_v2 = vsel %vm5620_vm5, %v5595_v24, %v5596_v30  ;;  %v6246_v56 = vsel %vm3321_vm3, %v6198_v59, %v6199_v42  ;;  %v11080_v29 = vpop.f32.mrf.mxu1  ;;  %v11626_v9 = vld [vmem:[#allocation39_spill] sm:$0xff] }
 0x2b3   :  { %v11082_v62 = vpop.f32.mrf.mxu0  ;;  %v7311_v15 = vpack.c.bf16 %v8552_v25, %v8556_v33  ;;  %v6484_v47 = vadd.f32 %v10805_v4, %v6306_v1  ;;  %v6485_v20 = vadd.f32 %v10805_v4, %v6307_v28  ;;  %v5707_v26 = vadd.f32 %v5644_v2, %v10615_v44  ;;  %v11628_v33 = vld [vmem:[#allocation15_spill] sm:$0xff] }
 0x2b4   :  { %7406 = vst [vmem:[%s11384_s3 + $0x48] sm:$0xff] %v7306_v51   ;;  %v5641_v58 = vsel %vm5620_vm5, %v5598_v35, %v5599_v21  ;;  %v6202_v12 = vrot.slane %v11065_v11, 7  ;;  %v5597_v14 = vrot.slane %v5472_v7, 6  ;;  %v6200_v24 = vrot.slane %v6075_v16, 7  ;;  %v11093_v61 = vpop.f32.mrf.mxu1 }
 0x2b5   :  { %v11095_v43 = vpop.f32.mrf.mxu0  ;;  %v8558_v45 = vpop.eup %8557  ;;  %7407 = vst [vmem:[%s11384_s3 + $0x50] sm:$0xff] %v7311_v15   ;;  %8569 = vtanh.f32 %v6484_v47  ;;  %v6309_v44 = vadd.f32 %v6246_v56, %v5707_v26  ;;  %v5710_v50 = vadd.f32 %v5641_v58, %v11625_v41  ;;  %v5602_v63 = vrot.slane %v11080_v29, 6  ;;  %v11629_v15 = vld [vmem:[#allocation17_spill] sm:$0xff] }
 0x2b6   :  { %8571 = vtanh.f32 %v6485_v20  ;;  %v6243_v3 = vsel %vm3321_vm3, %v6201_v39, %v6202_v12  ;;  %v5642_v52 = vsel %vm5620_vm5, %v5597_v14, %v5598_v35  ;;  %v5643_v59 = vsel %vm5620_vm5, %v5596_v30, %v5597_v14  ;;  %v11108_v54 = vpop.f32.mrf.mxu1 }
 0x2b7   :  { %v11110_v36 = vpop.f32.mrf.mxu0  ;;  %v8560_v17 = vpop.eup %8559  ;;  %v6487_v46 = vadd.f32 %v10805_v4, %v6309_v44  ;;  %v6312_v32 = vadd.f32 %v6243_v3, %v5710_v50  ;;  %v5708_v53 = vadd.f32 %v5643_v59, %v11626_v9  ;;  %v5709_v25 = vadd.f32 %v5642_v52, %v11627_v55  ;;  %v11630_v59 = vld [vmem:[#allocation14_spill] sm:$0xff] }
 0x2b8   :  { %v6244_v13 = vsel %vm3321_vm3, %v6200_v24, %v6201_v39  ;;  %v6245_v35 = vsel %vm3321_vm3, %v6199_v42, %v6200_v24  ;;  %v6205_v18 = vrot.slane %v11082_v62, 7  ;;  %v5600_v60 = vrot.slane %v11093_v61, 6  ;;  %v5488_v31 = vpop.f32.mrf.mxu1 }
 0x2b9   :  { %v6091_v49 = vpop.f32.mrf.mxu0  ;;  %v8562_v11 = vpop.eup %8561  ;;  %8573 = vtanh.f32 %v6487_v46  ;;  %v6490_v48 = vadd.f32 %v10805_v4, %v6312_v32  ;;  %v6310_v57 = vadd.f32 %v6245_v35, %v5708_v53  ;;  %v6311_v0 = vadd.f32 %v6244_v13, %v5709_v25 }
 0x2ba   :  { %v8564_v34 = vpop.eup %8563  ;;  %v7316_v22 = vpack.c.bf16 %v8562_v11, %v8558_v45  ;;  %v5640_v39 = vsel %vm5620_vm5, %v5599_v21, %v5600_v60  ;;  %v6203_v30 = vrot.slane %v11095_v43, 7  ;;  %v5603_v42 = vrot.slane %v11108_v54, 6  ;;  %v11126_v7 = vpop.f32.mrf.mxu1 }
 0x2bb   :  { %v11128_v16 = vpop.f32.mrf.mxu0  ;;  %v7321_v10 = vpack.c.bf16 %v8560_v17, %v8564_v34  ;;  %8575 = vtanh.f32 %v6490_v48  ;;  %v6488_v1 = vadd.f32 %v10805_v4, %v6310_v57  ;;  %v6489_v28 = vadd.f32 %v10805_v4, %v6311_v0 }
 0x2bc   :  { %7408 = vst [vmem:[%s11384_s3 + $0x58] sm:$0xff] %v7316_v22   ;;  %v5711_v21 = vadd.f32 %v5640_v39, %v11628_v33  ;;  %v6242_v51 = vsel %vm3321_vm3, %v6202_v12, %v6203_v30  ;;  %v5637_v2 = vsel %vm5620_vm5, %v5602_v63, %v5603_v42  ;;  %v6206_v56 = vrot.slane %v11110_v36, 7  ;;  %v11141_v29 = vpop.f32.mrf.mxu1  ;;  %v11631_v36 = vld [vmem:[#allocation16_spill] sm:$0xff] }
 0x2bd   :  { %v11143_v62 = vpop.f32.mrf.mxu0  ;;  %7409 = vst [vmem:[%s11384_s3 + $0x60] sm:$0xff] %v7321_v10   ;;  %8577 = vtanh.f32 %v6488_v1  ;;  %v5714_v47 = vadd.f32 %v5637_v2, %v11629_v15  ;;  %v5601_v20 = vrot.slane %v5488_v31, 6  ;;  %v6204_v26 = vrot.slane %v6091_v49, 7 }
 0x2be   :  { %v8566_v58 = vpop.eup %8565  ;;  %8579 = vtanh.f32 %v6489_v28  ;;  %v6313_v12 = vadd.f32 %v6242_v51, %v5711_v21  ;;  %v6239_v14 = vsel %vm3321_vm3, %v6205_v18, %v6206_v56  ;;  %v5606_v24 = vrot.slane %v11126_v7, 6  ;;  %v11152_v61 = vpop.f32.mrf.mxu1 }
 0x2bf   :  { %v11154_v43 = vpop.f32.mrf.mxu0  ;;  %v8568_v45 = vpop.eup %8567  ;;  %v6316_v44 = vadd.f32 %v6239_v14, %v5714_v47  ;;  %v5638_v41 = vsel %vm5620_vm5, %v5601_v20, %v5602_v63  ;;  %v5639_v50 = vsel %vm5620_vm5, %v5600_v60, %v5601_v20  ;;  %v6240_v3 = vsel %vm3321_vm3, %v6204_v26, %v6205_v18 }
 0x2c0   :  { %v6491_v52 = vadd.f32 %v10805_v4, %v6313_v12  ;;  %v5712_v54 = vadd.f32 %v5639_v50, %v11630_v59  ;;  %v5713_v17 = vadd.f32 %v5638_v41, %v11631_v36  ;;  %v6241_v46 = vsel %vm3321_vm3, %v6203_v30, %v6204_v26  ;;  %v5504_v32 = vpop.f32.mrf.mxu1  ;;  %v11632_v30 = vld [vmem:[#allocation40_spill] sm:$0xff]  ;;  %v11633_v12 = vld [vmem:[#allocation19_spill] sm:$0xff] }
 0x2c1   :  { %v6107_v9 = vpop.f32.mrf.mxu0  ;;  %v6494_v53 = vadd.f32 %v10805_v4, %v6316_v44  ;;  %v6209_v63 = vrot.slane %v11128_v16, 7  ;;  %v5604_v55 = vrot.slane %v11141_v29, 6  ;;  %v6207_v25 = vrot.slane %v11143_v62, 7 }
 0x2c2   :  { %v8570_v13 = vpop.eup %8569  ;;  %8581 = vtanh.f32 %v6491_v52  ;;  %v6314_v35 = vadd.f32 %v6241_v46, %v5712_v54  ;;  %v6315_v18 = vadd.f32 %v6240_v3, %v5713_v17  ;;  %v5607_v60 = vrot.slane %v11152_v61, 6  ;;  %v11172_v31 = vpop.f32.mrf.mxu1  ;;  %v11634_v61 = vld [vmem:[#allocation18_spill] sm:$0xff] }
 0x2c3   :  { %v11174_v49 = vpop.f32.mrf.mxu0  ;;  %v8572_v11 = vpop.eup %8571  ;;  %v7326_v48 = vpack.c.bf16 %v8570_v13, %v8566_v58  ;;  %8583 = vtanh.f32 %v6494_v53  ;;  %v5636_v57 = vsel %vm5620_vm5, %v5603_v42, %v5604_v55  ;;  %v6238_v0 = vsel %vm3321_vm3, %v6206_v56, %v6207_v25 }
 0x2c4   :  { %v7331_v34 = vpack.c.bf16 %v8568_v45, %v8572_v11  ;;  %v6492_v22 = vadd.f32 %v10805_v4, %v6314_v35  ;;  %v6493_v39 = vadd.f32 %v10805_v4, %v6315_v18  ;;  %v5715_v7 = vadd.f32 %v5636_v57, %v11632_v30  ;;  %v11183_v16 = vpop.f32.mrf.mxu1 }
 0x2c5   :  { %v11185_v10 = vpop.f32.mrf.mxu0  ;;  %7410 = vst [vmem:[%s11384_s3 + $0x68] sm:$0xff] %v7326_v48   ;;  %v5633_v42 = vsel %vm5620_vm5, %v5606_v24, %v5607_v60  ;;  %v6210_v1 = vrot.slane %v11154_v43, 7  ;;  %v5605_v28 = vrot.slane %v5504_v32, 6  ;;  %v6208_v33 = vrot.slane %v6107_v9, 7 }
 0x2c6   :  { %v8574_v21 = vpop.eup %8573  ;;  %7411 = vst [vmem:[%s11384_s3 + $0x70] sm:$0xff] %v7331_v34   ;;  %8585 = vtanh.f32 %v6492_v22  ;;  %v6317_v51 = vadd.f32 %v6238_v0, %v5715_v7  ;;  %v5718_v2 = vadd.f32 %v5633_v42, %v10692_v27  ;;  %v5610_v56 = vrot.slane %v11172_v31, 6  ;;  %v11198_v29 = vpop.f32.mrf.mxu1 }
 0x2c7   :  { %v11200_v62 = vpop.f32.mrf.mxu0  ;;  %8587 = vtanh.f32 %v6493_v39  ;;  %v6235_v15 = vsel %vm3321_vm3, %v6209_v63, %v6210_v1  ;;  %v5634_v47 = vsel %vm5620_vm5, %v5605_v28, %v5606_v24  ;;  %v5635_v20 = vsel %vm5620_vm5, %v5604_v55, %v5605_v28 }
 0x2c8   :  { %v8576_v26 = vpop.eup %8575  ;;  %v6495_v58 = vadd.f32 %v10805_v4, %v6317_v51  ;;  %v6320_v27 = vadd.f32 %v6235_v15, %v5718_v2  ;;  %v5716_v14 = vadd.f32 %v5635_v20, %v11633_v12  ;;  %v5717_v43 = vadd.f32 %v5634_v47, %v11634_v61  ;;  %v5520_v45 = vpop.f32.mrf.mxu1  ;;  %v11261_v2 = vld [vmem:[%s11383_s2] ss:$0 sm:$0xff]  ;;  %v11636_v15 = vld [vmem:[#allocation21_spill] sm:$0xff] }
 0x2c9   :  { %v6123_v44 = vpop.f32.mrf.mxu0  ;;  %v6236_v41 = vsel %vm3321_vm3, %v6208_v33, %v6209_v63  ;;  %v6237_v50 = vsel %vm3321_vm3, %v6207_v25, %v6208_v33  ;;  %v6213_v24 = vrot.slane %v11174_v49, 7  ;;  %v5608_v3 = vrot.slane %v11183_v16, 6  ;;  %v11635_v49 = vld [vmem:[#allocation20_spill] sm:$0xff] }
 0x2ca   :  { %v8578_v52 = vpop.eup %8577  ;;  %8589 = vtanh.f32 %v6495_v58  ;;  %v6498_v59 = vadd.f32 %v10805_v4, %v6320_v27  ;;  %v6318_v54 = vadd.f32 %v6237_v50, %v5716_v14  ;;  %v6319_v36 = vadd.f32 %v6236_v41, %v5717_v43  ;;  %v11218_v17 = vpop.f32.mrf.mxu1 }
 0x2cb   :  { %v11220_v46 = vpop.f32.mrf.mxu0  ;;  %v8580_v32 = vpop.eup %8579  ;;  %v7336_v9 = vpack.c.bf16 %v8578_v52, %v8574_v21  ;;  %v5632_v53 = vsel %vm5620_vm5, %v5607_v60, %v5608_v3  ;;  %v6211_v63 = vrot.slane %v11185_v10, 7  ;;  %v5611_v55 = vrot.slane %v11198_v29, 6 }
 0x2cc   :  { %v7341_v25 = vpack.c.bf16 %v8576_v26, %v8580_v32  ;;  %8591 = vtanh.f32 %v6498_v59  ;;  %v6496_v13 = vadd.f32 %v10805_v4, %v6318_v54  ;;  %v6497_v35 = vadd.f32 %v10805_v4, %v6319_v36  ;;  %v11228_v18 = vpop.f32.mrf.mxu1  ;;  %v11637_v54 = vld [vmem:[#allocation26_spill] sm:$0xff] }
 0x2cd   :  { %v11230_v31 = vpop.f32.mrf.mxu0  ;;  %7412 = vst [vmem:[%s11384_s3 + $0x78] sm:$0xff] %v7336_v9   ;;  %v5719_v60 = vadd.f32 %v5632_v53, %v11635_v49  ;;  %v6234_v11 = vsel %vm3321_vm3, %v6210_v1, %v6211_v63  ;;  %v5629_v48 = vsel %vm5620_vm5, %v5610_v56, %v5611_v55  ;;  %v6214_v57 = vrot.slane %v11200_v62, 7 }
 0x2ce   :  { %7413 = vst [vmem:[%s11384_s3 + $0x80] sm:$0xff] %v7341_v25   ;;  %8593 = vtanh.f32 %v6496_v13  ;;  %v5722_v4 = vadd.f32 %v5629_v48, %v10720_v5  ;;  %v5609_v0 = vrot.slane %v5520_v45, 6  ;;  %v6212_v34 = vrot.slane %v6123_v44, 7  ;;  %v11245_v22 = vpop.f32.mrf.mxu1 }
 0x2cf   :  { %v11247_v39 = vpop.f32.mrf.mxu0  ;;  %v8582_v30 = vpop.eup %8581  ;;  %8595 = vtanh.f32 %v6497_v35  ;;  %v6321_v7 = vadd.f32 %v6234_v11, %v5719_v60  ;;  %v6231_v16 = vsel %vm3321_vm3, %v6213_v24, %v6214_v57  ;;  %v5614_v10 = vrot.slane %v11218_v17, 6 }
 0x2d0   :  { %v8584_v42 = vpop.eup %8583  ;;  %v6324_v1 = vadd.f32 %v6231_v16, %v5722_v4  ;;  %v5630_v28 = vsel %vm5620_vm5, %v5609_v0, %v5610_v56  ;;  %v5631_v5 = vsel %vm5620_vm5, %v5608_v3, %v5609_v0  ;;  %v6232_v33 = vsel %vm3321_vm3, %v6212_v34, %v6213_v24  ;;  %v5536_v21 = vpop.f32.mrf.mxu1 }
 0x2d1   :  { %v6139_v51 = vpop.f32.mrf.mxu0  ;;  %v6499_v29 = vadd.f32 %v11261_v2, %v6321_v7  ;;  %v5720_v62 = vadd.f32 %v5631_v5, %v10716_v19  ;;  %v5721_v47 = vadd.f32 %v5630_v28, %v11636_v15  ;;  %v6233_v56 = vsel %vm3321_vm3, %v6211_v63, %v6212_v34  ;;  %v11638_v15 = vld [vmem:[#allocation23_spill] sm:$0xff] }
 0x2d2   :  { %v6502_v20 = vadd.f32 %v11261_v2, %v6324_v1  ;;  %v6217_v26 = vrot.slane %v11220_v46, 7  ;;  %v5612_v58 = vrot.slane %v11228_v18, 6  ;;  %v6215_v27 = vrot.slane %v11230_v31, 7  ;;  %v11272_v12 = vpop.f32.mrf.mxu1 }
 0x2d3   :  { %v11274_v14 = vpop.f32.mrf.mxu0  ;;  %v8586_v61 = vpop.eup %8585  ;;  %8597 = vtanh.f32 %v6499_v29  ;;  %v6322_v19 = vadd.f32 %v6233_v56, %v5720_v62  ;;  %v6323_v43 = vadd.f32 %v6232_v33, %v5721_v47  ;;  %v5615_v45 = vrot.slane %v11245_v22, 6 }
 0x2d4   :  { %v8588_v44 = vpop.eup %8587  ;;  %v7346_v41 = vpack.c.bf16 %v8586_v61, %v8582_v30  ;;  %8599 = vtanh.f32 %v6502_v20  ;;  %v5628_v50 = vsel %vm5620_vm5, %v5611_v55, %v5612_v58  ;;  %v6230_v24 = vsel %vm3321_vm3, %v6214_v57, %v6215_v27  ;;  %v11284_v17 = vpop.f32.mrf.mxu1  ;;  %v11642_v61 = vld [vmem:[#allocation27_spill] sm:$0xff] }
 0x2d5   :  { %v7351_v3 = vpack.c.bf16 %v8584_v42, %v8588_v44  ;;  %v6500_v52 = vadd.f32 %v11261_v2, %v6322_v19  ;;  %v6501_v59 = vadd.f32 %v11261_v2, %v6323_v43  ;;  %v5723_v36 = vadd.f32 %v5628_v50, %v11637_v54  ;;  %v11286_v46 = vpop.f32.mrf.mxu0 }
 0x2d6   :  { %7414 = vst [vmem:[%s11384_s3 + $0x88] sm:$0xff] %v7346_v41   ;;  %v5625_v32 = vsel %vm5620_vm5, %v5614_v10, %v5615_v45  ;;  %v6218_v9 = vrot.slane %v11247_v39, 7  ;;  %v5613_v53 = vrot.slane %v5536_v21, 6  ;;  %v6216_v63 = vrot.slane %v6139_v51, 7  ;;  %v8324_v4 = vpop.f32.mrf.mxu1 }
 0x2d7   :  { %v8590_v55 = vpop.eup %8589  ;;  %7415 = vst [vmem:[%s11384_s3 + $0x90] sm:$0xff] %v7351_v3   ;;  %8601 = vtanh.f32 %v6500_v52  ;;  %v6325_v25 = vadd.f32 %v6230_v24, %v5723_v36  ;;  %v5726_v13 = vadd.f32 %v5625_v32, %v10748_v37  ;;  %v5618_v35 = vrot.slane %v11272_v12, 6  ;;  %v8396_v0 = vpop.f32.mrf.mxu0  ;;  %v11641_v12 = vld [vmem:[#allocation42_spill] sm:$0xff] }
 0x2d8   :  { %8603 = vtanh.f32 %v6501_v59  ;;  %v6227_v18 = vsel %vm3321_vm3, %v6217_v26, %v6218_v9  ;;  %v5626_v31 = vsel %vm5620_vm5, %v5613_v53, %v5614_v10  ;;  %v5627_v49 = vsel %vm5620_vm5, %v5612_v58, %v5613_v53  ;;  %v5552_v29 = vpop.f32.mrf.mxu1  ;;  %v11644_v53 = vld [vmem:[#allocation41_spill] sm:$0xff] }
 0x2d9   :  { %v8592_v60 = vpop.eup %8591  ;;  %v6503_v11 = vadd.f32 %v11261_v2, %v6325_v25  ;;  %v6328_v48 = vadd.f32 %v6227_v18, %v5726_v13  ;;  %v5724_v57 = vadd.f32 %v5627_v49, %v10744_v6  ;;  %v5725_v37 = vadd.f32 %v5626_v31, %v10746_v40  ;;  %v6155_v62 = vpop.f32.mrf.mxu0  ;;  %v11645_v13 = vld [vmem:[#allocation24_spill] sm:$0xff] }
 0x2da   :  { %v6228_v34 = vsel %vm3321_vm3, %v6216_v63, %v6217_v26  ;;  %v6229_v22 = vsel %vm3321_vm3, %v6215_v27, %v6216_v63  ;;  %v6221_v39 = vrot.slane %v11274_v14, 7  ;;  %v5616_v30 = vrot.slane %v11284_v17, 6  ;;  %v11639_v26 = vld [vmem:[#allocation22_spill] sm:$0xff] }
 0x2db   :  { %v8594_v7 = vpop.eup %8593  ;;  %8605 = vtanh.f32 %v6503_v11  ;;  %v6506_v16 = vadd.f32 %v11261_v2, %v6328_v48  ;;  %v6326_v10 = vadd.f32 %v6229_v22, %v5724_v57  ;;  %v6327_v6 = vadd.f32 %v6228_v34, %v5725_v37 }
 0x2dc   :  { %v8596_v42 = vpop.eup %8595  ;;  %v7356_v40 = vpack.c.bf16 %v8594_v7, %v8590_v55  ;;  %v5624_v1 = vsel %vm5620_vm5, %v5615_v45, %v5616_v30  ;;  %v6219_v28 = vrot.slane %v11286_v46, 7  ;;  %v5619_v5 = vrot.slane %v8324_v4, 6 }
 0x2dd   :  { %v7361_v33 = vpack.c.bf16 %v8592_v60, %v8596_v42  ;;  %8607 = vtanh.f32 %v6506_v16  ;;  %v6504_v21 = vadd.f32 %v11261_v2, %v6326_v10  ;;  %v6505_v51 = vadd.f32 %v11261_v2, %v6327_v6 }
 0x2de   :  { %7416 = vst [vmem:[%s11384_s3 + $0x98] sm:$0xff] %v7356_v40   ;;  %v5727_v47 = vadd.f32 %v5624_v1, %v11638_v15  ;;  %v6226_v56 = vsel %vm3321_vm3, %v6218_v9, %v6219_v28  ;;  %v5621_v20 = vsel %vm5620_vm5, %v5618_v35, %v5619_v5  ;;  %v11640_v58 = vrot.slane %v11639_v26, 6 }
 0x2df   :  { %7417 = vst [vmem:[%s11384_s3 + $0xa0] sm:$0xff] %v7361_v33   ;;  %8609 = vtanh.f32 %v6504_v21  ;;  %v5730_v14 = vadd.f32 %v5621_v20, %v11641_v12  ;;  %v6222_v43 = vrot.slane %v8396_v0, 7  ;;  %v5617_v41 = vrot.slane %v5552_v29, 6 }
 0x2e0   :  { %v5676_v27 = vsel %vm5620_vm5, %v5619_v5, %v11640_v58  ;;  %v8598_v45 = vpop.eup %8597  ;;  %8611 = vtanh.f32 %v6505_v51  ;;  %v6329_v44 = vadd.f32 %v6226_v56, %v5727_v47  ;;  %v6220_v50 = vrot.slane %v6155_v62, 7 }
 0x2e1   :  { %v5731_v19 = vadd.f32 %v5676_v27, %v11642_v61  ;;  %v8600_v24 = vpop.eup %8599  ;;  %v6512_v3 = vadd.f32 %v11261_v2, %v10821_v8  ;;  %v6223_v52 = vsel %vm3321_vm3, %v6221_v39, %v6222_v43  ;;  %v6278_v54 = vsel %vm3321_vm3, %v6222_v43, %v6167_v38 }
 0x2e2   :  { %v6507_v36 = vadd.f32 %v11261_v2, %v6329_v44  ;;  %v6332_v17 = vadd.f32 %v6223_v52, %v5730_v14  ;;  %v5622_v32 = vsel %vm5620_vm5, %v5617_v41, %v5618_v35  ;;  %v5623_v9 = vsel %vm5620_vm5, %v5616_v30, %v5617_v41 }
 0x2e3   :  { %v6333_v46 = vadd.f32 %v6278_v54, %v5731_v19  ;;  %v5729_v8 = vadd.f32 %v5622_v32, %v11644_v53  ;;  %v5728_v18 = vadd.f32 %v5623_v9, %v11645_v13  ;;  %v6224_v38 = vsel %vm3321_vm3, %v6220_v50, %v6221_v39 }
 0x2e4   :  { %v8602_v63 = vpop.eup %8601  ;;  %v6510_v55 = vadd.f32 %v11261_v2, %v6332_v17  ;;  %8613 = vtanh.f32 %v6512_v3  ;;  %v6225_v35 = vsel %vm3321_vm3, %v6219_v28, %v6220_v50 }
 0x2e5   :  { %v6511_v25 = vadd.f32 %v11261_v2, %v6333_v46  ;;  %v8604_v31 = vpop.eup %8603  ;;  %v7366_v49 = vpack.c.bf16 %v8602_v63, %v8598_v45  ;;  %v6331_v60 = vadd.f32 %v6224_v38, %v5729_v8  ;;  %8615 = vtanh.f32 %v6507_v36 }
 0x2e6   :  { %v7371_v11 = vpack.c.bf16 %v8600_v24, %v8604_v31  ;;  %v6330_v48 = vadd.f32 %v6225_v35, %v5728_v18 }
 0x2e7   :  { %7418 = vst [vmem:[%s11384_s3 + $0xa8] sm:$0xff] %v7366_v49   ;;  %8617 = vtanh.f32 %v6511_v25  ;;  %v6509_v57 = vadd.f32 %v11261_v2, %v6331_v60 }
 0x2e8   :  { %v8606_v37 = vpop.eup %8605  ;;  %7419 = vst [vmem:[%s11384_s3 + $0xb0] sm:$0xff] %v7371_v11   ;;  %8619 = vtanh.f32 %v6510_v55  ;;  %v6508_v23 = vadd.f32 %v11261_v2, %v6330_v48 }
 0x2e9   :  { %8621 = vtanh.f32 %v6509_v57 }
 0x2ea   :  { %v8608_v4 = vpop.eup %8607  ;;  %8623 = vtanh.f32 %v6508_v23 }
 0x2ec   :  { %v8610_v0 = vpop.eup %8609 }
 0x2ed   :  { %v8612_v34 = vpop.eup %8611  ;;  %v7376_v22 = vpack.c.bf16 %v8610_v0, %v8606_v37 }
 0x2ee   :  { %v7381_v39 = vpack.c.bf16 %v8608_v4, %v8612_v34 }
 0x2ef   :  { %7420 = vst [vmem:[%s11384_s3 + $0xb8] sm:$0xff] %v7376_v22  }
 0x2f0   :  { %7421 = vst [vmem:[%s11384_s3 + $0xc0] sm:$0xff] %v7381_v39  }
 0x2f1   :  { %v8614_v30 = vpop.eup %8613 }
 0x2f2   :  { %v8616_v7 = vpop.eup %8615 }
 0x2f4   :  { %v8618_v16 = vpop.eup %8617 }
 0x2f5   :  { %v8620_v10 = vpop.eup %8619  ;;  %v7396_v2 = vpack.c.bf16 %v8614_v30, %v8618_v16 }
 0x2f6   :  { %v8622_v6 = vpop.eup %8621 }
 0x2f7   :  { %v8624_v42 = vpop.eup %8623  ;;  %7424 = vst [vmem:[%s11384_s3 + $0xd8] sm:$0xff] %v7396_v2   ;;  %v7391_v40 = vpack.c.bf16 %v8620_v10, %v8622_v6 }
 0x2f8   :  { %v7386_v1 = vpack.c.bf16 %v8624_v42, %v8616_v7 }
 0x2f9   :  { %7423 = vst [vmem:[%s11384_s3 + $0xd0] sm:$0xff] %v7391_v40  }
 0x2fa   :  { %7422 = vst [vmem:[%s11384_s3 + $0xc8] sm:$0xff] %v7386_v1  }

// kernel: ppm_deepsup_forward.7
= control target key start
LH: loop header
LB: loop body
LE: loop exit
PB: predicated region body
PF: predicated region fallthrough
CT: control target
= control target key end

     0   :  { %s2413_s1 = inlined_call_operand.vmem [shape: bf16[128,128], index: 1, kind: input, shape index: {}]   ;;  %s2414_s0 = inlined_call_operand.vmem [shape: bf16[448,128], index: 0, kind: input, shape index: {}]   ;;  %s2415_s2 = inlined_call_operand.vmem [shape: f32[1,128], index: 2, kind: input, shape index: {}]   ;;  %s2416_s3 = inlined_call_operand.vmem [shape: f32[448,128], index: 3, kind: output, shape index: {}]  }
   0x1   :  { %v1348_v0 = vld [vmem:[%s2413_s1 + $0x38] sm:$0xff]   ;;  %v1349_v1 = vld [vmem:[%s2413_s1 + $0x30] sm:$0xff]   ;;  %v1350_v2 = vld [vmem:[%s2413_s1 + $0x28] sm:$0xff]  }
   0x2   :  { %1260 = vmatprep.subr.bf16.mxu0 %v1348_v0  ;;  %1332 = vmatprep.subr.bf16.mxu1 %v1348_v0  ;;  %v1351_v3 = vld [vmem:[%s2413_s1 + $0x20] sm:$0xff]   ;;  %v1357_v5 = vld [vmem:[%s2414_s0 + $0x70] sm:$0xff]   ;;  %v1352_v6 = vld [vmem:[%s2413_s1 + $0x18] sm:$0xff]  }
   0x3   :  { %1261 = vmatpush3.bf16.msra.mxu0 %v1348_v0  ;;  %1340 = vmatpush3.bf16.msra.mxu1 %v1348_v0  ;;  %v1356_v4 = vld [vmem:[%s2414_s0] sm:$0xff]   ;;  %v1353_v7 = vld [vmem:[%s2413_s1 + $0x10] sm:$0xff]   ;;  %v1354_v8 = vld [vmem:[%s2413_s1 + $0x8] sm:$0xff]  }
   0x4   :  { %1262 = vmatprep.subr.bf16.mxu0 %v1349_v1  ;;  %1333 = vmatprep.subr.bf16.mxu1 %v1349_v1  ;;  %v1355_v9 = vld [vmem:[%s2413_s1] sm:$0xff]   ;;  %v1358_v10 = vld [vmem:[%s2414_s0 + $0x8] sm:$0xff]   ;;  %v1359_v11 = vld [vmem:[%s2414_s0 + $0x78] sm:$0xff]  }
   0x5   :  { %1276 = vmatprep.mubr.bf16.mxu0 %v1356_v4  ;;  %1304 = vmatprep.mubr.bf16.mxu1 %v1357_v5  ;;  %v1360_v12 = vld [vmem:[%s2414_s0 + $0x10] sm:$0xff]   ;;  %v1362_v13 = vld [vmem:[%s2414_s0 + $0x80] sm:$0xff]   ;;  %v1361_v14 = vld [vmem:[%s2414_s0 + $0x18] sm:$0xff]  }
   0x6   :  { %v1363_v15 = vld [vmem:[%s2414_s0 + $0x88] sm:$0xff]   ;;  %v1364_v16 = vld [vmem:[%s2414_s0 + $0x20] sm:$0xff]   ;;  %v1366_v17 = vld [vmem:[%s2414_s0 + $0x90] sm:$0xff]  }
   0x7   :  { %1263 = vmatpush3.bf16.msra.mxu0 %v1349_v1  ;;  %1341 = vmatpush3.bf16.msra.mxu1 %v1349_v1  ;;  %v1365_v18 = vld [vmem:[%s2414_s0 + $0x28] sm:$0xff]   ;;  %v1367_v19 = vld [vmem:[%s2414_s0 + $0x98] sm:$0xff]   ;;  %v1368_v20 = vld [vmem:[%s2414_s0 + $0x30] sm:$0xff]  }
   0x8   :  { %1264 = vmatprep.subr.bf16.mxu0 %v1350_v2  ;;  %1334 = vmatprep.subr.bf16.mxu1 %v1350_v2  ;;  %v1370_v21 = vld [vmem:[%s2414_s0 + $0xa0] sm:$0xff]   ;;  %v1369_v22 = vld [vmem:[%s2414_s0 + $0x38] sm:$0xff]   ;;  %v1371_v23 = vld [vmem:[%s2414_s0 + $0xa8] sm:$0xff]  }
   0x9   :  { %v1372_v24 = vld [vmem:[%s2414_s0 + $0x40] sm:$0xff]   ;;  %v1374_v25 = vld [vmem:[%s2414_s0 + $0xb0] sm:$0xff]   ;;  %v1373_v26 = vld [vmem:[%s2414_s0 + $0x48] sm:$0xff]  }
   0xa   :  { %v1375_v27 = vld [vmem:[%s2414_s0 + $0xb8] sm:$0xff]   ;;  %v1376_v28 = vld [vmem:[%s2414_s0 + $0x50] sm:$0xff]   ;;  %v1378_v29 = vld [vmem:[%s2414_s0 + $0xc0] sm:$0xff]  }
   0xb   :  { %1265 = vmatpush3.bf16.msra.mxu0 %v1350_v2  ;;  %1342 = vmatpush3.bf16.msra.mxu1 %v1350_v2  ;;  %v1377_v30 = vld [vmem:[%s2414_s0 + $0x58] sm:$0xff]   ;;  %v1379_v31 = vld [vmem:[%s2414_s0 + $0xc8] sm:$0xff]   ;;  %v1380_v32 = vld [vmem:[%s2414_s0 + $0x60] sm:$0xff]  }
   0xc   :  { %1266 = vmatprep.subr.bf16.mxu0 %v1351_v3  ;;  %1335 = vmatprep.subr.bf16.mxu1 %v1351_v3  ;;  %v1382_v33 = vld [vmem:[%s2414_s0 + $0xd0] sm:$0xff]   ;;  %v1381_v34 = vld [vmem:[%s2414_s0 + $0x68] sm:$0xff]   ;;  %v1383_v35 = vld [vmem:[%s2414_s0 + $0xd8] sm:$0xff]  }
   0xd   :  { %v1739_v36 = vld [vmem:[%s2415_s2] ss:$0 sm:$0xff] }
   0xf   :  { %1267 = vmatpush3.bf16.msra.mxu0 %v1351_v3  ;;  %1343 = vmatpush3.bf16.msra.mxu1 %v1351_v3 }
  0x10   :  { %1268 = vmatprep.subr.bf16.mxu0 %v1352_v6  ;;  %1336 = vmatprep.subr.bf16.mxu1 %v1352_v6 }
  0x13   :  { %1269 = vmatpush3.bf16.msra.mxu0 %v1352_v6  ;;  %1344 = vmatpush3.bf16.msra.mxu1 %v1352_v6 }
  0x14   :  { %1270 = vmatprep.subr.bf16.mxu0 %v1353_v7  ;;  %1337 = vmatprep.subr.bf16.mxu1 %v1353_v7 }
  0x17   :  { %1271 = vmatpush3.bf16.msra.mxu0 %v1353_v7  ;;  %1345 = vmatpush3.bf16.msra.mxu1 %v1353_v7 }
  0x18   :  { %1272 = vmatprep.subr.bf16.mxu0 %v1354_v8  ;;  %1338 = vmatprep.subr.bf16.mxu1 %v1354_v8 }
  0x1b   :  { %1273 = vmatpush3.bf16.msra.mxu0 %v1354_v8  ;;  %1346 = vmatpush3.bf16.msra.mxu1 %v1354_v8 }
  0x1c   :  { %1274 = vmatprep.subr.bf16.mxu0 %v1355_v9  ;;  %1339 = vmatprep.subr.bf16.mxu1 %v1355_v9 }
  0x1f   :  { %1275 = vmatpush3.bf16.msra.mxu0 %v1355_v9  ;;  %1347 = vmatpush3.bf16.msra.mxu1 %v1355_v9 }
  0x22   :  { %1277 = vmatmul.mubr.bf16.vlgmr.msra.gmra.mxu0 %v1358_v10  ;;  %1305 = vmatmul.mubr.bf16.vlgmr.msra.gmra.mxu1 %v1359_v11 }
  0x23   :  { %1280 = vmatprep.mubr.bf16.mxu0 %v1360_v12  ;;  %1308 = vmatprep.mubr.bf16.mxu1 %v1362_v13 }
  0x2a   :  { %1281 = vmatmul.mubr.bf16.gmra.mxu0 %v1361_v14  ;;  %1309 = vmatmul.mubr.bf16.gmra.mxu1 %v1363_v15 }
  0x2b   :  { %1284 = vmatprep.mubr.bf16.mxu0 %v1364_v16  ;;  %1312 = vmatprep.mubr.bf16.mxu1 %v1366_v17 }
  0x32   :  { %1285 = vmatmul.mubr.bf16.gmra.mxu0 %v1365_v18  ;;  %1313 = vmatmul.mubr.bf16.gmra.mxu1 %v1367_v19 }
  0x33   :  { %1288 = vmatprep.mubr.bf16.mxu0 %v1368_v20  ;;  %1316 = vmatprep.mubr.bf16.mxu1 %v1370_v21 }
  0x3a   :  { %1289 = vmatmul.mubr.bf16.gmra.mxu0 %v1369_v22  ;;  %1317 = vmatmul.mubr.bf16.gmra.mxu1 %v1371_v23 }
  0x3b   :  { %1292 = vmatprep.mubr.bf16.mxu0 %v1372_v24  ;;  %1320 = vmatprep.mubr.bf16.mxu1 %v1374_v25 }
  0x42   :  { %1293 = vmatmul.mubr.bf16.gmra.mxu0 %v1373_v26  ;;  %1321 = vmatmul.mubr.bf16.gmra.mxu1 %v1375_v27 }
  0x43   :  { %1296 = vmatprep.mubr.bf16.mxu0 %v1376_v28  ;;  %1324 = vmatprep.mubr.bf16.mxu1 %v1378_v29 }
  0x4a   :  { %1297 = vmatmul.mubr.bf16.gmra.mxu0 %v1377_v30  ;;  %1325 = vmatmul.mubr.bf16.gmra.mxu1 %v1379_v31 }
  0x4b   :  { %1300 = vmatprep.mubr.bf16.mxu0 %v1380_v32  ;;  %1328 = vmatprep.mubr.bf16.mxu1 %v1382_v33 }
  0x52   :  { %1301 = vmatmul.mubr.bf16.gmra.mxu0 %v1381_v34  ;;  %1329 = vmatmul.mubr.bf16.gmra.mxu1 %v1383_v35 }
  0xe2   :  { %v1278_v37 = vpop.f32.mrf.mxu0  ;;  %v1306_v38 = vpop.f32.mrf.mxu1 }
  0xe3   :  { %v1742_v39 = vadd.f32 %v1278_v37, %v1739_v36  ;;  %v1745_v40 = vadd.f32 %v1306_v38, %v1739_v36 }
  0xe4   :  { %v344_v41 = vpop.f32.mrf.mxu0  ;;  %v456_v42 = vpop.f32.mrf.mxu1 }
  0xe5   :  { %627 = vmax.xlane.f32.xlu0 %v1745_v40  ;;  %571 = vmax.xlane.f32.xlu1 %v1742_v39  ;;  %v1750_v44 = vadd.f32 %v1739_v36, %v344_v41  ;;  %v1758_v49 = vadd.f32 %v1739_v36, %v456_v42 }
  0xe6   :  { %v1279_v43 = vpop.f32.mrf.mxu0  ;;  %v1307_v46 = vpop.f32.mrf.mxu1 }
  0xe7   :  { %v1753_v45 = vadd.f32 %v1279_v43, %v1739_v36  ;;  %v1761_v50 = vadd.f32 %v1307_v46, %v1739_v36 }
  0xe8   :  { %v347_v47 = vpop.f32.mrf.mxu0  ;;  %v459_v51 = vpop.f32.mrf.mxu1 }
  0xe9   :  { %573 = vmax.xlane.f32.xlu1 %v1753_v45  ;;  %567 = vmax.xlane.f32.xlu0 %v1750_v44  ;;  %v1766_v54 = vadd.f32 %v1739_v36, %v347_v47  ;;  %v1769_v55 = vadd.f32 %v1739_v36, %v459_v51 }
  0xea   :  { %v1282_v48 = vpop.f32.mrf.mxu0  ;;  %v1310_v53 = vpop.f32.mrf.mxu1 }
  0xeb   :  { %v1774_v58 = vadd.f32 %v1282_v48, %v1739_v36  ;;  %v1782_v61 = vadd.f32 %v1310_v53, %v1739_v36 }
  0xec   :  { %v360_v52 = vpop.f32.mrf.mxu0  ;;  %v472_v57 = vpop.f32.mrf.mxu1 }
  0xed   :  { %629 = vmax.xlane.f32.xlu1 %v1761_v50  ;;  %623 = vmax.xlane.f32.xlu0 %v1758_v49  ;;  %v1790_v1 = vadd.f32 %v1739_v36, %v360_v52  ;;  %v1798_v6 = vadd.f32 %v1739_v36, %v472_v57 }
  0xee   :  { %v1283_v56 = vpop.f32.mrf.mxu0  ;;  %v1311_v60 = vpop.f32.mrf.mxu1 }
  0xef   :  { %v1777_v59 = vadd.f32 %v1283_v56, %v1739_v36  ;;  %v1785_v62 = vadd.f32 %v1311_v60, %v1739_v36 }
  0xf0   :  { %v363_v63 = vpop.f32.mrf.mxu0  ;;  %v475_v3 = vpop.f32.mrf.mxu1 }
  0xf1   :  { %625 = vmax.xlane.f32.xlu1 %v1769_v55  ;;  %569 = vmax.xlane.f32.xlu0 %v1766_v54  ;;  %v1793_v2 = vadd.f32 %v1739_v36, %v363_v63  ;;  %v1801_v7 = vadd.f32 %v1739_v36, %v475_v3 }
  0xf2   :  { %v1286_v0 = vpop.f32.mrf.mxu0  ;;  %v1314_v5 = vpop.f32.mrf.mxu1 }
  0xf3   :  { %v1806_v10 = vadd.f32 %v1286_v0, %v1739_v36  ;;  %v1814_v13 = vadd.f32 %v1314_v5, %v1739_v36 }
  0xf4   :  { %v376_v4 = vpop.f32.mrf.mxu0  ;;  %v488_v9 = vpop.f32.mrf.mxu1 }
  0xf5   :  { %581 = vmax.xlane.f32.xlu1 %v1777_v59  ;;  %579 = vmax.xlane.f32.xlu0 %v1774_v58  ;;  %v1822_v17 = vadd.f32 %v1739_v36, %v376_v4  ;;  %v1830_v22 = vadd.f32 %v1739_v36, %v488_v9 }
  0xf6   :  { %v1287_v8 = vpop.f32.mrf.mxu0  ;;  %v1315_v12 = vpop.f32.mrf.mxu1 }
  0xf7   :  { %v1809_v11 = vadd.f32 %v1287_v8, %v1739_v36  ;;  %v1817_v14 = vadd.f32 %v1315_v12, %v1739_v36 }
  0xf8   :  { %v379_v15 = vpop.f32.mrf.mxu0  ;;  %v491_v19 = vpop.f32.mrf.mxu1 }
  0xf9   :  { %637 = vmax.xlane.f32.xlu1 %v1785_v62  ;;  %635 = vmax.xlane.f32.xlu0 %v1782_v61  ;;  %v1825_v18 = vadd.f32 %v1739_v36, %v379_v15  ;;  %v1833_v23 = vadd.f32 %v1739_v36, %v491_v19 }
  0xfa   :  { %v1290_v16 = vpop.f32.mrf.mxu0  ;;  %v1318_v21 = vpop.f32.mrf.mxu1 }
  0xfb   :  { %v1838_v26 = vadd.f32 %v1290_v16, %v1739_v36  ;;  %v1846_v29 = vadd.f32 %v1318_v21, %v1739_v36 }
  0xfc   :  { %v392_v20 = vpop.f32.mrf.mxu0  ;;  %v504_v25 = vpop.f32.mrf.mxu1 }
  0xfd   :  { %577 = vmax.xlane.f32.xlu1 %v1793_v2  ;;  %575 = vmax.xlane.f32.xlu0 %v1790_v1  ;;  %v1854_v33 = vadd.f32 %v1739_v36, %v392_v20  ;;  %v1862_v41 = vadd.f32 %v1739_v36, %v504_v25 }
  0xfe   :  { %v1291_v24 = vpop.f32.mrf.mxu0  ;;  %v1319_v28 = vpop.f32.mrf.mxu1 }
  0xff   :  { %v1841_v27 = vadd.f32 %v1291_v24, %v1739_v36  ;;  %v1849_v30 = vadd.f32 %v1319_v28, %v1739_v36 }
 0x100   :  { %v395_v31 = vpop.f32.mrf.mxu0  ;;  %v507_v35 = vpop.f32.mrf.mxu1 }
 0x101   :  { %633 = vmax.xlane.f32.xlu1 %v1801_v7  ;;  %631 = vmax.xlane.f32.xlu0 %v1798_v6  ;;  %v1857_v34 = vadd.f32 %v1739_v36, %v395_v31  ;;  %v1865_v42 = vadd.f32 %v1739_v36, %v507_v35 }
 0x102   :  { %v1294_v32 = vpop.f32.mrf.mxu0  ;;  %v1322_v38 = vpop.f32.mrf.mxu1 }
 0x103   :  { %v1870_v47 = vadd.f32 %v1294_v32, %v1739_v36  ;;  %v1878_v52 = vadd.f32 %v1322_v38, %v1739_v36 }
 0x104   :  { %v408_v37 = vpop.f32.mrf.mxu0  ;;  %v520_v46 = vpop.f32.mrf.mxu1 }
 0x105   :  { %589 = vmax.xlane.f32.xlu1 %v1809_v11  ;;  %587 = vmax.xlane.f32.xlu0 %v1806_v10  ;;  %v1886_v60 = vadd.f32 %v1739_v36, %v408_v37  ;;  %v1894_v5 = vadd.f32 %v1739_v36, %v520_v46 }
 0x106   :  { %v1295_v43 = vpop.f32.mrf.mxu0  ;;  %v1323_v51 = vpop.f32.mrf.mxu1 }
 0x107   :  { %v1873_v48 = vadd.f32 %v1295_v43, %v1739_v36  ;;  %v1881_v53 = vadd.f32 %v1323_v51, %v1739_v36 }
 0x108   :  { %v411_v56 = vpop.f32.mrf.mxu0  ;;  %v523_v0 = vpop.f32.mrf.mxu1 }
 0x109   :  { %645 = vmax.xlane.f32.xlu1 %v1817_v14  ;;  %643 = vmax.xlane.f32.xlu0 %v1814_v13  ;;  %v1889_v63 = vadd.f32 %v1739_v36, %v411_v56  ;;  %v1897_v8 = vadd.f32 %v1739_v36, %v523_v0 }
 0x10a   :  { %v1298_v57 = vpop.f32.mrf.mxu0  ;;  %v1326_v4 = vpop.f32.mrf.mxu1 }
 0x10b   :  { %v1902_v15 = vadd.f32 %v1298_v57, %v1739_v36  ;;  %v1910_v20 = vadd.f32 %v1326_v4, %v1739_v36 }
 0x10c   :  { %v424_v3 = vpop.f32.mrf.mxu0  ;;  %v536_v12 = vpop.f32.mrf.mxu1 }
 0x10d   :  { %585 = vmax.xlane.f32.xlu1 %v1825_v18  ;;  %583 = vmax.xlane.f32.xlu0 %v1822_v17  ;;  %v1918_v28 = vadd.f32 %v1739_v36, %v424_v3  ;;  %v1926_v38 = vadd.f32 %v1739_v36, %v536_v12 }
 0x10e   :  { %v1299_v9 = vpop.f32.mrf.mxu0  ;;  %v1327_v19 = vpop.f32.mrf.mxu1 }
 0x10f   :  { %v1905_v16 = vadd.f32 %v1299_v9, %v1739_v36  ;;  %v1913_v21 = vadd.f32 %v1327_v19, %v1739_v36 }
 0x110   :  { %v427_v24 = vpop.f32.mrf.mxu0  ;;  %v539_v32 = vpop.f32.mrf.mxu1 }
 0x111   :  { %641 = vmax.xlane.f32.xlu1 %v1833_v23  ;;  %639 = vmax.xlane.f32.xlu0 %v1830_v22  ;;  %v1921_v31 = vadd.f32 %v1739_v36, %v427_v24  ;;  %v1929_v43 = vadd.f32 %v1739_v36, %v539_v32 }
 0x112   :  { %v1302_v25 = vpop.f32.mrf.mxu0  ;;  %v1330_v37 = vpop.f32.mrf.mxu1 }
 0x113   :  { %v1934_v56 = vadd.f32 %v1302_v25, %v1739_v36  ;;  %v1942_v3 = vadd.f32 %v1330_v37, %v1739_v36 }
 0x114   :  { %v440_v35 = vpop.f32.mrf.mxu0  ;;  %v552_v51 = vpop.f32.mrf.mxu1 }
 0x115   :  { %597 = vmax.xlane.f32.xlu1 %v1841_v27  ;;  %595 = vmax.xlane.f32.xlu0 %v1838_v26  ;;  %2427 = vst [vmem:[#allocation2_spill] sm:$0xff] %v1942_v3  ;;  %v1950_v12 = vadd.f32 %v1739_v36, %v440_v35  ;;  %v1958_v25 = vadd.f32 %v1739_v36, %v552_v51 }
 0x116   :  { %v1303_v46 = vpop.f32.mrf.mxu0  ;;  %v1331_v0 = vpop.f32.mrf.mxu1 }
 0x117   :  { %v1937_v57 = vadd.f32 %v1303_v46, %v1739_v36  ;;  %v1945_v4 = vadd.f32 %v1331_v0, %v1739_v36  ;;  %2429 = vst [vmem:[#allocation4_spill] sm:$0xff] %v1958_v25 }
 0x118   :  { %v443_v9 = vpop.f32.mrf.mxu0  ;;  %v555_v24 = vpop.f32.mrf.mxu1 }
 0x119   :  { %653 = vmax.xlane.f32.xlu1 %v1849_v30  ;;  %651 = vmax.xlane.f32.xlu0 %v1846_v29  ;;  %2428 = vst [vmem:[#allocation3_spill] sm:$0xff] %v1945_v4  ;;  %v1953_v19 = vadd.f32 %v1739_v36, %v443_v9  ;;  %v1961_v32 = vadd.f32 %v1739_v36, %v555_v24 }
 0x11d   :  { %593 = vmax.xlane.f32.xlu1 %v1857_v34  ;;  %591 = vmax.xlane.f32.xlu0 %v1854_v33 }
 0x121   :  { %649 = vmax.xlane.f32.xlu1 %v1865_v42  ;;  %647 = vmax.xlane.f32.xlu0 %v1862_v41 }
 0x125   :  { %605 = vmax.xlane.f32.xlu1 %v1873_v48  ;;  %603 = vmax.xlane.f32.xlu0 %v1870_v47 }
 0x129   :  { %661 = vmax.xlane.f32.xlu1 %v1881_v53  ;;  %659 = vmax.xlane.f32.xlu0 %v1878_v52 }
 0x12d   :  { %601 = vmax.xlane.f32.xlu1 %v1889_v63  ;;  %599 = vmax.xlane.f32.xlu0 %v1886_v60 }
 0x131   :  { %657 = vmax.xlane.f32.xlu1 %v1897_v8  ;;  %655 = vmax.xlane.f32.xlu0 %v1894_v5 }
 0x135   :  { %613 = vmax.xlane.f32.xlu1 %v1905_v16  ;;  %611 = vmax.xlane.f32.xlu0 %v1902_v15 }
 0x139   :  { %669 = vmax.xlane.f32.xlu1 %v1913_v21  ;;  %667 = vmax.xlane.f32.xlu0 %v1910_v20 }
 0x13d   :  { %609 = vmax.xlane.f32.xlu1 %v1921_v31  ;;  %607 = vmax.xlane.f32.xlu0 %v1918_v28 }
 0x141   :  { %665 = vmax.xlane.f32.xlu1 %v1929_v43  ;;  %663 = vmax.xlane.f32.xlu0 %v1926_v38 }
 0x145   :  { %621 = vmax.xlane.f32.xlu1 %v1937_v57  ;;  %619 = vmax.xlane.f32.xlu0 %v1934_v56 }
 0x149   :  { %677 = vmax.xlane.f32.xlu1 %v1945_v4  ;;  %675 = vmax.xlane.f32.xlu0 %v1942_v3 }
 0x14d   :  { %617 = vmax.xlane.f32.xlu1 %v1953_v19  ;;  %615 = vmax.xlane.f32.xlu0 %v1950_v12 }
 0x151   :  { %673 = vmax.xlane.f32.xlu1 %v1961_v32  ;;  %671 = vmax.xlane.f32.xlu0 %v1958_v25 }
 0x16e   :  { %v628_v35 = vpop.xlane.xlu0 %627  ;;  %v572_v37 = vpop.xlane.xlu1 %571 }
 0x16f   :  { %v1966_v46 = vsub.f32 %v1742_v39, %v572_v37  ;;  %v1969_v0 = vsub.f32 %v1745_v40, %v628_v35 }
 0x171   :  { %2430 = vst [vmem:[#allocation5_spill] sm:$0xff] %v1969_v0  ;;  %v739_v9 = vmul.f32 1.442695, %v1966_v46  ;;  %v795_v36 = vmul.f32 1.442695, %v1969_v0 }
 0x172   :  { %v574_v3 = vpop.xlane.xlu1 %573  ;;  %v568_v51 = vpop.xlane.xlu0 %567 }
 0x173   :  { %v1973_v4 = vsub.f32 %v1753_v45, %v574_v3  ;;  %1384 = vpow2.f32 %v739_v9  ;;  %v1977_v24 = vsub.f32 %v1750_v44, %v568_v51 }
 0x175   :  { %v741_v25 = vmul.f32 1.442695, %v1973_v4  ;;  %v735_v45 = vmul.f32 1.442695, %v1977_v24 }
 0x176   :  { %v630_v39 = vpop.xlane.xlu1 %629  ;;  %v624_v37 = vpop.xlane.xlu0 %623 }
 0x177   :  { %1386 = vpow2.f32 %v741_v25  ;;  %v1981_v40 = vsub.f32 %v1761_v50, %v630_v39  ;;  %v1984_v35 = vsub.f32 %v1758_v49, %v624_v37 }
 0x178   :  { %1388 = vpow2.f32 %v795_v36 }
 0x179   :  { %v797_v3 = vmul.f32 1.442695, %v1981_v40  ;;  %v791_v44 = vmul.f32 1.442695, %v1984_v35 }
 0x17a   :  { %v626_v9 = vpop.xlane.xlu1 %625  ;;  %v570_v0 = vpop.xlane.xlu0 %569 }
 0x17b   :  { %1390 = vpow2.f32 %v797_v3  ;;  %v1990_v51 = vsub.f32 %v1769_v55, %v626_v9  ;;  %v1993_v25 = vsub.f32 %v1766_v54, %v570_v0 }
 0x17c   :  { %1392 = vpow2.f32 %v735_v45 }
 0x17d   :  { %2431 = vst [vmem:[#allocation6_spill] sm:$0xff] %v1990_v51  ;;  %v737_v49 = vmul.f32 1.442695, %v1993_v25  ;;  %1394 = vpow2.f32 %v791_v44  ;;  %v793_v39 = vmul.f32 1.442695, %v1990_v51 }
 0x17e   :  { %v582_v50 = vpop.xlane.xlu1 %581  ;;  %v580_v36 = vpop.xlane.xlu0 %579 }
 0x17f   :  { %v1998_v37 = vsub.f32 %v1777_v59, %v582_v50  ;;  %v2001_v3 = vsub.f32 %v1774_v58, %v580_v36  ;;  %1396 = vpow2.f32 %v737_v49 }
 0x180   :  { %v1385_v55 = vpop.eup %1384  ;;  %1398 = vpow2.f32 %v793_v39 }
 0x181   :  { %v747_v9 = vmul.f32 1.442695, %v2001_v3  ;;  %851 = vadd.xlane.f32.xlu0 %v1385_v55  ;;  %v749_v45 = vmul.f32 1.442695, %v1998_v37 }
 0x182   :  { %v638_v54 = vpop.xlane.xlu1 %637  ;;  %v636_v0 = vpop.xlane.xlu0 %635 }
 0x183   :  { %v2006_v44 = vsub.f32 %v1785_v62, %v638_v54  ;;  %v2009_v51 = vsub.f32 %v1782_v61, %v636_v0  ;;  %1400 = vpow2.f32 %v747_v9 }
 0x184   :  { %v1387_v59 = vpop.eup %1386  ;;  %1402 = vpow2.f32 %v749_v45 }
 0x185   :  { %v1389_v58 = vpop.eup %1388  ;;  %v803_v49 = vmul.f32 1.442695, %v2009_v51  ;;  %853 = vadd.xlane.f32.xlu1 %v1387_v59  ;;  %v805_v39 = vmul.f32 1.442695, %v2006_v44 }
 0x186   :  { %907 = vadd.xlane.f32.xlu0 %v1389_v58  ;;  %v578_v50 = vpop.xlane.xlu1 %577  ;;  %v576_v36 = vpop.xlane.xlu0 %575 }
 0x187   :  { %v2014_v55 = vsub.f32 %v1793_v2, %v578_v50  ;;  %v2017_v62 = vsub.f32 %v1790_v1, %v576_v36  ;;  %1404 = vpow2.f32 %v803_v49 }
 0x188   :  { %v1391_v61 = vpop.eup %1390  ;;  %1406 = vpow2.f32 %v805_v39 }
 0x189   :  { %v1393_v54 = vpop.eup %1392  ;;  %v743_v9 = vmul.f32 1.442695, %v2017_v62  ;;  %909 = vadd.xlane.f32.xlu1 %v1391_v61  ;;  %v745_v45 = vmul.f32 1.442695, %v2014_v55 }
 0x18a   :  { %847 = vadd.xlane.f32.xlu0 %v1393_v54  ;;  %v634_v0 = vpop.xlane.xlu1 %633  ;;  %v632_v59 = vpop.xlane.xlu0 %631 }
 0x18b   :  { %v2022_v58 = vsub.f32 %v1801_v7, %v634_v0  ;;  %v2025_v2 = vsub.f32 %v1798_v6, %v632_v59  ;;  %v1395_v1 = vpop.eup %1394  ;;  %1408 = vpow2.f32 %v743_v9 }
 0x18c   :  { %v1397_v50 = vpop.eup %1396  ;;  %1410 = vpow2.f32 %v745_v45 }
 0x18d   :  { %v799_v49 = vmul.f32 1.442695, %v2025_v2  ;;  %849 = vadd.xlane.f32.xlu1 %v1397_v50  ;;  %v801_v39 = vmul.f32 1.442695, %v2022_v58  ;;  %v1399_v6 = vpop.eup %1398 }
 0x18e   :  { %903 = vadd.xlane.f32.xlu0 %v1395_v1  ;;  %v590_v36 = vpop.xlane.xlu1 %589  ;;  %v588_v61 = vpop.xlane.xlu0 %587 }
 0x18f   :  { %v2030_v54 = vsub.f32 %v1809_v11, %v590_v36  ;;  %v2033_v7 = vsub.f32 %v1806_v10, %v588_v61  ;;  %1412 = vpow2.f32 %v799_v49 }
 0x190   :  { %v1401_v0 = vpop.eup %1400  ;;  %1414 = vpow2.f32 %v801_v39 }
 0x191   :  { %v755_v9 = vmul.f32 1.442695, %v2033_v7  ;;  %905 = vadd.xlane.f32.xlu1 %v1399_v6  ;;  %v757_v45 = vmul.f32 1.442695, %v2030_v54  ;;  %v1403_v10 = vpop.eup %1402 }
 0x192   :  { %859 = vadd.xlane.f32.xlu0 %v1401_v0  ;;  %v646_v59 = vpop.xlane.xlu1 %645  ;;  %v644_v1 = vpop.xlane.xlu0 %643 }
 0x193   :  { %v2038_v50 = vsub.f32 %v1817_v14, %v646_v59  ;;  %v2041_v11 = vsub.f32 %v1814_v13, %v644_v1  ;;  %1416 = vpow2.f32 %v755_v9 }
 0x194   :  { %v1405_v36 = vpop.eup %1404  ;;  %1418 = vpow2.f32 %v757_v45 }
 0x195   :  { %v811_v49 = vmul.f32 1.442695, %v2041_v11  ;;  %861 = vadd.xlane.f32.xlu1 %v1403_v10  ;;  %v813_v39 = vmul.f32 1.442695, %v2038_v50  ;;  %v1407_v13 = vpop.eup %1406 }
 0x196   :  { %915 = vadd.xlane.f32.xlu0 %v1405_v36  ;;  %v586_v61 = vpop.xlane.xlu1 %585  ;;  %v584_v6 = vpop.xlane.xlu0 %583 }
 0x197   :  { %v2046_v0 = vsub.f32 %v1825_v18, %v586_v61  ;;  %v2049_v14 = vsub.f32 %v1822_v17, %v584_v6  ;;  %1420 = vpow2.f32 %v811_v49 }
 0x198   :  { %v1409_v59 = vpop.eup %1408  ;;  %1422 = vpow2.f32 %v813_v39 }
 0x199   :  { %v751_v9 = vmul.f32 1.442695, %v2049_v14  ;;  %917 = vadd.xlane.f32.xlu1 %v1407_v13  ;;  %v753_v45 = vmul.f32 1.442695, %v2046_v0  ;;  %v1411_v17 = vpop.eup %1410 }
 0x19a   :  { %855 = vadd.xlane.f32.xlu0 %v1409_v59  ;;  %v642_v1 = vpop.xlane.xlu1 %641  ;;  %v640_v10 = vpop.xlane.xlu0 %639 }
 0x19b   :  { %v2054_v36 = vsub.f32 %v1833_v23, %v642_v1  ;;  %v2057_v18 = vsub.f32 %v1830_v22, %v640_v10  ;;  %1424 = vpow2.f32 %v751_v9 }
 0x19c   :  { %v1413_v61 = vpop.eup %1412  ;;  %1426 = vpow2.f32 %v753_v45 }
 0x19d   :  { %v807_v49 = vmul.f32 1.442695, %v2057_v18  ;;  %857 = vadd.xlane.f32.xlu1 %v1411_v17  ;;  %v809_v39 = vmul.f32 1.442695, %v2054_v36  ;;  %v1415_v22 = vpop.eup %1414 }
 0x19e   :  { %911 = vadd.xlane.f32.xlu0 %v1413_v61  ;;  %v598_v6 = vpop.xlane.xlu1 %597  ;;  %v596_v13 = vpop.xlane.xlu0 %595 }
 0x19f   :  { %v2062_v59 = vsub.f32 %v1841_v27, %v598_v6  ;;  %v2065_v23 = vsub.f32 %v1838_v26, %v596_v13  ;;  %1428 = vpow2.f32 %v807_v49 }
 0x1a0   :  { %v1417_v1 = vpop.eup %1416  ;;  %1430 = vpow2.f32 %v809_v39 }
 0x1a1   :  { %v763_v9 = vmul.f32 1.442695, %v2065_v23  ;;  %913 = vadd.xlane.f32.xlu1 %v1415_v22  ;;  %v765_v45 = vmul.f32 1.442695, %v2062_v59  ;;  %v1419_v26 = vpop.eup %1418 }
 0x1a2   :  { %867 = vadd.xlane.f32.xlu0 %v1417_v1  ;;  %v654_v10 = vpop.xlane.xlu1 %653  ;;  %v652_v17 = vpop.xlane.xlu0 %651 }
 0x1a3   :  { %v2070_v61 = vsub.f32 %v1849_v30, %v654_v10  ;;  %v2073_v27 = vsub.f32 %v1846_v29, %v652_v17  ;;  %1432 = vpow2.f32 %v763_v9 }
 0x1a4   :  { %v1421_v6 = vpop.eup %1420  ;;  %1434 = vpow2.f32 %v765_v45 }
 0x1a5   :  { %v819_v49 = vmul.f32 1.442695, %v2073_v27  ;;  %869 = vadd.xlane.f32.xlu1 %v1419_v26  ;;  %v821_v39 = vmul.f32 1.442695, %v2070_v61  ;;  %v1423_v29 = vpop.eup %1422 }
 0x1a6   :  { %923 = vadd.xlane.f32.xlu0 %v1421_v6  ;;  %v594_v13 = vpop.xlane.xlu1 %593  ;;  %v592_v22 = vpop.xlane.xlu0 %591 }
 0x1a7   :  { %v2078_v1 = vsub.f32 %v1857_v34, %v594_v13  ;;  %v2081_v30 = vsub.f32 %v1854_v33, %v592_v22  ;;  %1436 = vpow2.f32 %v819_v49 }
 0x1a8   :  { %v1425_v10 = vpop.eup %1424  ;;  %1438 = vpow2.f32 %v821_v39 }
 0x1a9   :  { %v759_v9 = vmul.f32 1.442695, %v2081_v30  ;;  %925 = vadd.xlane.f32.xlu1 %v1423_v29  ;;  %v761_v45 = vmul.f32 1.442695, %v2078_v1  ;;  %v1427_v33 = vpop.eup %1426 }
 0x1aa   :  { %863 = vadd.xlane.f32.xlu0 %v1425_v10  ;;  %v650_v17 = vpop.xlane.xlu1 %649  ;;  %v648_v26 = vpop.xlane.xlu0 %647 }
 0x1ab   :  { %v2086_v6 = vsub.f32 %v1865_v42, %v650_v17  ;;  %v2089_v34 = vsub.f32 %v1862_v41, %v648_v26  ;;  %1440 = vpow2.f32 %v759_v9 }
 0x1ac   :  { %v1429_v13 = vpop.eup %1428  ;;  %1442 = vpow2.f32 %v761_v45 }
 0x1ad   :  { %v815_v49 = vmul.f32 1.442695, %v2089_v34  ;;  %865 = vadd.xlane.f32.xlu1 %v1427_v33  ;;  %v817_v39 = vmul.f32 1.442695, %v2086_v6  ;;  %v1431_v41 = vpop.eup %1430 }
 0x1ae   :  { %919 = vadd.xlane.f32.xlu0 %v1429_v13  ;;  %v606_v22 = vpop.xlane.xlu1 %605  ;;  %v604_v29 = vpop.xlane.xlu0 %603 }
 0x1af   :  { %v2094_v10 = vsub.f32 %v1873_v48, %v606_v22  ;;  %v2097_v42 = vsub.f32 %v1870_v47, %v604_v29  ;;  %1444 = vpow2.f32 %v815_v49 }
 0x1b0   :  { %v1433_v17 = vpop.eup %1432  ;;  %1446 = vpow2.f32 %v817_v39 }
 0x1b1   :  { %v771_v9 = vmul.f32 1.442695, %v2097_v42  ;;  %921 = vadd.xlane.f32.xlu1 %v1431_v41  ;;  %v773_v45 = vmul.f32 1.442695, %v2094_v10  ;;  %v1435_v47 = vpop.eup %1434 }
 0x1b2   :  { %875 = vadd.xlane.f32.xlu0 %v1433_v17  ;;  %v662_v26 = vpop.xlane.xlu1 %661  ;;  %v660_v33 = vpop.xlane.xlu0 %659 }
 0x1b3   :  { %v2102_v13 = vsub.f32 %v1881_v53, %v662_v26  ;;  %v2105_v48 = vsub.f32 %v1878_v52, %v660_v33  ;;  %1448 = vpow2.f32 %v771_v9 }
 0x1b4   :  { %v1437_v22 = vpop.eup %1436  ;;  %1450 = vpow2.f32 %v773_v45 }
 0x1b5   :  { %v827_v49 = vmul.f32 1.442695, %v2105_v48  ;;  %877 = vadd.xlane.f32.xlu1 %v1435_v47  ;;  %v829_v39 = vmul.f32 1.442695, %v2102_v13  ;;  %v1439_v52 = vpop.eup %1438 }
 0x1b6   :  { %931 = vadd.xlane.f32.xlu0 %v1437_v22  ;;  %v602_v29 = vpop.xlane.xlu1 %601  ;;  %v600_v41 = vpop.xlane.xlu0 %599 }
 0x1b7   :  { %v2110_v17 = vsub.f32 %v1889_v63, %v602_v29  ;;  %v2113_v53 = vsub.f32 %v1886_v60, %v600_v41  ;;  %1452 = vpow2.f32 %v827_v49 }
 0x1b8   :  { %v1441_v26 = vpop.eup %1440  ;;  %1454 = vpow2.f32 %v829_v39 }
 0x1b9   :  { %v767_v9 = vmul.f32 1.442695, %v2113_v53  ;;  %933 = vadd.xlane.f32.xlu1 %v1439_v52  ;;  %v769_v45 = vmul.f32 1.442695, %v2110_v17  ;;  %v1443_v60 = vpop.eup %1442 }
 0x1ba   :  { %871 = vadd.xlane.f32.xlu0 %v1441_v26  ;;  %v658_v33 = vpop.xlane.xlu1 %657  ;;  %v656_v47 = vpop.xlane.xlu0 %655 }
 0x1bb   :  { %v2118_v22 = vsub.f32 %v1897_v8, %v658_v33  ;;  %v2121_v63 = vsub.f32 %v1894_v5, %v656_v47  ;;  %1456 = vpow2.f32 %v767_v9 }
 0x1bc   :  { %v1445_v29 = vpop.eup %1444  ;;  %1458 = vpow2.f32 %v769_v45 }
 0x1bd   :  { %v823_v49 = vmul.f32 1.442695, %v2121_v63  ;;  %873 = vadd.xlane.f32.xlu1 %v1443_v60  ;;  %v825_v39 = vmul.f32 1.442695, %v2118_v22  ;;  %v1447_v5 = vpop.eup %1446 }
 0x1be   :  { %927 = vadd.xlane.f32.xlu0 %v1445_v29  ;;  %v614_v41 = vpop.xlane.xlu1 %613  ;;  %v612_v52 = vpop.xlane.xlu0 %611 }
 0x1bf   :  { %v2126_v26 = vsub.f32 %v1905_v16, %v614_v41  ;;  %v2129_v8 = vsub.f32 %v1902_v15, %v612_v52  ;;  %1460 = vpow2.f32 %v823_v49 }
 0x1c0   :  { %v1449_v33 = vpop.eup %1448  ;;  %1462 = vpow2.f32 %v825_v39 }
 0x1c1   :  { %v779_v9 = vmul.f32 1.442695, %v2129_v8  ;;  %929 = vadd.xlane.f32.xlu1 %v1447_v5  ;;  %v781_v45 = vmul.f32 1.442695, %v2126_v26  ;;  %v1451_v15 = vpop.eup %1450 }
 0x1c2   :  { %883 = vadd.xlane.f32.xlu0 %v1449_v33  ;;  %v670_v47 = vpop.xlane.xlu1 %669  ;;  %v668_v60 = vpop.xlane.xlu0 %667 }
 0x1c3   :  { %v2134_v29 = vsub.f32 %v1913_v21, %v670_v47  ;;  %v2137_v16 = vsub.f32 %v1910_v20, %v668_v60  ;;  %1464 = vpow2.f32 %v779_v9 }
 0x1c4   :  { %v1453_v41 = vpop.eup %1452  ;;  %1466 = vpow2.f32 %v781_v45 }
 0x1c5   :  { %v835_v49 = vmul.f32 1.442695, %v2137_v16  ;;  %885 = vadd.xlane.f32.xlu1 %v1451_v15  ;;  %v837_v39 = vmul.f32 1.442695, %v2134_v29  ;;  %v1455_v20 = vpop.eup %1454 }
 0x1c6   :  { %939 = vadd.xlane.f32.xlu0 %v1453_v41  ;;  %v610_v52 = vpop.xlane.xlu1 %609  ;;  %v608_v5 = vpop.xlane.xlu0 %607 }
 0x1c7   :  { %v2142_v33 = vsub.f32 %v1921_v31, %v610_v52  ;;  %v2145_v21 = vsub.f32 %v1918_v28, %v608_v5  ;;  %1468 = vpow2.f32 %v835_v49 }
 0x1c8   :  { %v1457_v47 = vpop.eup %1456  ;;  %1470 = vpow2.f32 %v837_v39 }
 0x1c9   :  { %v775_v9 = vmul.f32 1.442695, %v2145_v21  ;;  %941 = vadd.xlane.f32.xlu1 %v1455_v20  ;;  %v777_v45 = vmul.f32 1.442695, %v2142_v33  ;;  %v1459_v28 = vpop.eup %1458 }
 0x1ca   :  { %879 = vadd.xlane.f32.xlu0 %v1457_v47  ;;  %v666_v60 = vpop.xlane.xlu1 %665  ;;  %v664_v15 = vpop.xlane.xlu0 %663 }
 0x1cb   :  { %v2150_v41 = vsub.f32 %v1929_v43, %v666_v60  ;;  %v2153_v31 = vsub.f32 %v1926_v38, %v664_v15  ;;  %1472 = vpow2.f32 %v775_v9 }
 0x1cc   :  { %v1461_v52 = vpop.eup %1460  ;;  %1474 = vpow2.f32 %v777_v45 }
 0x1cd   :  { %2432 = vst [vmem:[#allocation7_spill] sm:$0xff] %v2150_v41  ;;  %v831_v49 = vmul.f32 1.442695, %v2153_v31  ;;  %881 = vadd.xlane.f32.xlu1 %v1459_v28  ;;  %v833_v39 = vmul.f32 1.442695, %v2150_v41  ;;  %v1463_v43 = vpop.eup %1462 }
 0x1ce   :  { %935 = vadd.xlane.f32.xlu0 %v1461_v52  ;;  %v622_v5 = vpop.xlane.xlu1 %621  ;;  %v620_v20 = vpop.xlane.xlu0 %619 }
 0x1cf   :  { %v2158_v47 = vsub.f32 %v1934_v56, %v620_v20  ;;  %1476 = vpow2.f32 %v831_v49  ;;  %v2161_v38 = vsub.f32 %v1937_v57, %v622_v5 }
 0x1d0   :  { %v1465_v60 = vpop.eup %1464  ;;  %1478 = vpow2.f32 %v833_v39 }
 0x1d1   :  { %2433 = vst [vmem:[#allocation8_spill] sm:$0xff] %v2158_v47  ;;  %2434 = vst [vmem:[#allocation9_spill] sm:$0xff] %v2161_v38  ;;  %v787_v9 = vmul.f32 1.442695, %v2158_v47  ;;  %937 = vadd.xlane.f32.xlu1 %v1463_v43  ;;  %v1467_v52 = vpop.eup %1466  ;;  %v789_v45 = vmul.f32 1.442695, %v2161_v38 }
 0x1d2   :  { %891 = vadd.xlane.f32.xlu0 %v1465_v60  ;;  %v678_v15 = vpop.xlane.xlu1 %677  ;;  %v676_v28 = vpop.xlane.xlu0 %675 }
 0x1d3   :  { %1480 = vpow2.f32 %v787_v9 }
 0x1d4   :  { %v1469_v41 = vpop.eup %1468  ;;  %1482 = vpow2.f32 %v789_v45 }
 0x1d5   :  { %893 = vadd.xlane.f32.xlu1 %v1467_v52  ;;  %v1471_v20 = vpop.eup %1470 }
 0x1d6   :  { %947 = vadd.xlane.f32.xlu0 %v1469_v41  ;;  %v618_v56 = vpop.xlane.xlu1 %617  ;;  %v616_v49 = vpop.xlane.xlu0 %615  ;;  %v2436_v41 = vld [vmem:[#allocation3_spill] sm:$0xff] }
 0x1d7   :  { %v2166_v57 = vsub.f32 %v1953_v19, %v618_v56  ;;  %v2169_v5 = vsub.f32 %v1950_v12, %v616_v49  ;;  %v2174_v38 = vsub.f32 %v2436_v41, %v678_v15  ;;  %v2437_v12 = vld [vmem:[#allocation4_spill] sm:$0xff]  ;;  %v2438_v49 = vld [vmem:[#allocation2_spill] sm:$0xff] }
 0x1d8   :  { %v1473_v43 = vpop.eup %1472  ;;  %v2183_v47 = vsub.f32 %v2438_v49, %v676_v28 }
 0x1d9   :  { %2435 = vst [vmem:[#allocation10_spill] sm:$0xff] %v2169_v5  ;;  %v785_v39 = vmul.f32 1.442695, %v2166_v57  ;;  %v783_v60 = vmul.f32 1.442695, %v2169_v5  ;;  %949 = vadd.xlane.f32.xlu1 %v1471_v20  ;;  %v1475_v45 = vpop.eup %1474 }
 0x1da   :  { %887 = vadd.xlane.f32.xlu0 %v1473_v43  ;;  %v674_v9 = vpop.xlane.xlu1 %673  ;;  %v672_v52 = vpop.xlane.xlu0 %671  ;;  %2439 = vst [vmem:[#allocation3_spill] sm:$0xff] %v2183_v47  ;;  %v845_v15 = vmul.f32 1.442695, %v2174_v38 }
 0x1db   :  { %1484 = vpow2.f32 %v785_v39  ;;  %v2177_v19 = vsub.f32 %v1961_v32, %v674_v9  ;;  %v2180_v56 = vsub.f32 %v2437_v12, %v672_v52  ;;  %v843_v39 = vmul.f32 1.442695, %v2183_v47 }
 0x1dc   :  { %1486 = vpow2.f32 %v783_v60  ;;  %v1477_v5 = vpop.eup %1476 }
 0x1dd   :  { %v841_v20 = vmul.f32 1.442695, %v2177_v19  ;;  %v839_v43 = vmul.f32 1.442695, %v2180_v56  ;;  %889 = vadd.xlane.f32.xlu1 %v1475_v45  ;;  %v1479_v32 = vpop.eup %1478 }
 0x1de   :  { %943 = vadd.xlane.f32.xlu0 %v1477_v5 }
 0x1df   :  { %1488 = vpow2.f32 %v841_v20 }
 0x1e0   :  { %1490 = vpow2.f32 %v839_v43  ;;  %v1481_v9 = vpop.eup %1480 }
 0x1e1   :  { %945 = vadd.xlane.f32.xlu1 %v1479_v32  ;;  %1492 = vpow2.f32 %v845_v15  ;;  %v1483_v28 = vpop.eup %1482 }
 0x1e2   :  { %899 = vadd.xlane.f32.xlu0 %v1481_v9  ;;  %1494 = vpow2.f32 %v843_v39 }
 0x1e5   :  { %901 = vadd.xlane.f32.xlu1 %v1483_v28 }
 0x1e8   :  { %v1485_v60 = vpop.eup %1484 }
 0x1e9   :  { %v1487_v52 = vpop.eup %1486  ;;  %897 = vadd.xlane.f32.xlu1 %v1485_v60 }
 0x1ea   :  { %895 = vadd.xlane.f32.xlu0 %v1487_v52 }
 0x1ec   :  { %v1489_v41 = vpop.eup %1488 }
 0x1ed   :  { %v1491_v5 = vpop.eup %1490  ;;  %953 = vadd.xlane.f32.xlu1 %v1489_v41 }
 0x1ee   :  { %951 = vadd.xlane.f32.xlu0 %v1491_v5  ;;  %v1493_v12 = vpop.eup %1492 }
 0x1ef   :  { %v1495_v45 = vpop.eup %1494 }
 0x1f1   :  { %957 = vadd.xlane.f32.xlu1 %v1493_v12 }
 0x1f2   :  { %955 = vadd.xlane.f32.xlu0 %v1495_v45 }
 0x20a   :  { %v852_v49 = vpop.xlane.xlu0 %851 }
 0x20b   :  { %1496 = vlog2.f32 %v852_v49 }
 0x20e   :  { %v854_v20 = vpop.xlane.xlu1 %853 }
 0x20f   :  { %1498 = vlog2.f32 %v854_v20  ;;  %v908_v43 = vpop.xlane.xlu0 %907 }
 0x210   :  { %1500 = vlog2.f32 %v908_v43 }
 0x212   :  { %v910_v15 = vpop.xlane.xlu1 %909 }
 0x213   :  { %1502 = vlog2.f32 %v910_v15  ;;  %v848_v32 = vpop.xlane.xlu0 %847 }
 0x214   :  { %1504 = vlog2.f32 %v848_v32 }
 0x216   :  { %v850_v39 = vpop.xlane.xlu1 %849 }
 0x217   :  { %v904_v9 = vpop.xlane.xlu0 %903  ;;  %1506 = vlog2.f32 %v850_v39 }
 0x218   :  { %v1497_v28 = vpop.eup %1496  ;;  %1508 = vlog2.f32 %v904_v9  ;;  %v2440_v9 = vld [vmem:[#allocation5_spill] sm:$0xff] }
 0x219   :  { %v964_v60 = vmul.f32 0.6931472, %v1497_v28 }
 0x21a   :  { %v906_v52 = vpop.xlane.xlu1 %905 }
 0x21b   :  { %v860_v41 = vpop.xlane.xlu0 %859  ;;  %v1073_v12 = vsub.f32 %v1966_v46, %v964_v60  ;;  %1510 = vlog2.f32 %v906_v52 }
 0x21c   :  { %v1499_v5 = vpop.eup %1498  ;;  %1512 = vlog2.f32 %v860_v41 }
 0x21d   :  { %v1501_v45 = vpop.eup %1500  ;;  %v966_v49 = vmul.f32 0.6931472, %v1499_v5  ;;  %1129 = vst [vmem:[%s2416_s3 + $0x10] sm:$0xff] %v1073_v12 }
 0x21e   :  { %v1020_v20 = vmul.f32 0.6931472, %v1501_v45  ;;  %v862_v15 = vpop.xlane.xlu1 %861 }
 0x21f   :  { %v1074_v43 = vsub.f32 %v1973_v4, %v966_v49  ;;  %v916_v32 = vpop.xlane.xlu0 %915  ;;  %1514 = vlog2.f32 %v862_v15 }
 0x220   :  { %v1503_v39 = vpop.eup %1502  ;;  %v1101_v28 = vsub.f32 %v2440_v9, %v1020_v20  ;;  %1516 = vlog2.f32 %v916_v32 }
 0x221   :  { %v1505_v47 = vpop.eup %1504  ;;  %1130 = vst [vmem:[%s2416_s3 + $0x18] sm:$0xff] %v1074_v43  ;;  %v1022_v46 = vmul.f32 0.6931472, %v1503_v39 }
 0x222   :  { %1157 = vst [vmem:[%s2416_s3 + $0xf0] sm:$0xff] %v1101_v28  ;;  %v960_v60 = vmul.f32 0.6931472, %v1505_v47  ;;  %v918_v52 = vpop.xlane.xlu1 %917 }
 0x223   :  { %v1102_v4 = vsub.f32 %v1981_v40, %v1022_v46  ;;  %v856_v41 = vpop.xlane.xlu0 %855  ;;  %1518 = vlog2.f32 %v918_v52 }
 0x224   :  { %v1071_v5 = vsub.f32 %v1977_v24, %v960_v60  ;;  %v1507_v12 = vpop.eup %1506  ;;  %1520 = vlog2.f32 %v856_v41  ;;  %v2441_v60 = vld [vmem:[#allocation6_spill] sm:$0xff] }
 0x225   :  { %1158 = vst [vmem:[%s2416_s3 + $0xf8] sm:$0xff] %v1102_v4  ;;  %v1509_v45 = vpop.eup %1508  ;;  %v962_v49 = vmul.f32 0.6931472, %v1507_v12 }
 0x226   :  { %1127 = vst [vmem:[%s2416_s3] sm:$0xff] %v1071_v5  ;;  %v1016_v47 = vmul.f32 0.6931472, %v1509_v45  ;;  %v858_v20 = vpop.xlane.xlu1 %857 }
 0x227   :  { %v912_v40 = vpop.xlane.xlu0 %911  ;;  %v1072_v43 = vsub.f32 %v1993_v25, %v962_v49  ;;  %1522 = vlog2.f32 %v858_v20 }
 0x228   :  { %v1511_v24 = vpop.eup %1510  ;;  %v1099_v15 = vsub.f32 %v1984_v35, %v1016_v47  ;;  %1524 = vlog2.f32 %v912_v40 }
 0x229   :  { %v1513_v32 = vpop.eup %1512  ;;  %1128 = vst [vmem:[%s2416_s3 + $0x8] sm:$0xff] %v1072_v43  ;;  %v1018_v39 = vmul.f32 0.6931472, %v1511_v24 }
 0x22a   :  { %1155 = vst [vmem:[%s2416_s3 + $0xe0] sm:$0xff] %v1099_v15  ;;  %v972_v9 = vmul.f32 0.6931472, %v1513_v32  ;;  %v914_v28 = vpop.xlane.xlu1 %913 }
 0x22b   :  { %v868_v46 = vpop.xlane.xlu0 %867  ;;  %v1100_v25 = vsub.f32 %v2441_v60, %v1018_v39  ;;  %1526 = vlog2.f32 %v914_v28 }
 0x22c   :  { %v1515_v4 = vpop.eup %1514  ;;  %v1077_v35 = vsub.f32 %v2001_v3, %v972_v9  ;;  %1528 = vlog2.f32 %v868_v46 }
 0x22d   :  { %v1517_v52 = vpop.eup %1516  ;;  %1156 = vst [vmem:[%s2416_s3 + $0xe8] sm:$0xff] %v1100_v25  ;;  %v974_v41 = vmul.f32 0.6931472, %v1515_v4 }
 0x22e   :  { %1133 = vst [vmem:[%s2416_s3 + $0x30] sm:$0xff] %v1077_v35  ;;  %v1028_v5 = vmul.f32 0.6931472, %v1517_v52  ;;  %v870_v12 = vpop.xlane.xlu1 %869 }
 0x22f   :  { %v924_v45 = vpop.xlane.xlu0 %923  ;;  %v1078_v49 = vsub.f32 %v1998_v37, %v974_v41  ;;  %1530 = vlog2.f32 %v870_v12 }
 0x230   :  { %v1519_v47 = vpop.eup %1518  ;;  %v1105_v3 = vsub.f32 %v2009_v51, %v1028_v5  ;;  %1532 = vlog2.f32 %v924_v45 }
 0x231   :  { %v1521_v20 = vpop.eup %1520  ;;  %1134 = vst [vmem:[%s2416_s3 + $0x38] sm:$0xff] %v1078_v49  ;;  %v1030_v40 = vmul.f32 0.6931472, %v1519_v47 }
 0x232   :  { %1161 = vst [vmem:[%s2416_s3 + $0x110] sm:$0xff] %v1105_v3  ;;  %v968_v43 = vmul.f32 0.6931472, %v1521_v20  ;;  %v926_v24 = vpop.xlane.xlu1 %925 }
 0x233   :  { %v864_v15 = vpop.xlane.xlu0 %863  ;;  %v1106_v37 = vsub.f32 %v2006_v44, %v1030_v40  ;;  %1534 = vlog2.f32 %v926_v24 }
 0x234   :  { %v1523_v32 = vpop.eup %1522  ;;  %v1075_v51 = vsub.f32 %v2017_v62, %v968_v43  ;;  %1536 = vlog2.f32 %v864_v15 }
 0x235   :  { %v1525_v39 = vpop.eup %1524  ;;  %1162 = vst [vmem:[%s2416_s3 + $0x118] sm:$0xff] %v1106_v37  ;;  %v970_v9 = vmul.f32 0.6931472, %v1523_v32 }
 0x236   :  { %1131 = vst [vmem:[%s2416_s3 + $0x20] sm:$0xff] %v1075_v51  ;;  %v1024_v28 = vmul.f32 0.6931472, %v1525_v39  ;;  %v866_v46 = vpop.xlane.xlu1 %865 }
 0x237   :  { %v920_v60 = vpop.xlane.xlu0 %919  ;;  %v1076_v44 = vsub.f32 %v2014_v55, %v970_v9  ;;  %1538 = vlog2.f32 %v866_v46 }
 0x238   :  { %v1527_v25 = vpop.eup %1526  ;;  %v1103_v62 = vsub.f32 %v2025_v2, %v1024_v28  ;;  %1540 = vlog2.f32 %v920_v60 }
 0x239   :  { %v1529_v4 = vpop.eup %1528  ;;  %1132 = vst [vmem:[%s2416_s3 + $0x28] sm:$0xff] %v1076_v44  ;;  %v1026_v35 = vmul.f32 0.6931472, %v1527_v25 }
 0x23a   :  { %1159 = vst [vmem:[%s2416_s3 + $0x100] sm:$0xff] %v1103_v62  ;;  %v980_v52 = vmul.f32 0.6931472, %v1529_v4  ;;  %v922_v41 = vpop.xlane.xlu1 %921 }
 0x23b   :  { %v876_v5 = vpop.xlane.xlu0 %875  ;;  %v1104_v55 = vsub.f32 %v2022_v58, %v1026_v35  ;;  %1542 = vlog2.f32 %v922_v41 }
 0x23c   :  { %v1531_v12 = vpop.eup %1530  ;;  %v1081_v2 = vsub.f32 %v2033_v7, %v980_v52  ;;  %1544 = vlog2.f32 %v876_v5 }
 0x23d   :  { %v1533_v45 = vpop.eup %1532  ;;  %1160 = vst [vmem:[%s2416_s3 + $0x108] sm:$0xff] %v1104_v55  ;;  %v982_v49 = vmul.f32 0.6931472, %v1531_v12 }
 0x23e   :  { %1137 = vst [vmem:[%s2416_s3 + $0x50] sm:$0xff] %v1081_v2  ;;  %v1036_v47 = vmul.f32 0.6931472, %v1533_v45  ;;  %v878_v3 = vpop.xlane.xlu1 %877 }
 0x23f   :  { %v932_v20 = vpop.xlane.xlu0 %931  ;;  %v1082_v58 = vsub.f32 %v2030_v54, %v982_v49  ;;  %1546 = vlog2.f32 %v878_v3 }
 0x240   :  { %v1535_v40 = vpop.eup %1534  ;;  %v1109_v7 = vsub.f32 %v2041_v11, %v1036_v47  ;;  %1548 = vlog2.f32 %v932_v20 }
 0x241   :  { %v1537_v43 = vpop.eup %1536  ;;  %1138 = vst [vmem:[%s2416_s3 + $0x58] sm:$0xff] %v1082_v58  ;;  %v1038_v24 = vmul.f32 0.6931472, %v1535_v40 }
 0x242   :  { %1165 = vst [vmem:[%s2416_s3 + $0x130] sm:$0xff] %v1109_v7  ;;  %v976_v15 = vmul.f32 0.6931472, %v1537_v43  ;;  %v934_v37 = vpop.xlane.xlu1 %933 }
 0x243   :  { %v872_v32 = vpop.xlane.xlu0 %871  ;;  %v1110_v54 = vsub.f32 %v2038_v50, %v1038_v24  ;;  %1550 = vlog2.f32 %v934_v37 }
 0x244   :  { %v1539_v51 = vpop.eup %1538  ;;  %v1079_v11 = vsub.f32 %v2049_v14, %v976_v15  ;;  %1552 = vlog2.f32 %v872_v32 }
 0x245   :  { %v1541_v39 = vpop.eup %1540  ;;  %1166 = vst [vmem:[%s2416_s3 + $0x138] sm:$0xff] %v1110_v54  ;;  %v978_v9 = vmul.f32 0.6931472, %v1539_v51 }
 0x246   :  { %1135 = vst [vmem:[%s2416_s3 + $0x40] sm:$0xff] %v1079_v11  ;;  %v1032_v28 = vmul.f32 0.6931472, %v1541_v39  ;;  %v874_v46 = vpop.xlane.xlu1 %873 }
 0x247   :  { %v928_v60 = vpop.xlane.xlu0 %927  ;;  %v1080_v50 = vsub.f32 %v2046_v0, %v978_v9  ;;  %1554 = vlog2.f32 %v874_v46 }
 0x248   :  { %v1543_v44 = vpop.eup %1542  ;;  %v1107_v14 = vsub.f32 %v2057_v18, %v1032_v28  ;;  %1556 = vlog2.f32 %v928_v60 }
 0x249   :  { %v1545_v25 = vpop.eup %1544  ;;  %1136 = vst [vmem:[%s2416_s3 + $0x48] sm:$0xff] %v1080_v50  ;;  %v1034_v62 = vmul.f32 0.6931472, %v1543_v44 }
 0x24a   :  { %1163 = vst [vmem:[%s2416_s3 + $0x120] sm:$0xff] %v1107_v14  ;;  %v988_v4 = vmul.f32 0.6931472, %v1545_v25  ;;  %v930_v35 = vpop.xlane.xlu1 %929 }
 0x24b   :  { %v884_v52 = vpop.xlane.xlu0 %883  ;;  %v1108_v0 = vsub.f32 %v2054_v36, %v1034_v62  ;;  %1558 = vlog2.f32 %v930_v35 }
 0x24c   :  { %v1547_v41 = vpop.eup %1546  ;;  %v1085_v18 = vsub.f32 %v2065_v23, %v988_v4  ;;  %1560 = vlog2.f32 %v884_v52 }
 0x24d   :  { %v1549_v5 = vpop.eup %1548  ;;  %1164 = vst [vmem:[%s2416_s3 + $0x128] sm:$0xff] %v1108_v0  ;;  %v990_v55 = vmul.f32 0.6931472, %v1547_v41 }
 0x24e   :  { %1141 = vst [vmem:[%s2416_s3 + $0x70] sm:$0xff] %v1085_v18  ;;  %v1044_v12 = vmul.f32 0.6931472, %v1549_v5  ;;  %v886_v2 = vpop.xlane.xlu1 %885 }
 0x24f   :  { %v940_v45 = vpop.xlane.xlu0 %939  ;;  %v1086_v36 = vsub.f32 %v2062_v59, %v990_v55  ;;  %1562 = vlog2.f32 %v886_v2 }
 0x250   :  { %v1551_v49 = vpop.eup %1550  ;;  %v1113_v23 = vsub.f32 %v2073_v27, %v1044_v12  ;;  %1564 = vlog2.f32 %v940_v45 }
 0x251   :  { %v1553_v47 = vpop.eup %1552  ;;  %1142 = vst [vmem:[%s2416_s3 + $0x78] sm:$0xff] %v1086_v36  ;;  %v1046_v3 = vmul.f32 0.6931472, %v1551_v49 }
 0x252   :  { %1169 = vst [vmem:[%s2416_s3 + $0x150] sm:$0xff] %v1113_v23  ;;  %v984_v20 = vmul.f32 0.6931472, %v1553_v47  ;;  %v942_v58 = vpop.xlane.xlu1 %941 }
 0x253   :  { %v880_v40 = vpop.xlane.xlu0 %879  ;;  %v1114_v59 = vsub.f32 %v2070_v61, %v1046_v3  ;;  %1566 = vlog2.f32 %v942_v58 }
 0x254   :  { %v1555_v7 = vpop.eup %1554  ;;  %v1083_v27 = vsub.f32 %v2081_v30, %v984_v20  ;;  %1568 = vlog2.f32 %v880_v40 }
 0x255   :  { %v1557_v43 = vpop.eup %1556  ;;  %1170 = vst [vmem:[%s2416_s3 + $0x158] sm:$0xff] %v1114_v59  ;;  %v986_v24 = vmul.f32 0.6931472, %v1555_v7 }
 0x256   :  { %1139 = vst [vmem:[%s2416_s3 + $0x60] sm:$0xff] %v1083_v27  ;;  %v1040_v15 = vmul.f32 0.6931472, %v1557_v43  ;;  %v882_v37 = vpop.xlane.xlu1 %881 }
 0x257   :  { %v936_v32 = vpop.xlane.xlu0 %935  ;;  %v1084_v61 = vsub.f32 %v2078_v1, %v986_v24  ;;  %1570 = vlog2.f32 %v882_v37 }
 0x258   :  { %v1559_v54 = vpop.eup %1558  ;;  %v1111_v30 = vsub.f32 %v2089_v34, %v1040_v15  ;;  %1572 = vlog2.f32 %v936_v32 }
 0x259   :  { %v1561_v51 = vpop.eup %1560  ;;  %1140 = vst [vmem:[%s2416_s3 + $0x68] sm:$0xff] %v1084_v61  ;;  %v1042_v11 = vmul.f32 0.6931472, %v1559_v54 }
 0x25a   :  { %1167 = vst [vmem:[%s2416_s3 + $0x140] sm:$0xff] %v1111_v30  ;;  %v996_v39 = vmul.f32 0.6931472, %v1561_v51  ;;  %v938_v9 = vpop.xlane.xlu1 %937 }
 0x25b   :  { %v892_v28 = vpop.xlane.xlu0 %891  ;;  %v1112_v1 = vsub.f32 %v2086_v6, %v1042_v11  ;;  %1574 = vlog2.f32 %v938_v9 }
 0x25c   :  { %v1563_v46 = vpop.eup %1562  ;;  %v1089_v34 = vsub.f32 %v2097_v42, %v996_v39  ;;  %1576 = vlog2.f32 %v892_v28 }
 0x25d   :  { %v1565_v60 = vpop.eup %1564  ;;  %1168 = vst [vmem:[%s2416_s3 + $0x148] sm:$0xff] %v1112_v1  ;;  %v998_v50 = vmul.f32 0.6931472, %v1563_v46 }
 0x25e   :  { %1145 = vst [vmem:[%s2416_s3 + $0x90] sm:$0xff] %v1089_v34  ;;  %v1052_v44 = vmul.f32 0.6931472, %v1565_v60  ;;  %v894_v14 = vpop.xlane.xlu1 %893 }
 0x25f   :  { %v948_v25 = vpop.xlane.xlu0 %947  ;;  %v1090_v6 = vsub.f32 %v2094_v10, %v998_v50  ;;  %1578 = vlog2.f32 %v894_v14 }
 0x260   :  { %v1567_v62 = vpop.eup %1566  ;;  %v1117_v42 = vsub.f32 %v2105_v48, %v1052_v44  ;;  %1580 = vlog2.f32 %v948_v25  ;;  %v2442_v44 = vld [vmem:[#allocation7_spill] sm:$0xff]  ;;  %v2443_v25 = vld [vmem:[#allocation8_spill] sm:$0xff] }
 0x261   :  { %v1569_v4 = vpop.eup %1568  ;;  %1146 = vst [vmem:[%s2416_s3 + $0x98] sm:$0xff] %v1090_v6  ;;  %v1054_v35 = vmul.f32 0.6931472, %v1567_v62  ;;  %v2444_v62 = vld [vmem:[#allocation9_spill] sm:$0xff] }
 0x262   :  { %1173 = vst [vmem:[%s2416_s3 + $0x170] sm:$0xff] %v1117_v42  ;;  %v992_v52 = vmul.f32 0.6931472, %v1569_v4  ;;  %v950_v0 = vpop.xlane.xlu1 %949 }
 0x263   :  { %v888_v41 = vpop.xlane.xlu0 %887  ;;  %v1118_v10 = vsub.f32 %v2102_v13, %v1054_v35  ;;  %1582 = vlog2.f32 %v950_v0 }
 0x264   :  { %v1571_v18 = vpop.eup %1570  ;;  %v1087_v48 = vsub.f32 %v2113_v53, %v992_v52  ;;  %1584 = vlog2.f32 %v888_v41 }
 0x265   :  { %v1573_v5 = vpop.eup %1572  ;;  %1174 = vst [vmem:[%s2416_s3 + $0x178] sm:$0xff] %v1118_v10  ;;  %v994_v55 = vmul.f32 0.6931472, %v1571_v18  ;;  %v2445_v18 = vld [vmem:[#allocation10_spill] sm:$0xff] }
 0x266   :  { %1143 = vst [vmem:[%s2416_s3 + $0x80] sm:$0xff] %v1087_v48  ;;  %v1048_v12 = vmul.f32 0.6931472, %v1573_v5  ;;  %v890_v2 = vpop.xlane.xlu1 %889 }
 0x267   :  { %v944_v45 = vpop.xlane.xlu0 %943  ;;  %v1088_v13 = vsub.f32 %v2110_v17, %v994_v55  ;;  %1586 = vlog2.f32 %v890_v2 }
 0x268   :  { %v1575_v36 = vpop.eup %1574  ;;  %v1115_v53 = vsub.f32 %v2121_v63, %v1048_v12  ;;  %1588 = vlog2.f32 %v944_v45 }
 0x269   :  { %v1577_v49 = vpop.eup %1576  ;;  %1144 = vst [vmem:[%s2416_s3 + $0x88] sm:$0xff] %v1088_v13  ;;  %v1050_v23 = vmul.f32 0.6931472, %v1575_v36 }
 0x26a   :  { %1171 = vst [vmem:[%s2416_s3 + $0x160] sm:$0xff] %v1115_v53  ;;  %v1004_v47 = vmul.f32 0.6931472, %v1577_v49  ;;  %v946_v3 = vpop.xlane.xlu1 %945 }
 0x26b   :  { %v900_v20 = vpop.xlane.xlu0 %899  ;;  %v1116_v17 = vsub.f32 %v2118_v22, %v1050_v23  ;;  %1590 = vlog2.f32 %v946_v3  ;;  %v2446_v23 = vld [vmem:[#allocation3_spill] sm:$0xff] }
 0x26c   :  { %v1579_v58 = vpop.eup %1578  ;;  %v1093_v63 = vsub.f32 %v2129_v8, %v1004_v47  ;;  %1592 = vlog2.f32 %v900_v20 }
 0x26d   :  { %v1581_v40 = vpop.eup %1580  ;;  %1172 = vst [vmem:[%s2416_s3 + $0x168] sm:$0xff] %v1116_v17  ;;  %v1006_v59 = vmul.f32 0.6931472, %v1579_v58 }
 0x26e   :  { %1149 = vst [vmem:[%s2416_s3 + $0xb0] sm:$0xff] %v1093_v63  ;;  %v1060_v7 = vmul.f32 0.6931472, %v1581_v40  ;;  %v902_v27 = vpop.xlane.xlu1 %901 }
 0x26f   :  { %v1094_v43 = vsub.f32 %v2126_v26, %v1006_v59  ;;  %1594 = vlog2.f32 %v902_v27 }
 0x270   :  { %v1583_v22 = vpop.eup %1582  ;;  %v1121_v24 = vsub.f32 %v2137_v16, %v1060_v7 }
 0x271   :  { %v1585_v8 = vpop.eup %1584  ;;  %1150 = vst [vmem:[%s2416_s3 + $0xb8] sm:$0xff] %v1094_v43  ;;  %v1062_v15 = vmul.f32 0.6931472, %v1583_v22 }
 0x272   :  { %1177 = vst [vmem:[%s2416_s3 + $0x190] sm:$0xff] %v1121_v24  ;;  %v1000_v37 = vmul.f32 0.6931472, %v1585_v8  ;;  %v898_v32 = vpop.xlane.xlu1 %897 }
 0x273   :  { %v896_v61 = vpop.xlane.xlu0 %895  ;;  %v1122_v54 = vsub.f32 %v2134_v29, %v1062_v15  ;;  %1596 = vlog2.f32 %v898_v32 }
 0x274   :  { %v1587_v26 = vpop.eup %1586  ;;  %v1091_v30 = vsub.f32 %v2145_v21, %v1000_v37  ;;  %1598 = vlog2.f32 %v896_v61 }
 0x275   :  { %v1589_v16 = vpop.eup %1588  ;;  %1178 = vst [vmem:[%s2416_s3 + $0x198] sm:$0xff] %v1122_v54  ;;  %v1002_v51 = vmul.f32 0.6931472, %v1587_v26 }
 0x276   :  { %1147 = vst [vmem:[%s2416_s3 + $0xa0] sm:$0xff] %v1091_v30  ;;  %v1056_v11 = vmul.f32 0.6931472, %v1589_v16  ;;  %v954_v39 = vpop.xlane.xlu1 %953 }
 0x277   :  { %v952_v9 = vpop.xlane.xlu0 %951  ;;  %v1092_v29 = vsub.f32 %v2142_v33, %v1002_v51  ;;  %1600 = vlog2.f32 %v954_v39 }
 0x278   :  { %v1591_v28 = vpop.eup %1590  ;;  %v1119_v21 = vsub.f32 %v2153_v31, %v1056_v11  ;;  %1602 = vlog2.f32 %v952_v9 }
 0x279   :  { %v1593_v1 = vpop.eup %1592  ;;  %1148 = vst [vmem:[%s2416_s3 + $0xa8] sm:$0xff] %v1092_v29  ;;  %v1058_v46 = vmul.f32 0.6931472, %v1591_v28 }
 0x27a   :  { %1175 = vst [vmem:[%s2416_s3 + $0x180] sm:$0xff] %v1119_v21  ;;  %v1012_v34 = vmul.f32 0.6931472, %v1593_v1  ;;  %v958_v60 = vpop.xlane.xlu1 %957 }
 0x27b   :  { %v956_v50 = vpop.xlane.xlu0 %955  ;;  %v1120_v33 = vsub.f32 %v2442_v44, %v1058_v46  ;;  %1604 = vlog2.f32 %v958_v60 }
 0x27c   :  { %v1595_v14 = vpop.eup %1594  ;;  %v1097_v31 = vsub.f32 %v2443_v25, %v1012_v34  ;;  %1606 = vlog2.f32 %v956_v50 }
 0x27d   :  { %1176 = vst [vmem:[%s2416_s3 + $0x188] sm:$0xff] %v1120_v33  ;;  %v1014_v6 = vmul.f32 0.6931472, %v1595_v14 }
 0x27e   :  { %1153 = vst [vmem:[%s2416_s3 + $0xd0] sm:$0xff] %v1097_v31 }
 0x27f   :  { %v1098_v42 = vsub.f32 %v2444_v62, %v1014_v6 }
 0x280   :  { %v1597_v4 = vpop.eup %1596 }
 0x281   :  { %v1599_v35 = vpop.eup %1598  ;;  %1154 = vst [vmem:[%s2416_s3 + $0xd8] sm:$0xff] %v1098_v42  ;;  %v1010_v52 = vmul.f32 0.6931472, %v1597_v4 }
 0x282   :  { %v1008_v0 = vmul.f32 0.6931472, %v1599_v35 }
 0x283   :  { %v1096_v41 = vsub.f32 %v2166_v57, %v1010_v52 }
 0x284   :  { %v1601_v10 = vpop.eup %1600  ;;  %v1095_v48 = vsub.f32 %v2445_v18, %v1008_v0 }
 0x285   :  { %v1603_v5 = vpop.eup %1602  ;;  %1152 = vst [vmem:[%s2416_s3 + $0xc8] sm:$0xff] %v1096_v41  ;;  %v1066_v55 = vmul.f32 0.6931472, %v1601_v10 }
 0x286   :  { %1151 = vst [vmem:[%s2416_s3 + $0xc0] sm:$0xff] %v1095_v48  ;;  %v1064_v12 = vmul.f32 0.6931472, %v1603_v5 }
 0x287   :  { %v1124_v2 = vsub.f32 %v2177_v19, %v1066_v55 }
 0x288   :  { %v1605_v45 = vpop.eup %1604  ;;  %v1123_v13 = vsub.f32 %v2180_v56, %v1064_v12 }
 0x289   :  { %v1607_v57 = vpop.eup %1606  ;;  %1180 = vst [vmem:[%s2416_s3 + $0x1a8] sm:$0xff] %v1124_v2  ;;  %v1070_v36 = vmul.f32 0.6931472, %v1605_v45 }
 0x28a   :  { %1179 = vst [vmem:[%s2416_s3 + $0x1a0] sm:$0xff] %v1123_v13  ;;  %v1068_v53 = vmul.f32 0.6931472, %v1607_v57 }
 0x28b   :  { %v1126_v49 = vsub.f32 %v2174_v38, %v1070_v36 }
 0x28c   :  { %v1125_v47 = vsub.f32 %v2446_v23, %v1068_v53 }
 0x28d   :  { %1182 = vst [vmem:[%s2416_s3 + $0x1b8] sm:$0xff] %v1126_v49 }
 0x28e   :  { %1181 = vst [vmem:[%s2416_s3 + $0x1b0] sm:$0xff] %v1125_v47 }

</bundles_post_ra>
